<compile_context>
chip_gen: v7x
topology: tpu7x:2x2x1
jax: 0.10.0
libtpu: 0.0.40
codegen_flags: <defaults>
</compile_context>

<pallas_src>
import functools
import math

import jax
import jax.numpy as jnp
from jax.experimental import pallas as pl
from jax.experimental.pallas import tpu as pltpu

_MIB = 1024 * 1024


def _pick_tile(dim, target, align):
    """Largest multiple of `align` that divides `dim` and is <= target, else `dim`."""
    if dim <= target:
        return dim
    t = (target // align) * align
    while t >= align:
        if dim % t == 0:
            return t
        t -= align
    return dim


# -----------------------------------------------------------------------------
# Kernel 1: QKV projection.  One matmul per M tile; the whole (K, N) weight
# stays resident (constant index_map -> fetched once).
# -----------------------------------------------------------------------------
def _linear_kernel(x_ref, w_ref, b_ref, o_ref):
    acc = jnp.dot(x_ref[...], w_ref[...], preferred_element_type=jnp.float32)
    o_ref[...] = (acc + b_ref[...].astype(jnp.float32)).astype(o_ref.dtype)


def pallas_linear(x2d, w, b, *, out_dtype=None, tile_m=512):
    """(M, K) @ (K, N) + (N,); M tiled, full-K single-shot matmul per tile."""
    M, K = x2d.shape
    N = w.shape[1]
    out_dtype = out_dtype if out_dtype is not None else x2d.dtype
    tm = _pick_tile(M, tile_m, 8)
    itemsize = jnp.dtype(x2d.dtype).itemsize
    # double-buffered x/out blocks + single weight/bias block + fp32 staging
    budget = 2 * (tm * K + tm * N) * itemsize + (K * N + N) * itemsize + tm * N * 4
    vmem_limit = int(min(56 * _MIB, max(32 * _MIB, budget * 2)))
    return pl.pallas_call(
        _linear_kernel,
        out_shape=jax.ShapeDtypeStruct((M, N), out_dtype),
        grid=(M // tm,),
        in_specs=[
            pl.BlockSpec((tm, K), lambda i: (i, 0)),
            pl.BlockSpec((K, N), lambda i: (0, 0)),
            pl.BlockSpec((1, N), lambda i: (0, 0)),
        ],
        out_specs=pl.BlockSpec((tm, N), lambda i: (i, 0)),
        compiler_params=pltpu.CompilerParams(
            dimension_semantics=("parallel",),
            vmem_limit_bytes=vmem_limit),
    )(x2d, w, b.reshape(1, N))


# -----------------------------------------------------------------------------
# Kernel 2: fused multi-head attention + output projection, query-tiled.
# -----------------------------------------------------------------------------
def _mha_proj_kernel(q_ref, kt_ref, v_ref, wp_ref, bp_ref, o_ref, *,
                     head_nums, head_dim, batch_block):
    bias = bp_ref[...].astype(jnp.float32)
    for wb in range(batch_block):          # static: several windows / batch elems per step
        q = q_ref[wb]                      # (TILE_Q, planes) bf16 (softmax scale pre-folded)
        kt = kt_ref[wb]                    # (planes, Lk)     bf16, lane-dense along Lk
        v = v_ref[wb]                      # (Lk, planes)     bf16, packed head-major
        head_outs = []
        for h in range(head_nums):         # static unroll: all heads in ONE grid step
            lo = h * head_dim
            qh = q[:, lo:lo + head_dim]    # small lane-offset slice (TILE_Q x D)
            khT = kt[lo:lo + head_dim, :]  # sublane-aligned slice; no in-kernel transpose
            vh = v[:, lo:lo + head_dim]
            s = jnp.dot(qh, khT, preferred_element_type=jnp.float32)   # (TILE_Q, Lk) f32
            m = jnp.max(s, axis=-1, keepdims=True)
            p = jnp.exp(s - m)
            l = jnp.sum(p, axis=-1, keepdims=True)
            oh = jnp.dot(p.astype(vh.dtype), vh, preferred_element_type=jnp.float32)
            # EUP reciprocal; cast to bf16 early so the concat slab is half-size
            head_outs.append((oh * pl.reciprocal(l, approx=True)).astype(wp_ref.dtype))
        attn = jnp.concatenate(head_outs, axis=-1)   # (TILE_Q, planes) bf16 lane-dense slab
        out = jnp.dot(attn, wp_ref[...], preferred_element_type=jnp.float32)
        o_ref[wb] = (out + bias).astype(o_ref.dtype)


def _pick_tile_q(Lq, Lk, *, target=512, score_budget=6 * _MIB):
    """Largest 8-aligned divisor of Lq keeping the per-head f32 score slab bounded."""
    cap = max(8, (score_budget // max(Lk * 4, 1)) // 8 * 8)
    return _pick_tile(Lq, min(target, cap), 8)


def _pick_batch_block(B, tile_q, Lk, planes, *, target_rows=256, kv_budget=12 * _MIB):
    """How many batch/window elements per grid step (fills the MXU M dimension
    for small windowed-attention sequences without blowing the K/V block VMEM)."""
    bb = 1
    for cand in range(1, B + 1):
        if B % cand:
            continue
        kv_bytes = 8 * cand * Lk * planes       # kT+v bf16 blocks, double-buffered
        if cand * tile_q <= target_rows and kv_bytes <= kv_budget:
            bb = cand
    return bb


def pallas_mha_proj(q, kT, v, wproj, bproj, head_nums, *, out_dtype=jnp.bfloat16):
    """softmax(q kT) v over all heads + output projection, fused and query-tiled.

    q:  (B, Lq, planes)  packed head-major, softmax scale already folded in.
    kT: (B, planes, Lk)  per-head-transposed K (head_dim on sublanes, Lk on lanes).
    v:  (B, Lk, planes)  packed head-major.
    """
    B, Lq, planes = q.shape
    Lk = v.shape[1]
    head_dim = planes // head_nums

    tile_q = _pick_tile_q(Lq, Lk)
    bb = _pick_batch_block(B, tile_q, Lk, planes)
    grid = (B // bb, Lq // tile_q)

    # VMEM budget: double-buffered blocks + live fp32 score/prob slabs + attn slab.
    blocks = (bb * (2 * tile_q * planes + 2 * Lk * planes) * 2
              + planes * planes * 2 + planes * 4)
    live = 2 * tile_q * Lk * 4 + tile_q * planes * (4 + 2)
    vmem_limit = int(min(56 * _MIB, max(32 * _MIB, (2 * blocks + live) * 1.5)))

    kernel = functools.partial(_mha_proj_kernel, head_nums=head_nums,
                               head_dim=head_dim, batch_block=bb)
    return pl.pallas_call(
        kernel,
        out_shape=jax.ShapeDtypeStruct((B, Lq, planes), out_dtype),
        grid=grid,
        in_specs=[
            pl.BlockSpec((bb, tile_q, planes), lambda bi, qi: (bi, qi, 0)),
            pl.BlockSpec((bb, planes, Lk), lambda bi, qi: (bi, 0, 0)),
            pl.BlockSpec((bb, Lk, planes), lambda bi, qi: (bi, 0, 0)),
            pl.BlockSpec((planes, planes), lambda bi, qi: (0, 0)),
            pl.BlockSpec((1, planes), lambda bi, qi: (0, 0)),
        ],
        out_specs=pl.BlockSpec((bb, tile_q, planes), lambda bi, qi: (bi, qi, 0)),
        compiler_params=pltpu.CompilerParams(
            dimension_semantics=("parallel", "parallel"),
            vmem_limit_bytes=vmem_limit),
    )(q, kT, v, wproj, bproj.reshape(1, planes))


# -----------------------------------------------------------------------------
# MultiScaleAttention forward (matches the PyTorch module semantics)
# -----------------------------------------------------------------------------
@functools.partial(jax.jit, static_argnums=(2, 3))
def multiscale_attention_forward(x, params, head_nums, pool_stride=None):
    """x: (B, H, W, inplanes) -> (B, H', W', planes), bf16."""
    B, H, W, Cin = x.shape
    planes = params['proj_w'].shape[0]
    head_dim = planes // head_nums
    cdt = jnp.bfloat16   # MXU operands in bf16, fp32 accumulation everywhere

    # Fold the 1/sqrt(head_dim) softmax scale into the q columns of the QKV
    # projection in fp32 (before the bf16 cast): removes a per-step VPU multiply
    # in the attention kernel and the second bf16 rounding of q.
    scale = head_dim ** (-0.5)
    qkv_w = params['qkv_w'].astype(jnp.float32).at[:, :planes].multiply(scale)
    qkv_b = params['qkv_b'].astype(jnp.float32).at[:planes].multiply(scale)

    qkv = pallas_linear(x.reshape(B * H * W, Cin).astype(cdt),
                        qkv_w.astype(cdt), qkv_b, out_dtype=cdt)
    qkv = qkv.reshape(B, H * W, 3 * planes)   # packed (q | k | v), head-major inside

    q = qkv[:, :, :planes]
    k = qkv[:, :, planes:2 * planes]
    v = qkv[:, :, 2 * planes:]
    # Per-head-transposed K so QK^T in the kernel is (TILE_Q, D) @ (D, Lk) with a
    # lane-dense RHS and sublane-aligned head slices (no in-kernel transposes).
    kT = jnp.swapaxes(k, 1, 2)                # (B, planes, Lk)

    Hq, Wq = H, W
    if pool_stride:
        # TODO(synk): MaxPool2d(kernel=stride=pool_stride) on q still runs as XLA
        # glue; folding it into the attention kernel's q read (block s*TILE_Q rows,
        # reduce in VMEM) would save one HBM round trip of q on the pooled layers.
        s = pool_stride
        Hq, Wq = H // s, W // s
        q = q.reshape(B, H, W, planes)[:, :Hq * s, :Wq * s, :]
        q = q.reshape(B, Hq, s, Wq, s, planes).max(axis=(2, 4))
        q = q.reshape(B, Hq * Wq, planes)

    out = pallas_mha_proj(q, kT, v, params['proj_w'].astype(cdt),
                          params['proj_b'].astype(jnp.float32), head_nums)
    return out.reshape(B, Hq, Wq, planes)


# -----------------------------------------------------------------------------
# Pure-JAX fp32 reference (for in-script correctness checking)
# -----------------------------------------------------------------------------
def multiscale_attention_ref(x, params, head_nums, pool_stride=None):
    B, H, W, Cin = x.shape
    planes = params['proj_w'].shape[0]
    D = planes // head_nums
    qkv = x.reshape(B, H * W, Cin) @ params['qkv_w'] + params['qkv_b']
    qkv = qkv.reshape(B, H * W, 3, head_nums, D)
    q, k, v = qkv[:, :, 0], qkv[:, :, 1], qkv[:, :, 2]
    if pool_stride:
        s = pool_stride
        Ho, Wo = H // s, W // s
        q = q.reshape(B, H, W, planes)[:, :Ho * s, :Wo * s, :]
        q = q.reshape(B, Ho, s, Wo, s, planes).max(axis=(2, 4))
        H, W = Ho, Wo
        q = q.reshape(B, H * W, head_nums, D)
    qh, kh, vh = (jnp.swapaxes(t, 1, 2) for t in (q, k, v))
    scores = jnp.einsum('bhqd,bhkd->bhqk', qh, kh) / math.sqrt(D)
    p = jax.nn.softmax(scores, axis=-1)
    o = jnp.einsum('bhqk,bhkd->bhqd', p, vh)
    o = jnp.swapaxes(o, 1, 2).reshape(B, H * W, planes)
    o = o @ params['proj_w'] + params['proj_b']
    return o.reshape(B, H, W, planes)


# -----------------------------------------------------------------------------
if __name__ == "__main__":
    B, H, W = 2, 16, 16
    inplanes, planes, head_nums = 32, 64, 2

    key = jax.random.PRNGKey(0)
    kx, kw0, kb0, kw1, kb1 = jax.random.split(key, 5)
    x = jax.random.normal(kx, (B, H, W, inplanes), dtype=jnp.float32)
    params = {
        'qkv_w': jax.random.normal(kw0, (inplanes, 3 * planes), jnp.float32)
                 / math.sqrt(inplanes),
        'qkv_b': 0.01 * jax.random.normal(kb0, (3 * planes,), jnp.float32),
        'proj_w': jax.random.normal(kw1, (planes, planes), jnp.float32)
                  / math.sqrt(planes),
        'proj_b': 0.01 * jax.random.normal(kb1, (planes,), jnp.float32),
    }

    for pool_stride in (None, 2):   # cover both module configurations
        out = multiscale_attention_forward(x, params, head_nums, pool_stride)
        out = jax.block_until_ready(out)
        ref = multiscale_attention_ref(x, params, head_nums, pool_stride)
        Hq = H // pool_stride if pool_stride else H
        Wq = W // pool_stride if pool_stride else W
        assert out.shape == (B, Hq, Wq, planes), out.shape
        err = float(jnp.max(jnp.abs(out.astype(jnp.float32) - ref)))
        mag = float(jnp.max(jnp.abs(ref)))
        # bf16 MXU operands + bf16 output + approx reciprocal -> loose but meaningful tolerance
        assert err <= 0.05 * mag + 0.05, (pool_stride, err, mag)

    print("KERNEL_OK")
</pallas_src>

<mosaic_0001>
module attributes {stable_mosaic.version = 11 : i64} {
  func.func @_linear_kernel(%arg0: i32, %arg1: memref<512x32xbf16, #tpu.memory_space<vmem>>, %arg2: memref<32x192xbf16, #tpu.memory_space<vmem>>, %arg3: memref<1x192xf32, #tpu.memory_space<vmem>>, %arg4: memref<512x192xbf16, #tpu.memory_space<vmem>>) attributes {dimension_semantics = [#tpu.dimension_semantics<parallel>], iteration_bounds = array<i64: 1>, scalar_prefetch = 0 : i64, scratch_operands = 0 : i64, tpu.core_type = #tpu.core_type<tc>, window_params = [{transform_indices = @transform_0, window_bounds = array<i64: 512, 32>}, {pipeline_mode = #tpu.pipeline_mode<synchronous>, transform_indices = @transform_1, window_bounds = array<i64: 32, 192>}, {pipeline_mode = #tpu.pipeline_mode<synchronous>, transform_indices = @transform_2, window_bounds = array<i64: 1, 192>}, {transform_indices = @transform_3, window_bounds = array<i64: 512, 192>}]} {
    %c0 = arith.constant 0 : index
    %c0_0 = arith.constant 0 : index
    %0 = vector.load %arg1[%c0, %c0_0] : memref<512x32xbf16, #tpu.memory_space<vmem>>, vector<512x32xbf16>
    %c0_1 = arith.constant 0 : index
    %c0_2 = arith.constant 0 : index
    %1 = vector.load %arg2[%c0_1, %c0_2] : memref<32x192xbf16, #tpu.memory_space<vmem>>, vector<32x192xbf16>
    %cst = arith.constant dense<0.000000e+00> : vector<512x192xf32>
    %2 = tpu.matmul %0, %1, %cst {dimension_numbers = #tpu.dot_dimension_numbers<[1], [0], [0], [1], [0, 0, 1, 1], [], []>} : vector<512x32xbf16>, vector<32x192xbf16>, vector<512x192xf32> -> vector<512x192xf32>
    %c0_3 = arith.constant 0 : index
    %c0_4 = arith.constant 0 : index
    %3 = vector.load %arg3[%c0_3, %c0_4] : memref<1x192xf32, #tpu.memory_space<vmem>>, vector<1x192xf32>
    %4 = vector.broadcast %3 : vector<1x192xf32> to vector<512x192xf32>
    %5 = arith.addf %2, %4 : vector<512x192xf32>
    %6 = arith.truncf %5 : vector<512x192xf32> to vector<512x192xbf16>
    %c0_5 = arith.constant 0 : index
    %c0_6 = arith.constant 0 : index
    %7 = vector.load %arg4[%c0_5, %c0_6] : memref<512x192xbf16, #tpu.memory_space<vmem>>, vector<512x192xbf16>
    tpu.vector_store %arg4[%c0_5, %c0_6], %6 {strides = array<i32>} : memref<512x192xbf16, #tpu.memory_space<vmem>>, vector<512x192xbf16>,
    return
  }
  func.func @transform_0(%arg0: i32) -> (i32, i32) {
    %c0_i32 = arith.constant 0 : i32
    %c0_i32_0 = arith.constant 0 : i32
    return %arg0, %c0_i32 : i32, i32
  }
  func.func @transform_1(%arg0: i32) -> (i32, i32) {
    %c0_i32 = arith.constant 0 : i32
    %c0_i32_0 = arith.constant 0 : i32
    %c0_i32_1 = arith.constant 0 : i32
    return %c0_i32, %c0_i32_0 : i32, i32
  }
  func.func @transform_2(%arg0: i32) -> (i32, i32) {
    %c0_i32 = arith.constant 0 : i32
    %c0_i32_0 = arith.constant 0 : i32
    %c0_i32_1 = arith.constant 0 : i32
    return %c0_i32, %c0_i32_0 : i32, i32
  }
  func.func @transform_3(%arg0: i32) -> (i32, i32) {
    %c0_i32 = arith.constant 0 : i32
    %c0_i32_0 = arith.constant 0 : i32
    return %arg0, %c0_i32 : i32, i32
  }
}

module attributes {stable_mosaic.version = 11 : i64} {
  func.func @_mha_proj_kernel(%arg0: i32, %arg1: i32, %arg2: memref<1x256x64xbf16, #tpu.memory_space<vmem>>, %arg3: memref<1x64x256xbf16, #tpu.memory_space<vmem>>, %arg4: memref<1x256x64xbf16, #tpu.memory_space<vmem>>, %arg5: memref<64x64xbf16, #tpu.memory_space<vmem>>, %arg6: memref<1x64xf32, #tpu.memory_space<vmem>>, %arg7: memref<1x256x64xbf16, #tpu.memory_space<vmem>>) attributes {dimension_semantics = [#tpu.dimension_semantics<parallel>, #tpu.dimension_semantics<parallel>], iteration_bounds = array<i64: 2, 1>, scalar_prefetch = 0 : i64, scratch_operands = 0 : i64, tpu.core_type = #tpu.core_type<tc>, window_params = [{transform_indices = @transform_0, window_bounds = array<i64: 1, 256, 64>}, {transform_indices = @transform_1, window_bounds = array<i64: 1, 64, 256>}, {transform_indices = @transform_2, window_bounds = array<i64: 1, 256, 64>}, {pipeline_mode = #tpu.pipeline_mode<synchronous>, transform_indices = @transform_3, window_bounds = array<i64: 64, 64>}, {pipeline_mode = #tpu.pipeline_mode<synchronous>, transform_indices = @transform_4, window_bounds = array<i64: 1, 64>}, {transform_indices = @transform_5, window_bounds = array<i64: 1, 256, 64>}]} {
    %c0 = arith.constant 0 : index
    %c0_0 = arith.constant 0 : index
    %0 = vector.load %arg6[%c0, %c0_0] : memref<1x64xf32, #tpu.memory_space<vmem>>, vector<1x64xf32>
    %c0_1 = arith.constant 0 : index
    %c0_2 = arith.constant 0 : index
    %c0_3 = arith.constant 0 : index
    %1 = vector.load %arg2[%c0_1, %c0_2, %c0_3] : memref<1x256x64xbf16, #tpu.memory_space<vmem>>, vector<1x256x64xbf16>
    %2 = vector.shape_cast %1 : vector<1x256x64xbf16> to vector<256x64xbf16>
    %c0_4 = arith.constant 0 : index
    %c0_5 = arith.constant 0 : index
    %c0_6 = arith.constant 0 : index
    %3 = vector.load %arg3[%c0_4, %c0_5, %c0_6] : memref<1x64x256xbf16, #tpu.memory_space<vmem>>, vector<1x64x256xbf16>
    %4 = vector.shape_cast %3 : vector<1x64x256xbf16> to vector<64x256xbf16>
    %c0_7 = arith.constant 0 : index
    %c0_8 = arith.constant 0 : index
    %c0_9 = arith.constant 0 : index
    %5 = vector.load %arg4[%c0_7, %c0_8, %c0_9] : memref<1x256x64xbf16, #tpu.memory_space<vmem>>, vector<1x256x64xbf16>
    %6 = vector.shape_cast %5 : vector<1x256x64xbf16> to vector<256x64xbf16>
    %7 = vector.extract_strided_slice %2 {offsets = [0, 0], sizes = [256, 32], strides = [1, 1]} : vector<256x64xbf16> to vector<256x32xbf16>
    %8 = vector.extract_strided_slice %4 {offsets = [0, 0], sizes = [32, 256], strides = [1, 1]} : vector<64x256xbf16> to vector<32x256xbf16>
    %9 = vector.extract_strided_slice %6 {offsets = [0, 0], sizes = [256, 32], strides = [1, 1]} : vector<256x64xbf16> to vector<256x32xbf16>
    %cst = arith.constant dense<0.000000e+00> : vector<256x256xf32>
    %10 = tpu.matmul %7, %8, %cst {dimension_numbers = #tpu.dot_dimension_numbers<[1], [0], [0], [1], [0, 0, 1, 1], [], []>} : vector<256x32xbf16>, vector<32x256xbf16>, vector<256x256xf32> -> vector<256x256xf32>
    %cst_10 = arith.constant dense<0xFF800000> : vector<256xf32>
    %11 = vector.multi_reduction <maximumf>, %10, %cst_10 [1] : vector<256x256xf32> to vector<256xf32>
    %12 = vector.shape_cast %11 : vector<256xf32> to vector<256x1xf32>
    %13 = vector.broadcast %12 : vector<256x1xf32> to vector<256x256xf32>
    %14 = arith.subf %10, %13 : vector<256x256xf32>
    %15 = math.exp %14 : vector<256x256xf32>
    %cst_11 = arith.constant dense<0.000000e+00> : vector<256xf32>
    %16 = vector.multi_reduction <add>, %15, %cst_11 [1] : vector<256x256xf32> to vector<256xf32>
    %17 = vector.shape_cast %16 : vector<256xf32> to vector<256x1xf32>
    %18 = arith.truncf %15 : vector<256x256xf32> to vector<256x256xbf16>
    %cst_12 = arith.constant dense<0.000000e+00> : vector<256x32xf32>
    %19 = tpu.matmul %18, %9, %cst_12 {dimension_numbers = #tpu.dot_dimension_numbers<[1], [0], [0], [1], [0, 0, 1, 1], [], []>} : vector<256x256xbf16>, vector<256x32xbf16>, vector<256x32xf32> -> vector<256x32xf32>
    %20 = tpu.reciprocal %17 {approx = true} : vector<256x1xf32> -> vector<256x1xf32>
    %21 = vector.broadcast %20 : vector<256x1xf32> to vector<256x32xf32>
    %22 = arith.mulf %19, %21 : vector<256x32xf32>
    %23 = arith.truncf %22 : vector<256x32xf32> to vector<256x32xbf16>
    %24 = vector.extract_strided_slice %2 {offsets = [0, 32], sizes = [256, 32], strides = [1, 1]} : vector<256x64xbf16> to vector<256x32xbf16>
    %25 = vector.extract_strided_slice %4 {offsets = [32, 0], sizes = [32, 256], strides = [1, 1]} : vector<64x256xbf16> to vector<32x256xbf16>
    %26 = vector.extract_strided_slice %6 {offsets = [0, 32], sizes = [256, 32], strides = [1, 1]} : vector<256x64xbf16> to vector<256x32xbf16>
    %cst_13 = arith.constant dense<0.000000e+00> : vector<256x256xf32>
    %27 = tpu.matmul %24, %25, %cst_13 {dimension_numbers = #tpu.dot_dimension_numbers<[1], [0], [0], [1], [0, 0, 1, 1], [], []>} : vector<256x32xbf16>, vector<32x256xbf16>, vector<256x256xf32> -> vector<256x256xf32>
    %cst_14 = arith.constant dense<0xFF800000> : vector<256xf32>
    %28 = vector.multi_reduction <maximumf>, %27, %cst_14 [1] : vector<256x256xf32> to vector<256xf32>
    %29 = vector.shape_cast %28 : vector<256xf32> to vector<256x1xf32>
    %30 = vector.broadcast %29 : vector<256x1xf32> to vector<256x256xf32>
    %31 = arith.subf %27, %30 : vector<256x256xf32>
    %32 = math.exp %31 : vector<256x256xf32>
    %cst_15 = arith.constant dense<0.000000e+00> : vector<256xf32>
    %33 = vector.multi_reduction <add>, %32, %cst_15 [1] : vector<256x256xf32> to vector<256xf32>
    %34 = vector.shape_cast %33 : vector<256xf32> to vector<256x1xf32>
    %35 = arith.truncf %32 : vector<256x256xf32> to vector<256x256xbf16>
    %cst_16 = arith.constant dense<0.000000e+00> : vector<256x32xf32>
    %36 = tpu.matmul %35, %26, %cst_16 {dimension_numbers = #tpu.dot_dimension_numbers<[1], [0], [0], [1], [0, 0, 1, 1], [], []>} : vector<256x256xbf16>, vector<256x32xbf16>, vector<256x32xf32> -> vector<256x32xf32>
    %37 = tpu.reciprocal %34 {approx = true} : vector<256x1xf32> -> vector<256x1xf32>
    %38 = vector.broadcast %37 : vector<256x1xf32> to vector<256x32xf32>
    %39 = arith.mulf %36, %38 : vector<256x32xf32>
    %40 = arith.truncf %39 : vector<256x32xf32> to vector<256x32xbf16>
    %41 = tpu.concatenate %23, %40 in 1 : vector<256x32xbf16>, vector<256x32xbf16> -> vector<256x64xbf16>
    %c0_17 = arith.constant 0 : index
    %c0_18 = arith.constant 0 : index
    %42 = vector.load %arg5[%c0_17, %c0_18] : memref<64x64xbf16, #tpu.memory_space<vmem>>, vector<64x64xbf16>
    %cst_19 = arith.constant dense<0.000000e+00> : vector<256x64xf32>
    %43 = tpu.matmul %41, %42, %cst_19 {dimension_numbers = #tpu.dot_dimension_numbers<[1], [0], [0], [1], [0, 0, 1, 1], [], []>} : vector<256x64xbf16>, vector<64x64xbf16>, vector<256x64xf32> -> vector<256x64xf32>
    %44 = vector.broadcast %0 : vector<1x64xf32> to vector<256x64xf32>
    %45 = arith.addf %43, %44 : vector<256x64xf32>
    %46 = arith.truncf %45 : vector<256x64xf32> to vector<256x64xbf16>
    %c0_20 = arith.constant 0 : index
    %c0_21 = arith.constant 0 : index
    %c0_22 = arith.constant 0 : index
    %47 = vector.load %arg7[%c0_20, %c0_21, %c0_22] : memref<1x256x64xbf16, #tpu.memory_space<vmem>>, vector<1x256x64xbf16>
    %48 = vector.shape_cast %47 : vector<1x256x64xbf16> to vector<256x64xbf16>
    %49 = vector.shape_cast %46 : vector<256x64xbf16> to vector<1x256x64xbf16>
    tpu.vector_store %arg7[%c0_20, %c0_21, %c0_22], %49 {strides = array<i32>} : memref<1x256x64xbf16, #tpu.memory_space<vmem>>, vector<1x256x64xbf16>,
    return
  }
  func.func @transform_0(%arg0: i32, %arg1: i32) -> (i32, i32, i32) {
    %c0_i32 = arith.constant 0 : i32
    %c0_i32_0 = arith.constant 0 : i32
    return %arg0, %arg1, %c0_i32 : i32, i32, i32
  }
  func.func @transform_1(%arg0: i32, %arg1: i32) -> (i32, i32, i32) {
    %c0_i32 = arith.constant 0 : i32
    %c0_i32_0 = arith.constant 0 : i32
    %c0_i32_1 = arith.constant 0 : i32
    return %arg0, %c0_i32, %c0_i32_0 : i32, i32, i32
  }
  func.func @transform_2(%arg0: i32, %arg1: i32) -> (i32, i32, i32) {
    %c0_i32 = arith.constant 0 : i32
    %c0_i32_0 = arith.constant 0 : i32
    %c0_i32_1 = arith.constant 0 : i32
    return %arg0, %c0_i32, %c0_i32_0 : i32, i32, i32
  }
  func.func @transform_3(%arg0: i32, %arg1: i32) -> (i32, i32) {
    %c0_i32 = arith.constant 0 : i32
    %c0_i32_0 = arith.constant 0 : i32
    %c0_i32_1 = arith.constant 0 : i32
    return %c0_i32, %c0_i32_0 : i32, i32
  }
  func.func @transform_4(%arg0: i32, %arg1: i32) -> (i32, i32) {
    %c0_i32 = arith.constant 0 : i32
    %c0_i32_0 = arith.constant 0 : i32
    %c0_i32_1 = arith.constant 0 : i32
    return %c0_i32, %c0_i32_0 : i32, i32
  }
  func.func @transform_5(%arg0: i32, %arg1: i32) -> (i32, i32, i32) {
    %c0_i32 = arith.constant 0 : i32
    %c0_i32_0 = arith.constant 0 : i32
    return %arg0, %arg1, %c0_i32 : i32, i32, i32
  }
}

</mosaic_0001>

<bundles_post_ra>
// kernel: multiscale_attention_forward.2
= control target key start
LH: loop header
LB: loop body
LE: loop exit
PB: predicated region body
PF: predicated region fallthrough
CT: control target
= control target key end

     0   :  { %v1419_v1 = vmov 0   ;;  %vm275_vm0 = vcmask 261120   ;;  %v85_v37 = vlaneseq  ;;  %vm1109_vm1 = vcmask 1043456   ;;  %s2071_s1 = inlined_call_operand.vmem [shape: bf16[32,192], index: 1, kind: input, shape index: {}]   ;;  %s2072_s0 = inlined_call_operand.vmem [shape: bf16[512,32], index: 0, kind: input, shape index: {}]   ;;  %s2073_s2 = inlined_call_operand.vmem [shape: f32[1,192], index: 2, kind: input, shape index: {}]   ;;  %s2074_s3 = inlined_call_operand.vmem [shape: bf16[512,192], index: 3, kind: output, shape index: {}]  }
   0x1   :  { %v1381_v0 = vld [vmem:[%s2071_s1 + $0x4] ss:$8 sps:$4 sm:$0xff]   ;;  %404 = vmatprep.mubr.bf16.mxu0 %v1419_v1  ;;  %564 = vmatprep.mubr.bf16.mxu1 %v1419_v1  ;;  %v1383_v2 = vld [vmem:[%s2071_s1] ss:$8 sps:$4 sm:$0xff]   ;;  %v1384_v3 = vld [vmem:[%s2071_s1 + $0x14] ss:$8 sps:$4 sm:$0xff]  }
   0x2   :  { %372 = vmatprep.subr.bf16.mxu0 %v1381_v0  ;;  %1376 = vmatprep.subr.bf16.mxu1 %v1381_v0  ;;  %v1386_v4 = vld [vmem:[%s2071_s1 + $0x10] ss:$8 sps:$4 sm:$0xff]   ;;  %v1387_v5 = vld [vmem:[%s2072_s0] sm:$0xff]   ;;  %v1389_v7 = vld [vmem:[%s2072_s0 + $0x8] sm:$0xff]   ;;  %v86_v38 = vshrl.u32 %v85_v37, 7  ;;  %vm1110_vm2 = vcmask 523268  }
   0x3   :  { %373 = vmatpush1.bf16.msra.mxu0 %v1383_v2  ;;  %1378 = vmatpush1.bf16.msra.mxu1 %v1383_v2  ;;  %v1388_v6 = vld [vmem:[%s2072_s0 + $0x80] sm:$0xff]   ;;  %v1390_v8 = vld [vmem:[%s2072_s0 + $0x88] sm:$0xff]   ;;  %v1391_v9 = vld [vmem:[%s2072_s0 + $0x10] sm:$0xff]  }
   0x4   :  { %374 = vmatprep.subr.bf16.mxu0 %v1384_v3  ;;  %1377 = vmatprep.subr.bf16.mxu1 %v1384_v3  ;;  %v1392_v10 = vld [vmem:[%s2072_s0 + $0x90] sm:$0xff]   ;;  %v1393_v11 = vld [vmem:[%s2072_s0 + $0x18] sm:$0xff]   ;;  %v1395_v13 = vld [vmem:[%s2072_s0 + $0x20] sm:$0xff]   ;;  %v87_v39 = vsub.s32 0, %v86_v38  ;;  %v91_v41 = vsub.s32 1, %v86_v38 }
   0x5   :  { %v1394_v12 = vld [vmem:[%s2072_s0 + $0x98] sm:$0xff]   ;;  %v1396_v14 = vld [vmem:[%s2072_s0 + $0xa0] sm:$0xff]   ;;  %v1397_v15 = vld [vmem:[%s2072_s0 + $0x28] sm:$0xff]  }
   0x6   :  { %v1398_v16 = vld [vmem:[%s2072_s0 + $0xa8] sm:$0xff]   ;;  %v1399_v17 = vld [vmem:[%s2072_s0 + $0x30] sm:$0xff]   ;;  %v1401_v19 = vld [vmem:[%s2072_s0 + $0x38] sm:$0xff]  }
   0x7   :  { %375 = vmatpush1.bf16.msra.mxu0 %v1386_v4  ;;  %1379 = vmatpush1.bf16.msra.mxu1 %v1386_v4  ;;  %v1400_v18 = vld [vmem:[%s2072_s0 + $0xb0] sm:$0xff]   ;;  %v1402_v20 = vld [vmem:[%s2072_s0 + $0xb8] sm:$0xff]   ;;  %v1403_v21 = vld [vmem:[%s2072_s0 + $0x40] sm:$0xff]  }
   0x8   :  { %v1404_v22 = vld [vmem:[%s2072_s0 + $0xc0] sm:$0xff]   ;;  %v1405_v23 = vld [vmem:[%s2072_s0 + $0x48] sm:$0xff]   ;;  %v1407_v25 = vld [vmem:[%s2072_s0 + $0x50] sm:$0xff]  }
   0x9   :  { %v1406_v24 = vld [vmem:[%s2072_s0 + $0xc8] sm:$0xff]   ;;  %v1408_v26 = vld [vmem:[%s2072_s0 + $0xd0] sm:$0xff]   ;;  %v1409_v27 = vld [vmem:[%s2072_s0 + $0x58] sm:$0xff]  }
   0xa   :  { %1216 = vmatmul.mubr.msk.bf16.vlgmr.msra.gmra.mrb[0].mxu0 %vm275_vm0, %v1387_v5  ;;  %1232 = vmatmul.mubr.msk.bf16.vlgmr.msra.gmra.mrb[0].mxu1 %vm275_vm0, %v1388_v6  ;;  %v1410_v28 = vld [vmem:[%s2072_s0 + $0xd8] sm:$0xff]   ;;  %v1411_v29 = vld [vmem:[%s2072_s0 + $0x60] sm:$0xff]   ;;  %v1413_v31 = vld [vmem:[%s2072_s0 + $0x68] sm:$0xff]  }
   0xb   :  { %414 = vmatprep.mubr.bf16.mxu0 %v1419_v1  ;;  %574 = vmatprep.mubr.bf16.mxu1 %v1419_v1  ;;  %v1412_v30 = vld [vmem:[%s2072_s0 + $0xe0] sm:$0xff]   ;;  %v1414_v32 = vld [vmem:[%s2072_s0 + $0xe8] sm:$0xff]   ;;  %v1415_v33 = vld [vmem:[%s2072_s0 + $0x70] sm:$0xff]  }
   0xc   :  { %v1416_v34 = vld [vmem:[%s2072_s0 + $0xf0] sm:$0xff]   ;;  %v1417_v35 = vld [vmem:[%s2072_s0 + $0x78] sm:$0xff]   ;;  %v83_v40 = vld [vmem:[%s2073_s2] sm:$0x3] }
   0xd   :  { %v1418_v36 = vld [vmem:[%s2072_s0 + $0xf8] sm:$0xff]   ;;  %v1615_v42 = vrot.slane %v83_v40, %v87_v39  ;;  %v1617_v43 = vrot.slane %v83_v40, %v91_v41  ;;  %vm1623_vm3 = vmor %vm1110_vm2, %vm1109_vm1 }
  0x12   :  { %1217 = vmatmul.mubr.msk.bf16.gmra.mrb[4].mxu0 %vm275_vm0, %v1389_v7  ;;  %1233 = vmatmul.mubr.msk.bf16.gmra.mrb[4].mxu1 %vm275_vm0, %v1390_v8 }
  0x13   :  { %424 = vmatprep.mubr.bf16.mxu0 %v1419_v1  ;;  %584 = vmatprep.mubr.bf16.mxu1 %v1419_v1 }
  0x1a   :  { %1218 = vmatmul.mubr.msk.bf16.gmra.mrb[8].mxu0 %vm275_vm0, %v1391_v9  ;;  %1234 = vmatmul.mubr.msk.bf16.gmra.mrb[8].mxu1 %vm275_vm0, %v1392_v10 }
  0x1b   :  { %434 = vmatprep.mubr.bf16.mxu0 %v1419_v1  ;;  %594 = vmatprep.mubr.bf16.mxu1 %v1419_v1 }
  0x22   :  { %1219 = vmatmul.mubr.msk.bf16.gmra.mrb[12].mxu0 %vm275_vm0, %v1393_v11  ;;  %1235 = vmatmul.mubr.msk.bf16.gmra.mrb[12].mxu1 %vm275_vm0, %v1394_v12 }
  0x23   :  { %444 = vmatprep.mubr.bf16.mxu0 %v1419_v1  ;;  %604 = vmatprep.mubr.bf16.mxu1 %v1419_v1 }
  0x2a   :  { %1220 = vmatmul.mubr.msk.bf16.gmra.mrb[16].mxu0 %vm275_vm0, %v1395_v13  ;;  %1236 = vmatmul.mubr.msk.bf16.gmra.mrb[16].mxu1 %vm275_vm0, %v1396_v14 }
  0x2b   :  { %454 = vmatprep.mubr.bf16.mxu0 %v1419_v1  ;;  %614 = vmatprep.mubr.bf16.mxu1 %v1419_v1 }
  0x32   :  { %1221 = vmatmul.mubr.msk.bf16.gmra.mrb[20].mxu0 %vm275_vm0, %v1397_v15  ;;  %1237 = vmatmul.mubr.msk.bf16.gmra.mrb[20].mxu1 %vm275_vm0, %v1398_v16 }
  0x33   :  { %464 = vmatprep.mubr.bf16.mxu0 %v1419_v1  ;;  %624 = vmatprep.mubr.bf16.mxu1 %v1419_v1 }
  0x3a   :  { %1222 = vmatmul.mubr.msk.bf16.gmra.mrb[24].mxu0 %vm275_vm0, %v1399_v17  ;;  %1238 = vmatmul.mubr.msk.bf16.gmra.mrb[24].mxu1 %vm275_vm0, %v1400_v18 }
  0x3b   :  { %474 = vmatprep.mubr.bf16.mxu0 %v1419_v1  ;;  %634 = vmatprep.mubr.bf16.mxu1 %v1419_v1 }
  0x42   :  { %1223 = vmatmul.mubr.msk.bf16.gmra.mrb[28].mxu0 %vm275_vm0, %v1401_v19  ;;  %1239 = vmatmul.mubr.msk.bf16.gmra.mrb[28].mxu1 %vm275_vm0, %v1402_v20 }
  0x43   :  { %484 = vmatprep.mubr.bf16.mxu0 %v1419_v1  ;;  %644 = vmatprep.mubr.bf16.mxu1 %v1419_v1 }
  0x4a   :  { %1224 = vmatmul.mubr.msk.bf16.gmra.mrb[32].mxu0 %vm275_vm0, %v1403_v21  ;;  %1240 = vmatmul.mubr.msk.bf16.gmra.mrb[32].mxu1 %vm275_vm0, %v1404_v22 }
  0x4b   :  { %494 = vmatprep.mubr.bf16.mxu0 %v1419_v1  ;;  %654 = vmatprep.mubr.bf16.mxu1 %v1419_v1 }
  0x52   :  { %1225 = vmatmul.mubr.msk.bf16.gmra.mrb[36].mxu0 %vm275_vm0, %v1405_v23  ;;  %1241 = vmatmul.mubr.msk.bf16.gmra.mrb[36].mxu1 %vm275_vm0, %v1406_v24 }
  0x53   :  { %504 = vmatprep.mubr.bf16.mxu0 %v1419_v1  ;;  %664 = vmatprep.mubr.bf16.mxu1 %v1419_v1 }
  0x5a   :  { %1226 = vmatmul.mubr.msk.bf16.gmra.mrb[40].mxu0 %vm275_vm0, %v1407_v25  ;;  %1242 = vmatmul.mubr.msk.bf16.gmra.mrb[40].mxu1 %vm275_vm0, %v1408_v26 }
  0x5b   :  { %514 = vmatprep.mubr.bf16.mxu0 %v1419_v1  ;;  %674 = vmatprep.mubr.bf16.mxu1 %v1419_v1 }
  0x62   :  { %1227 = vmatmul.mubr.msk.bf16.gmra.mrb[44].mxu0 %vm275_vm0, %v1409_v27  ;;  %1243 = vmatmul.mubr.msk.bf16.gmra.mrb[44].mxu1 %vm275_vm0, %v1410_v28 }
  0x63   :  { %524 = vmatprep.mubr.bf16.mxu0 %v1419_v1  ;;  %684 = vmatprep.mubr.bf16.mxu1 %v1419_v1 }
  0x6a   :  { %1228 = vmatmul.mubr.msk.bf16.gmra.mrb[48].mxu0 %vm275_vm0, %v1411_v29  ;;  %1244 = vmatmul.mubr.msk.bf16.gmra.mrb[48].mxu1 %vm275_vm0, %v1412_v30 }
  0x6b   :  { %534 = vmatprep.mubr.bf16.mxu0 %v1419_v1  ;;  %694 = vmatprep.mubr.bf16.mxu1 %v1419_v1 }
  0x72   :  { %1229 = vmatmul.mubr.msk.bf16.gmra.mrb[52].mxu0 %vm275_vm0, %v1413_v31  ;;  %1245 = vmatmul.mubr.msk.bf16.gmra.mrb[52].mxu1 %vm275_vm0, %v1414_v32 }
  0x73   :  { %544 = vmatprep.mubr.bf16.mxu0 %v1419_v1  ;;  %704 = vmatprep.mubr.bf16.mxu1 %v1419_v1 }
  0x7a   :  { %1230 = vmatmul.mubr.msk.bf16.gmra.mrb[56].mxu0 %vm275_vm0, %v1415_v33  ;;  %1246 = vmatmul.mubr.msk.bf16.gmra.mrb[56].mxu1 %vm275_vm0, %v1416_v34 }
  0x7b   :  { %554 = vmatprep.mubr.bf16.mxu0 %v1419_v1  ;;  %714 = vmatprep.mubr.bf16.mxu1 %v1419_v1 }
  0x82   :  { %1231 = vmatmul.mubr.msk.bf16.gmra.mrb[60].mxu0 %vm275_vm0, %v1417_v35  ;;  %1247 = vmatmul.mubr.msk.bf16.gmra.mrb[60].mxu1 %vm275_vm0, %v1418_v36 }
  0xdd   :  { %v406_v44 = vpop.f32.mrb[0].mxu0  ;;  %v566_v45 = vpop.f32.mrb[0].mxu1 }
  0xde   :  { %v407_v46 = vadd.f32 %v406_v44, %v1615_v42  ;;  %v567_v47 = vadd.f32 %v566_v45, %v1615_v42  ;;  %v408_v48 = vpop.f32.mrb[1].mxu0  ;;  %v568_v49 = vpop.f32.mrb[1].mxu1 }
  0xdf   :  { %v409_v50 = vadd.f32 %v408_v48, %v1617_v43  ;;  %v569_v51 = vadd.f32 %v568_v49, %v1617_v43  ;;  %v410_v52 = vpop.f32.mrb[2].mxu0  ;;  %v570_v53 = vpop.f32.mrb[2].mxu1 }
  0xe0   :  { %v411_v55 = vadd.f32 %v410_v52, %v1615_v42  ;;  %v571_v56 = vadd.f32 %v570_v53, %v1615_v42  ;;  %v412_v57 = vpop.f32.mrb[3].mxu0  ;;  %v572_v58 = vpop.f32.mrb[3].mxu1 }
  0xe1   :  { %v1312_v59 = vpack.c.bf16 %v409_v50, %v407_v46  ;;  %v1344_v60 = vpack.c.bf16 %v569_v51, %v567_v47  ;;  %v413_v61 = vadd.f32 %v412_v57, %v1617_v43  ;;  %v573_v62 = vadd.f32 %v572_v58, %v1617_v43 }
  0xe3   :  { %1112 = vst.msk [vmem:[%s2074_s3] sm:$0xff] %vm1623_vm3, %v1312_v59  ;;  %1144 = vst.msk [vmem:[%s2074_s3 + $0x100] sm:$0xff] %vm1623_vm3, %v1344_v60  ;;  %v1313_v63 = vpack.c.bf16 %v413_v61, %v411_v55  ;;  %v1345_v0 = vpack.c.bf16 %v573_v62, %v571_v56 }
  0xe5   :  { %1113 = vst.msk [vmem:[%s2074_s3 + $0x8] sm:$0xff] %vm1623_vm3, %v1313_v63  ;;  %1145 = vst.msk [vmem:[%s2074_s3 + $0x108] sm:$0xff] %vm1623_vm3, %v1345_v0  ;;  %v416_v1 = vpop.f32.mrb[4].mxu0  ;;  %v576_v2 = vpop.f32.mrb[4].mxu1 }
  0xe6   :  { %v417_v3 = vadd.f32 %v416_v1, %v1615_v42  ;;  %v577_v4 = vadd.f32 %v576_v2, %v1615_v42  ;;  %v418_v5 = vpop.f32.mrb[5].mxu0  ;;  %v578_v6 = vpop.f32.mrb[5].mxu1 }
  0xe7   :  { %v419_v7 = vadd.f32 %v418_v5, %v1617_v43  ;;  %v579_v8 = vadd.f32 %v578_v6, %v1617_v43  ;;  %v420_v9 = vpop.f32.mrb[6].mxu0  ;;  %v580_v10 = vpop.f32.mrb[6].mxu1 }
  0xe8   :  { %v421_v11 = vadd.f32 %v420_v9, %v1615_v42  ;;  %v581_v12 = vadd.f32 %v580_v10, %v1615_v42  ;;  %v422_v13 = vpop.f32.mrb[7].mxu0  ;;  %v582_v14 = vpop.f32.mrb[7].mxu1 }
  0xe9   :  { %v1314_v15 = vpack.c.bf16 %v419_v7, %v417_v3  ;;  %v1346_v16 = vpack.c.bf16 %v579_v8, %v577_v4  ;;  %v423_v17 = vadd.f32 %v422_v13, %v1617_v43  ;;  %v583_v18 = vadd.f32 %v582_v14, %v1617_v43 }
  0xeb   :  { %1114 = vst.msk [vmem:[%s2074_s3 + $0x10] sm:$0xff] %vm1623_vm3, %v1314_v15  ;;  %1146 = vst.msk [vmem:[%s2074_s3 + $0x110] sm:$0xff] %vm1623_vm3, %v1346_v16  ;;  %v1315_v19 = vpack.c.bf16 %v423_v17, %v421_v11  ;;  %v1347_v20 = vpack.c.bf16 %v583_v18, %v581_v12 }
  0xed   :  { %1115 = vst.msk [vmem:[%s2074_s3 + $0x18] sm:$0xff] %vm1623_vm3, %v1315_v19  ;;  %1147 = vst.msk [vmem:[%s2074_s3 + $0x118] sm:$0xff] %vm1623_vm3, %v1347_v20  ;;  %v426_v21 = vpop.f32.mrb[8].mxu0  ;;  %v586_v22 = vpop.f32.mrb[8].mxu1 }
  0xee   :  { %v427_v23 = vadd.f32 %v426_v21, %v1615_v42  ;;  %v587_v24 = vadd.f32 %v586_v22, %v1615_v42  ;;  %v428_v25 = vpop.f32.mrb[9].mxu0  ;;  %v588_v26 = vpop.f32.mrb[9].mxu1 }
  0xef   :  { %v429_v27 = vadd.f32 %v428_v25, %v1617_v43  ;;  %v589_v28 = vadd.f32 %v588_v26, %v1617_v43  ;;  %v430_v29 = vpop.f32.mrb[10].mxu0  ;;  %v590_v30 = vpop.f32.mrb[10].mxu1 }
  0xf0   :  { %v431_v31 = vadd.f32 %v430_v29, %v1615_v42  ;;  %v591_v32 = vadd.f32 %v590_v30, %v1615_v42  ;;  %v432_v33 = vpop.f32.mrb[11].mxu0  ;;  %v592_v34 = vpop.f32.mrb[11].mxu1 }
  0xf1   :  { %v1316_v35 = vpack.c.bf16 %v429_v27, %v427_v23  ;;  %v1348_v36 = vpack.c.bf16 %v589_v28, %v587_v24  ;;  %v433_v37 = vadd.f32 %v432_v33, %v1617_v43  ;;  %v593_v38 = vadd.f32 %v592_v34, %v1617_v43 }
  0xf3   :  { %1116 = vst.msk [vmem:[%s2074_s3 + $0x20] sm:$0xff] %vm1623_vm3, %v1316_v35  ;;  %1148 = vst.msk [vmem:[%s2074_s3 + $0x120] sm:$0xff] %vm1623_vm3, %v1348_v36  ;;  %v1317_v39 = vpack.c.bf16 %v433_v37, %v431_v31  ;;  %v1349_v40 = vpack.c.bf16 %v593_v38, %v591_v32 }
  0xf5   :  { %1117 = vst.msk [vmem:[%s2074_s3 + $0x28] sm:$0xff] %vm1623_vm3, %v1317_v39  ;;  %1149 = vst.msk [vmem:[%s2074_s3 + $0x128] sm:$0xff] %vm1623_vm3, %v1349_v40  ;;  %v436_v41 = vpop.f32.mrb[12].mxu0  ;;  %v596_v44 = vpop.f32.mrb[12].mxu1 }
  0xf6   :  { %v437_v45 = vadd.f32 %v436_v41, %v1615_v42  ;;  %v597_v46 = vadd.f32 %v596_v44, %v1615_v42  ;;  %v438_v47 = vpop.f32.mrb[13].mxu0  ;;  %v598_v48 = vpop.f32.mrb[13].mxu1 }
  0xf7   :  { %v439_v49 = vadd.f32 %v438_v47, %v1617_v43  ;;  %v599_v50 = vadd.f32 %v598_v48, %v1617_v43  ;;  %v440_v51 = vpop.f32.mrb[14].mxu0  ;;  %v600_v52 = vpop.f32.mrb[14].mxu1 }
  0xf8   :  { %v441_v53 = vadd.f32 %v440_v51, %v1615_v42  ;;  %v601_v55 = vadd.f32 %v600_v52, %v1615_v42  ;;  %v442_v56 = vpop.f32.mrb[15].mxu0  ;;  %v602_v57 = vpop.f32.mrb[15].mxu1 }
  0xf9   :  { %v1318_v58 = vpack.c.bf16 %v439_v49, %v437_v45  ;;  %v1350_v59 = vpack.c.bf16 %v599_v50, %v597_v46  ;;  %v443_v60 = vadd.f32 %v442_v56, %v1617_v43  ;;  %v603_v61 = vadd.f32 %v602_v57, %v1617_v43 }
  0xfb   :  { %1118 = vst.msk [vmem:[%s2074_s3 + $0x30] sm:$0xff] %vm1623_vm3, %v1318_v58  ;;  %1150 = vst.msk [vmem:[%s2074_s3 + $0x130] sm:$0xff] %vm1623_vm3, %v1350_v59  ;;  %v1319_v62 = vpack.c.bf16 %v443_v60, %v441_v53  ;;  %v1351_v63 = vpack.c.bf16 %v603_v61, %v601_v55 }
  0xfd   :  { %1119 = vst.msk [vmem:[%s2074_s3 + $0x38] sm:$0xff] %vm1623_vm3, %v1319_v62  ;;  %1151 = vst.msk [vmem:[%s2074_s3 + $0x138] sm:$0xff] %vm1623_vm3, %v1351_v63  ;;  %v446_v0 = vpop.f32.mrb[16].mxu0  ;;  %v606_v1 = vpop.f32.mrb[16].mxu1 }
  0xfe   :  { %v447_v2 = vadd.f32 %v446_v0, %v1615_v42  ;;  %v607_v3 = vadd.f32 %v606_v1, %v1615_v42  ;;  %v448_v4 = vpop.f32.mrb[17].mxu0  ;;  %v608_v5 = vpop.f32.mrb[17].mxu1 }
  0xff   :  { %v449_v6 = vadd.f32 %v448_v4, %v1617_v43  ;;  %v609_v7 = vadd.f32 %v608_v5, %v1617_v43  ;;  %v450_v8 = vpop.f32.mrb[18].mxu0  ;;  %v610_v9 = vpop.f32.mrb[18].mxu1 }
 0x100   :  { %v451_v10 = vadd.f32 %v450_v8, %v1615_v42  ;;  %v611_v11 = vadd.f32 %v610_v9, %v1615_v42  ;;  %v452_v12 = vpop.f32.mrb[19].mxu0  ;;  %v612_v13 = vpop.f32.mrb[19].mxu1 }
 0x101   :  { %v1320_v14 = vpack.c.bf16 %v449_v6, %v447_v2  ;;  %v1352_v15 = vpack.c.bf16 %v609_v7, %v607_v3  ;;  %v453_v16 = vadd.f32 %v452_v12, %v1617_v43  ;;  %v613_v17 = vadd.f32 %v612_v13, %v1617_v43 }
 0x103   :  { %1120 = vst.msk [vmem:[%s2074_s3 + $0x40] sm:$0xff] %vm1623_vm3, %v1320_v14  ;;  %1152 = vst.msk [vmem:[%s2074_s3 + $0x140] sm:$0xff] %vm1623_vm3, %v1352_v15  ;;  %v1321_v18 = vpack.c.bf16 %v453_v16, %v451_v10  ;;  %v1353_v19 = vpack.c.bf16 %v613_v17, %v611_v11 }
 0x105   :  { %1121 = vst.msk [vmem:[%s2074_s3 + $0x48] sm:$0xff] %vm1623_vm3, %v1321_v18  ;;  %1153 = vst.msk [vmem:[%s2074_s3 + $0x148] sm:$0xff] %vm1623_vm3, %v1353_v19  ;;  %v456_v20 = vpop.f32.mrb[20].mxu0  ;;  %v616_v21 = vpop.f32.mrb[20].mxu1 }
 0x106   :  { %v457_v22 = vadd.f32 %v456_v20, %v1615_v42  ;;  %v617_v23 = vadd.f32 %v616_v21, %v1615_v42  ;;  %v458_v24 = vpop.f32.mrb[21].mxu0  ;;  %v618_v25 = vpop.f32.mrb[21].mxu1 }
 0x107   :  { %v459_v26 = vadd.f32 %v458_v24, %v1617_v43  ;;  %v619_v27 = vadd.f32 %v618_v25, %v1617_v43  ;;  %v460_v28 = vpop.f32.mrb[22].mxu0  ;;  %v620_v29 = vpop.f32.mrb[22].mxu1 }
 0x108   :  { %v461_v30 = vadd.f32 %v460_v28, %v1615_v42  ;;  %v621_v31 = vadd.f32 %v620_v29, %v1615_v42  ;;  %v462_v32 = vpop.f32.mrb[23].mxu0  ;;  %v622_v33 = vpop.f32.mrb[23].mxu1 }
 0x109   :  { %v1322_v34 = vpack.c.bf16 %v459_v26, %v457_v22  ;;  %v1354_v35 = vpack.c.bf16 %v619_v27, %v617_v23  ;;  %v463_v36 = vadd.f32 %v462_v32, %v1617_v43  ;;  %v623_v37 = vadd.f32 %v622_v33, %v1617_v43 }
 0x10b   :  { %1122 = vst.msk [vmem:[%s2074_s3 + $0x50] sm:$0xff] %vm1623_vm3, %v1322_v34  ;;  %1154 = vst.msk [vmem:[%s2074_s3 + $0x150] sm:$0xff] %vm1623_vm3, %v1354_v35  ;;  %v1323_v38 = vpack.c.bf16 %v463_v36, %v461_v30  ;;  %v1355_v39 = vpack.c.bf16 %v623_v37, %v621_v31 }
 0x10d   :  { %1123 = vst.msk [vmem:[%s2074_s3 + $0x58] sm:$0xff] %vm1623_vm3, %v1323_v38  ;;  %1155 = vst.msk [vmem:[%s2074_s3 + $0x158] sm:$0xff] %vm1623_vm3, %v1355_v39  ;;  %v466_v40 = vpop.f32.mrb[24].mxu0  ;;  %v626_v41 = vpop.f32.mrb[24].mxu1 }
 0x10e   :  { %v467_v44 = vadd.f32 %v466_v40, %v1615_v42  ;;  %v627_v45 = vadd.f32 %v626_v41, %v1615_v42  ;;  %v468_v46 = vpop.f32.mrb[25].mxu0  ;;  %v628_v47 = vpop.f32.mrb[25].mxu1 }
 0x10f   :  { %v469_v48 = vadd.f32 %v468_v46, %v1617_v43  ;;  %v629_v49 = vadd.f32 %v628_v47, %v1617_v43  ;;  %v470_v50 = vpop.f32.mrb[26].mxu0  ;;  %v630_v51 = vpop.f32.mrb[26].mxu1 }
 0x110   :  { %v471_v52 = vadd.f32 %v470_v50, %v1615_v42  ;;  %v631_v53 = vadd.f32 %v630_v51, %v1615_v42  ;;  %v472_v55 = vpop.f32.mrb[27].mxu0  ;;  %v632_v56 = vpop.f32.mrb[27].mxu1 }
 0x111   :  { %v1324_v57 = vpack.c.bf16 %v469_v48, %v467_v44  ;;  %v1356_v58 = vpack.c.bf16 %v629_v49, %v627_v45  ;;  %v473_v59 = vadd.f32 %v472_v55, %v1617_v43  ;;  %v633_v60 = vadd.f32 %v632_v56, %v1617_v43 }
 0x113   :  { %1124 = vst.msk [vmem:[%s2074_s3 + $0x60] sm:$0xff] %vm1623_vm3, %v1324_v57  ;;  %1156 = vst.msk [vmem:[%s2074_s3 + $0x160] sm:$0xff] %vm1623_vm3, %v1356_v58  ;;  %v1325_v61 = vpack.c.bf16 %v473_v59, %v471_v52  ;;  %v1357_v62 = vpack.c.bf16 %v633_v60, %v631_v53 }
 0x115   :  { %1125 = vst.msk [vmem:[%s2074_s3 + $0x68] sm:$0xff] %vm1623_vm3, %v1325_v61  ;;  %1157 = vst.msk [vmem:[%s2074_s3 + $0x168] sm:$0xff] %vm1623_vm3, %v1357_v62  ;;  %v476_v63 = vpop.f32.mrb[28].mxu0  ;;  %v636_v0 = vpop.f32.mrb[28].mxu1 }
 0x116   :  { %v477_v1 = vadd.f32 %v476_v63, %v1615_v42  ;;  %v637_v2 = vadd.f32 %v636_v0, %v1615_v42  ;;  %v478_v3 = vpop.f32.mrb[29].mxu0  ;;  %v638_v4 = vpop.f32.mrb[29].mxu1 }
 0x117   :  { %v479_v5 = vadd.f32 %v478_v3, %v1617_v43  ;;  %v639_v6 = vadd.f32 %v638_v4, %v1617_v43  ;;  %v480_v7 = vpop.f32.mrb[30].mxu0  ;;  %v640_v8 = vpop.f32.mrb[30].mxu1 }
 0x118   :  { %v481_v9 = vadd.f32 %v480_v7, %v1615_v42  ;;  %v641_v10 = vadd.f32 %v640_v8, %v1615_v42  ;;  %v482_v11 = vpop.f32.mrb[31].mxu0  ;;  %v642_v12 = vpop.f32.mrb[31].mxu1 }
 0x119   :  { %v1326_v13 = vpack.c.bf16 %v479_v5, %v477_v1  ;;  %v1358_v14 = vpack.c.bf16 %v639_v6, %v637_v2  ;;  %v483_v15 = vadd.f32 %v482_v11, %v1617_v43  ;;  %v643_v16 = vadd.f32 %v642_v12, %v1617_v43 }
 0x11b   :  { %1126 = vst.msk [vmem:[%s2074_s3 + $0x70] sm:$0xff] %vm1623_vm3, %v1326_v13  ;;  %1158 = vst.msk [vmem:[%s2074_s3 + $0x170] sm:$0xff] %vm1623_vm3, %v1358_v14  ;;  %v1327_v17 = vpack.c.bf16 %v483_v15, %v481_v9  ;;  %v1359_v18 = vpack.c.bf16 %v643_v16, %v641_v10 }
 0x11d   :  { %1127 = vst.msk [vmem:[%s2074_s3 + $0x78] sm:$0xff] %vm1623_vm3, %v1327_v17  ;;  %1159 = vst.msk [vmem:[%s2074_s3 + $0x178] sm:$0xff] %vm1623_vm3, %v1359_v18  ;;  %v486_v19 = vpop.f32.mrb[32].mxu0  ;;  %v646_v20 = vpop.f32.mrb[32].mxu1 }
 0x11e   :  { %v487_v21 = vadd.f32 %v486_v19, %v1615_v42  ;;  %v647_v22 = vadd.f32 %v646_v20, %v1615_v42  ;;  %v488_v23 = vpop.f32.mrb[33].mxu0  ;;  %v648_v24 = vpop.f32.mrb[33].mxu1 }
 0x11f   :  { %v489_v25 = vadd.f32 %v488_v23, %v1617_v43  ;;  %v649_v26 = vadd.f32 %v648_v24, %v1617_v43  ;;  %v490_v27 = vpop.f32.mrb[34].mxu0  ;;  %v650_v28 = vpop.f32.mrb[34].mxu1 }
 0x120   :  { %v491_v29 = vadd.f32 %v490_v27, %v1615_v42  ;;  %v651_v30 = vadd.f32 %v650_v28, %v1615_v42  ;;  %v492_v31 = vpop.f32.mrb[35].mxu0  ;;  %v652_v32 = vpop.f32.mrb[35].mxu1 }
 0x121   :  { %v1328_v33 = vpack.c.bf16 %v489_v25, %v487_v21  ;;  %v1360_v34 = vpack.c.bf16 %v649_v26, %v647_v22  ;;  %v493_v35 = vadd.f32 %v492_v31, %v1617_v43  ;;  %v653_v36 = vadd.f32 %v652_v32, %v1617_v43 }
 0x123   :  { %1128 = vst.msk [vmem:[%s2074_s3 + $0x80] sm:$0xff] %vm1623_vm3, %v1328_v33  ;;  %1160 = vst.msk [vmem:[%s2074_s3 + $0x180] sm:$0xff] %vm1623_vm3, %v1360_v34  ;;  %v1329_v37 = vpack.c.bf16 %v493_v35, %v491_v29  ;;  %v1361_v38 = vpack.c.bf16 %v653_v36, %v651_v30 }
 0x125   :  { %1129 = vst.msk [vmem:[%s2074_s3 + $0x88] sm:$0xff] %vm1623_vm3, %v1329_v37  ;;  %1161 = vst.msk [vmem:[%s2074_s3 + $0x188] sm:$0xff] %vm1623_vm3, %v1361_v38  ;;  %v496_v39 = vpop.f32.mrb[36].mxu0  ;;  %v656_v40 = vpop.f32.mrb[36].mxu1 }
 0x126   :  { %v497_v41 = vadd.f32 %v496_v39, %v1615_v42  ;;  %v657_v44 = vadd.f32 %v656_v40, %v1615_v42  ;;  %v498_v45 = vpop.f32.mrb[37].mxu0  ;;  %v658_v46 = vpop.f32.mrb[37].mxu1 }
 0x127   :  { %v499_v47 = vadd.f32 %v498_v45, %v1617_v43  ;;  %v659_v48 = vadd.f32 %v658_v46, %v1617_v43  ;;  %v500_v49 = vpop.f32.mrb[38].mxu0  ;;  %v660_v50 = vpop.f32.mrb[38].mxu1 }
 0x128   :  { %v501_v51 = vadd.f32 %v500_v49, %v1615_v42  ;;  %v661_v52 = vadd.f32 %v660_v50, %v1615_v42  ;;  %v502_v53 = vpop.f32.mrb[39].mxu0  ;;  %v662_v55 = vpop.f32.mrb[39].mxu1 }
 0x129   :  { %v1330_v56 = vpack.c.bf16 %v499_v47, %v497_v41  ;;  %v1362_v57 = vpack.c.bf16 %v659_v48, %v657_v44  ;;  %v503_v58 = vadd.f32 %v502_v53, %v1617_v43  ;;  %v663_v59 = vadd.f32 %v662_v55, %v1617_v43 }
 0x12b   :  { %1130 = vst.msk [vmem:[%s2074_s3 + $0x90] sm:$0xff] %vm1623_vm3, %v1330_v56  ;;  %1162 = vst.msk [vmem:[%s2074_s3 + $0x190] sm:$0xff] %vm1623_vm3, %v1362_v57  ;;  %v1331_v60 = vpack.c.bf16 %v503_v58, %v501_v51  ;;  %v1363_v61 = vpack.c.bf16 %v663_v59, %v661_v52 }
 0x12d   :  { %1131 = vst.msk [vmem:[%s2074_s3 + $0x98] sm:$0xff] %vm1623_vm3, %v1331_v60  ;;  %1163 = vst.msk [vmem:[%s2074_s3 + $0x198] sm:$0xff] %vm1623_vm3, %v1363_v61  ;;  %v506_v62 = vpop.f32.mrb[40].mxu0  ;;  %v666_v63 = vpop.f32.mrb[40].mxu1 }
 0x12e   :  { %v507_v0 = vadd.f32 %v506_v62, %v1615_v42  ;;  %v667_v1 = vadd.f32 %v666_v63, %v1615_v42  ;;  %v508_v2 = vpop.f32.mrb[41].mxu0  ;;  %v668_v3 = vpop.f32.mrb[41].mxu1 }
 0x12f   :  { %v509_v4 = vadd.f32 %v508_v2, %v1617_v43  ;;  %v669_v5 = vadd.f32 %v668_v3, %v1617_v43  ;;  %v510_v6 = vpop.f32.mrb[42].mxu0  ;;  %v670_v7 = vpop.f32.mrb[42].mxu1 }
 0x130   :  { %v511_v8 = vadd.f32 %v510_v6, %v1615_v42  ;;  %v671_v9 = vadd.f32 %v670_v7, %v1615_v42  ;;  %v512_v10 = vpop.f32.mrb[43].mxu0  ;;  %v672_v11 = vpop.f32.mrb[43].mxu1 }
 0x131   :  { %v1332_v12 = vpack.c.bf16 %v509_v4, %v507_v0  ;;  %v1364_v13 = vpack.c.bf16 %v669_v5, %v667_v1  ;;  %v513_v14 = vadd.f32 %v512_v10, %v1617_v43  ;;  %v673_v15 = vadd.f32 %v672_v11, %v1617_v43 }
 0x133   :  { %1132 = vst.msk [vmem:[%s2074_s3 + $0xa0] sm:$0xff] %vm1623_vm3, %v1332_v12  ;;  %1164 = vst.msk [vmem:[%s2074_s3 + $0x1a0] sm:$0xff] %vm1623_vm3, %v1364_v13  ;;  %v1333_v16 = vpack.c.bf16 %v513_v14, %v511_v8  ;;  %v1365_v17 = vpack.c.bf16 %v673_v15, %v671_v9 }
 0x135   :  { %1133 = vst.msk [vmem:[%s2074_s3 + $0xa8] sm:$0xff] %vm1623_vm3, %v1333_v16  ;;  %1165 = vst.msk [vmem:[%s2074_s3 + $0x1a8] sm:$0xff] %vm1623_vm3, %v1365_v17  ;;  %v516_v18 = vpop.f32.mrb[44].mxu0  ;;  %v676_v19 = vpop.f32.mrb[44].mxu1 }
 0x136   :  { %v517_v20 = vadd.f32 %v516_v18, %v1615_v42  ;;  %v677_v21 = vadd.f32 %v676_v19, %v1615_v42  ;;  %v518_v22 = vpop.f32.mrb[45].mxu0  ;;  %v678_v23 = vpop.f32.mrb[45].mxu1 }
 0x137   :  { %v519_v24 = vadd.f32 %v518_v22, %v1617_v43  ;;  %v679_v25 = vadd.f32 %v678_v23, %v1617_v43  ;;  %v520_v26 = vpop.f32.mrb[46].mxu0  ;;  %v680_v27 = vpop.f32.mrb[46].mxu1 }
 0x138   :  { %v521_v28 = vadd.f32 %v520_v26, %v1615_v42  ;;  %v681_v29 = vadd.f32 %v680_v27, %v1615_v42  ;;  %v522_v30 = vpop.f32.mrb[47].mxu0  ;;  %v682_v31 = vpop.f32.mrb[47].mxu1 }
 0x139   :  { %v1334_v32 = vpack.c.bf16 %v519_v24, %v517_v20  ;;  %v1366_v33 = vpack.c.bf16 %v679_v25, %v677_v21  ;;  %v523_v34 = vadd.f32 %v522_v30, %v1617_v43  ;;  %v683_v35 = vadd.f32 %v682_v31, %v1617_v43 }
 0x13b   :  { %1134 = vst.msk [vmem:[%s2074_s3 + $0xb0] sm:$0xff] %vm1623_vm3, %v1334_v32  ;;  %1166 = vst.msk [vmem:[%s2074_s3 + $0x1b0] sm:$0xff] %vm1623_vm3, %v1366_v33  ;;  %v1335_v36 = vpack.c.bf16 %v523_v34, %v521_v28  ;;  %v1367_v37 = vpack.c.bf16 %v683_v35, %v681_v29 }
 0x13d   :  { %1135 = vst.msk [vmem:[%s2074_s3 + $0xb8] sm:$0xff] %vm1623_vm3, %v1335_v36  ;;  %1167 = vst.msk [vmem:[%s2074_s3 + $0x1b8] sm:$0xff] %vm1623_vm3, %v1367_v37  ;;  %v526_v38 = vpop.f32.mrb[48].mxu0  ;;  %v686_v39 = vpop.f32.mrb[48].mxu1 }
 0x13e   :  { %v527_v40 = vadd.f32 %v526_v38, %v1615_v42  ;;  %v687_v41 = vadd.f32 %v686_v39, %v1615_v42  ;;  %v528_v44 = vpop.f32.mrb[49].mxu0  ;;  %v688_v45 = vpop.f32.mrb[49].mxu1 }
 0x13f   :  { %v529_v46 = vadd.f32 %v528_v44, %v1617_v43  ;;  %v689_v47 = vadd.f32 %v688_v45, %v1617_v43  ;;  %v530_v48 = vpop.f32.mrb[50].mxu0  ;;  %v690_v49 = vpop.f32.mrb[50].mxu1 }
 0x140   :  { %v531_v50 = vadd.f32 %v530_v48, %v1615_v42  ;;  %v691_v51 = vadd.f32 %v690_v49, %v1615_v42  ;;  %v532_v52 = vpop.f32.mrb[51].mxu0  ;;  %v692_v53 = vpop.f32.mrb[51].mxu1 }
 0x141   :  { %v1336_v55 = vpack.c.bf16 %v529_v46, %v527_v40  ;;  %v1368_v56 = vpack.c.bf16 %v689_v47, %v687_v41  ;;  %v533_v57 = vadd.f32 %v532_v52, %v1617_v43  ;;  %v693_v58 = vadd.f32 %v692_v53, %v1617_v43 }
 0x143   :  { %1136 = vst.msk [vmem:[%s2074_s3 + $0xc0] sm:$0xff] %vm1623_vm3, %v1336_v55  ;;  %1168 = vst.msk [vmem:[%s2074_s3 + $0x1c0] sm:$0xff] %vm1623_vm3, %v1368_v56  ;;  %v1337_v59 = vpack.c.bf16 %v533_v57, %v531_v50  ;;  %v1369_v60 = vpack.c.bf16 %v693_v58, %v691_v51 }
 0x145   :  { %1137 = vst.msk [vmem:[%s2074_s3 + $0xc8] sm:$0xff] %vm1623_vm3, %v1337_v59  ;;  %1169 = vst.msk [vmem:[%s2074_s3 + $0x1c8] sm:$0xff] %vm1623_vm3, %v1369_v60  ;;  %v536_v61 = vpop.f32.mrb[52].mxu0  ;;  %v696_v62 = vpop.f32.mrb[52].mxu1 }
 0x146   :  { %v537_v63 = vadd.f32 %v536_v61, %v1615_v42  ;;  %v697_v0 = vadd.f32 %v696_v62, %v1615_v42  ;;  %v538_v1 = vpop.f32.mrb[53].mxu0  ;;  %v698_v2 = vpop.f32.mrb[53].mxu1 }
 0x147   :  { %v539_v3 = vadd.f32 %v538_v1, %v1617_v43  ;;  %v699_v4 = vadd.f32 %v698_v2, %v1617_v43  ;;  %v540_v5 = vpop.f32.mrb[54].mxu0  ;;  %v700_v6 = vpop.f32.mrb[54].mxu1 }
 0x148   :  { %v541_v7 = vadd.f32 %v540_v5, %v1615_v42  ;;  %v701_v8 = vadd.f32 %v700_v6, %v1615_v42  ;;  %v542_v9 = vpop.f32.mrb[55].mxu0  ;;  %v702_v10 = vpop.f32.mrb[55].mxu1 }
 0x149   :  { %v1338_v11 = vpack.c.bf16 %v539_v3, %v537_v63  ;;  %v1370_v12 = vpack.c.bf16 %v699_v4, %v697_v0  ;;  %v543_v13 = vadd.f32 %v542_v9, %v1617_v43  ;;  %v703_v14 = vadd.f32 %v702_v10, %v1617_v43 }
 0x14b   :  { %1138 = vst.msk [vmem:[%s2074_s3 + $0xd0] sm:$0xff] %vm1623_vm3, %v1338_v11  ;;  %1170 = vst.msk [vmem:[%s2074_s3 + $0x1d0] sm:$0xff] %vm1623_vm3, %v1370_v12  ;;  %v1339_v15 = vpack.c.bf16 %v543_v13, %v541_v7  ;;  %v1371_v16 = vpack.c.bf16 %v703_v14, %v701_v8 }
 0x14d   :  { %1139 = vst.msk [vmem:[%s2074_s3 + $0xd8] sm:$0xff] %vm1623_vm3, %v1339_v15  ;;  %1171 = vst.msk [vmem:[%s2074_s3 + $0x1d8] sm:$0xff] %vm1623_vm3, %v1371_v16  ;;  %v546_v17 = vpop.f32.mrb[56].mxu0  ;;  %v706_v18 = vpop.f32.mrb[56].mxu1 }
 0x14e   :  { %v547_v19 = vadd.f32 %v546_v17, %v1615_v42  ;;  %v707_v20 = vadd.f32 %v706_v18, %v1615_v42  ;;  %v548_v21 = vpop.f32.mrb[57].mxu0  ;;  %v708_v22 = vpop.f32.mrb[57].mxu1 }
 0x14f   :  { %v549_v23 = vadd.f32 %v548_v21, %v1617_v43  ;;  %v709_v24 = vadd.f32 %v708_v22, %v1617_v43  ;;  %v550_v25 = vpop.f32.mrb[58].mxu0  ;;  %v710_v26 = vpop.f32.mrb[58].mxu1 }
 0x150   :  { %v551_v27 = vadd.f32 %v550_v25, %v1615_v42  ;;  %v711_v28 = vadd.f32 %v710_v26, %v1615_v42  ;;  %v552_v29 = vpop.f32.mrb[59].mxu0  ;;  %v712_v30 = vpop.f32.mrb[59].mxu1 }
 0x151   :  { %v1340_v31 = vpack.c.bf16 %v549_v23, %v547_v19  ;;  %v1372_v32 = vpack.c.bf16 %v709_v24, %v707_v20  ;;  %v553_v33 = vadd.f32 %v552_v29, %v1617_v43  ;;  %v713_v34 = vadd.f32 %v712_v30, %v1617_v43 }
 0x153   :  { %1140 = vst.msk [vmem:[%s2074_s3 + $0xe0] sm:$0xff] %vm1623_vm3, %v1340_v31  ;;  %1172 = vst.msk [vmem:[%s2074_s3 + $0x1e0] sm:$0xff] %vm1623_vm3, %v1372_v32  ;;  %v1341_v35 = vpack.c.bf16 %v553_v33, %v551_v27  ;;  %v1373_v36 = vpack.c.bf16 %v713_v34, %v711_v28 }
 0x155   :  { %1141 = vst.msk [vmem:[%s2074_s3 + $0xe8] sm:$0xff] %vm1623_vm3, %v1341_v35  ;;  %1173 = vst.msk [vmem:[%s2074_s3 + $0x1e8] sm:$0xff] %vm1623_vm3, %v1373_v36  ;;  %v556_v37 = vpop.f32.mrb[60].mxu0  ;;  %v716_v38 = vpop.f32.mrb[60].mxu1 }
 0x156   :  { %v557_v39 = vadd.f32 %v556_v37, %v1615_v42  ;;  %v717_v40 = vadd.f32 %v716_v38, %v1615_v42  ;;  %v558_v41 = vpop.f32.mrb[61].mxu0  ;;  %v718_v44 = vpop.f32.mrb[61].mxu1 }
 0x157   :  { %v559_v45 = vadd.f32 %v558_v41, %v1617_v43  ;;  %v719_v46 = vadd.f32 %v718_v44, %v1617_v43  ;;  %v560_v47 = vpop.f32.mrb[62].mxu0  ;;  %v720_v48 = vpop.f32.mrb[62].mxu1 }
 0x158   :  { %v561_v49 = vadd.f32 %v560_v47, %v1615_v42  ;;  %v721_v50 = vadd.f32 %v720_v48, %v1615_v42  ;;  %v562_v51 = vpop.f32.mrb[63].mxu0  ;;  %v722_v52 = vpop.f32.mrb[63].mxu1 }
 0x159   :  { %v1342_v53 = vpack.c.bf16 %v559_v45, %v557_v39  ;;  %v1374_v55 = vpack.c.bf16 %v719_v46, %v717_v40  ;;  %v563_v56 = vadd.f32 %v562_v51, %v1617_v43  ;;  %v723_v57 = vadd.f32 %v722_v52, %v1617_v43 }
 0x15b   :  { %1142 = vst.msk [vmem:[%s2074_s3 + $0xf0] sm:$0xff] %vm1623_vm3, %v1342_v53  ;;  %1174 = vst.msk [vmem:[%s2074_s3 + $0x1f0] sm:$0xff] %vm1623_vm3, %v1374_v55  ;;  %v1343_v42 = vpack.c.bf16 %v563_v56, %v561_v49  ;;  %v1375_v58 = vpack.c.bf16 %v723_v57, %v721_v50 }
 0x15d   :  { %1143 = vst.msk [vmem:[%s2074_s3 + $0xf8] sm:$0xff] %vm1623_vm3, %v1343_v42  ;;  %1175 = vst.msk [vmem:[%s2074_s3 + $0x1f8] sm:$0xff] %vm1623_vm3, %v1375_v58 }

// kernel: multiscale_attention_forward.3
= control target key start
LH: loop header
LB: loop body
LE: loop exit
PB: predicated region body
PF: predicated region fallthrough
CT: control target
= control target key end

     0   :  { %10 = vsyncpa [#allocation3], 0  ;;  %s5930_s0 = inlined_call_operand.vmem [shape: bf16[2,256,64], index: 0, kind: input, shape index: {}]   ;;  %s5931_s1 = inlined_call_operand.vmem [shape: bf16[2,64,256], index: 1, kind: input, shape index: {}]   ;;  %s5932_s2 = inlined_call_operand.vmem [shape: bf16[2,256,64], index: 2, kind: input, shape index: {}]   ;;  %s5933_s3 = inlined_call_operand.vmem [shape: bf16[64,64], index: 3, kind: input, shape index: {}]   ;;  %s5934_s4 = inlined_call_operand.vmem [shape: f32[1,64], index: 4, kind: input, shape index: {}]   ;;  %s5935_s5 = inlined_call_operand.hbm [shape: bf16[2,256,64], index: 5, kind: output, shape index: {}]  }
   0x1   :  { %12 = vsyncpa [#allocation3 + $0x1], 0  ;;  %s4143_s18 = smov 0   ;;  %s4145_s19 = smov 0  }
   0x2   :  { %s4147_s20 = smov 0   ;;  %s4149_s21 = smov 0  }
   0x3   :  { %s4151_s22 = smov 0   ;;  %s4153_s23 = smov 0  }
   0x4 LB: > { %s3069_s24 = sadd.s32 4294967295, %s4105_s23   ;;  %s3070_s25 = sadd.s32 4294967294, %s4105_s23   ;;  %s4105_s23 = sphi %s4153_s23, %s18_s23   ;;  %s4101_s22 = sphi %s4151_s22, %s6294_s22   ;;  %s4097_s21 = sphi %s4149_s21, %s6293_s21   ;;  %s4093_s20 = sphi %s4147_s20, %s6292_s20   ;;  %s4089_s19 = sphi %s4145_s19, %s6291_s19   ;;  %s4085_s18 = sphi %s4143_s18, %s6290_s18  }
   0x5   : > { %s30_s26 = sadd.s32 1, %s4101_s22  ;;  %s161_s27 = sadd.s32 1, %s4093_s20 }
   0x6   : > { %p32_p0 = scmp.ge.s32.totalorder %s30_s26, 2  ;;  %p171_p1 = scmp.ne.s32.totalorder %s4093_s20, %s4089_s19 }
   0x7   : > { %p172_p2 = scmp.eq.s32.totalorder %s3069_s24, 1  ;;  %p177_p3 = scmp.ne.s32.totalorder %s4089_s19, %s4085_s18 }
   0x8   : > { %s6296_s26 = smov (%p32_p0, %s30_s26), 0  ;;  %p178_p5 = scmp.eq.s32.totalorder %s3070_s25, 1 }
   0x9   : > { %p4183_p4 = por %p172_p2, %p171_p1  ;;  %s156_s29 = ssub.s32 %s4101_s22, %s6296_s26 }
   0xa   : > { %p3073_p6 = scmp.ge.s32.totalorder %s4105_s23, 1  ;;  %p159_p7 = scmp.eq.s32.totalorder %s156_s29, 0 }
   0xb   : > { %p4190_p8 = por %p178_p5, %p177_p3  ;;  %p231_p9 = scmp.lt.s32.totalorder %s4105_s23, 3 }
   0xc   : > { %s4196_s6 = scalar_select %p159_p7, %s4093_s20, %s161_s27  }
   0xd   : > { %p232_p10 = pnand %p3073_p6, %p231_p9 }
   0xf   : > { %235 = sbr.rel (%p232_p10) target bundleno = 1306 (0x51a), region = 40 }
  0x16   : > { %p274_p11 = scmp.lt.s32.totalorder %s4097_s21, 1  ;;  %v4107_v0 = vmov 0   ;;  %s4108_s16 = smov 96   ;;  %vm468_vm0 = vcmask 261120   ;;  %vm2595_vm1 = vcmask 523264   ;;  %vm2917_vm2 = vcmask 519168  }
  0x17   : > { %549 = vmatprep.mubr.bf16.mxu0 %v4107_v0  ;;  %669 = vmatprep.mubr.bf16.mxu1 %v4107_v0  ;;  %s4109_s13 = smov 32   ;;  %s270_s14 = sand.u32 1, %s4089_s19  }
  0x18   : > { %s4202_s7 = scalar_select %p274_p11, %s4097_s21, 1 }
  0x19   : > { %s3074_s17 = sshll.u32 %s270_s14, 7  ;;  %s4110_s10 = smov [#allocation2]  }
  0x1a   : > { %s3211_s8 = sshll.u32 %s4202_s7, 7  ;;  %s3212_s9 = sshll.u32 %s4202_s7, 6 }
  0x1b   : > { %s4209_s12 = scalar_lea.vmem %s5931_s1, %s3212_s9  ;;  %s4216_s15 = scalar_lea.vmem %s5930_s0, %s3211_s8 }
  0x1c   : > { %v3595_v1 = vld [vmem:[%s4209_s12 + $0x4] ss:$8 sps:$4 sm:$0xff]   ;;  %v3597_v2 = vld [vmem:[%s4209_s12] ss:$8 sps:$4 sm:$0xff]   ;;  %v3598_v3 = vld [vmem:[%s4209_s12 + $0x14] ss:$8 sps:$4 sm:$0xff]   ;;  %s4255_s25 = scalar_lea.vmem %s5932_s2, %s3211_s8 }
  0x1d   : > { %517 = vmatprep.subr.bf16.mxu0 %v3595_v1  ;;  %3531 = vmatprep.subr.bf16.mxu1 %v3595_v1  ;;  %v3600_v4 = vld [vmem:[%s4209_s12 + $0x10] ss:$8 sps:$4 sm:$0xff]   ;;  %v3601_v5 = vld [vmem:[%s4216_s15] sm:$0xff]   ;;  %v3603_v7 = vld [vmem:[%s4216_s15 + $0x8] sm:$0xff]   ;;  %s5779_s24 = scalar_lea.vmem [#allocation2], %s3074_s17  ;;  %s4031_s11 = sshll.u32 %s4110_s10, 4  ;;  %s4032_s11 = int_to_ptr.vmem [resolvable:$false] %s4031_s11 }
  0x1e   : > { %518 = vmatpush1.bf16.msra.mxu0 %v3597_v2  ;;  %3533 = vmatpush1.bf16.msra.mxu1 %v3597_v2  ;;  %v3602_v6 = vld [vmem:[%s4216_s15 + $0x60] sm:$0xff]   ;;  %v3605_v8 = vld [vmem:[%s4216_s15 + $0x10] sm:$0xff]   ;;  %v3607_v9 = vld [vmem:[%s4216_s15 + $0x18] sm:$0xff]   ;;  %s2966_s27 = sshll.u32 %s5779_s24, 4  ;;  %s5874_s27 = int_to_ptr.vmem [resolvable:$true] %s2966_s27 }
  0x1f   : > { %519 = vmatprep.subr.bf16.mxu0 %v3598_v3  ;;  %3532 = vmatprep.subr.bf16.mxu1 %v3598_v3  ;;  %v3609_v10 = vld [vmem:[%s4216_s15 + $0x20] sm:$0xff]   ;;  %v3604_v13 = vld [vmem:[%s4216_s15 + $0x68] sm:$0xff]   ;;  %v4248_v15 = vld [vmem:[%s4216_s15 + $0x30] sm:$0xff]   ;;  %s4027_s9 = scalar_lea.vmem %s5874_s27, 2048  ;;  %p4034_p1 = scmp.lt.s32.totalorder %s5874_s27, %s4032_s11 }
  0x20   : > { %1463 = vrot.lane.b32.xlu0 %v3601_v5, %s4108_s16  ;;  %1467 = vrot.lane.b32.xlu1 %v3605_v8, %s4108_s16  ;;  %v3610_v11 = vld [vmem:[%s4209_s12 + $0x20] ss:$8 sps:$4 sm:$0xff]   ;;  %v3612_v12 = vld [vmem:[%s4209_s12 + $0x24] ss:$8 sps:$4 sm:$0xff]   ;;  %p4028_p12 = scmp.ne.s32.totalorder %s5874_s27, %s4027_s9 }
  0x21   : > { %v4241_v14 = vld [vmem:[%s4216_s15 + $0x28] sm:$0xff]   ;;  %v4260_v16 = vld [vmem:[%s4216_s15 + $0x38] sm:$0xff]   ;;  %v3606_v17 = vld [vmem:[%s4216_s15 + $0x70] sm:$0xff]  }
  0x22   : > { %520 = vmatpush1.bf16.msra.mxu0 %v3600_v4  ;;  %3534 = vmatpush1.bf16.msra.mxu1 %v3600_v4  ;;  %v4266_v18 = vld [vmem:[%s4216_s15 + $0x40] sm:$0xff]   ;;  %v3619_v19 = vld [vmem:[%s4209_s12 + $0x30] ss:$8 sps:$4 sm:$0xff]   ;;  %v3621_v20 = vld [vmem:[%s4209_s12 + $0x34] ss:$8 sps:$4 sm:$0xff]   ;;  %p4029_p13 = pnand %p4028_p12, %p4183_p4  ;;  %s4033_s12 = scalar_lea.vmem %s4032_s11, 4096 }
  0x23   : > { %1563 = vmatprep.subr.bf16.mxu0 %v3612_v12  ;;  %v4273_v21 = vld [vmem:[%s4216_s15 + $0x48] sm:$0xff]   ;;  %v3623_v22 = vld [vmem:[%s4255_s25 + $0x40] sm:$0xff]   ;;  %v4279_v23 = vld [vmem:[%s4216_s15 + $0x50] sm:$0xff]   ;;  %p4035_p2 = scmp.lt.s32.totalorder %s4033_s12, %s4027_s9 }
  0x24   : > { %1465 = vrot.lane.b32.xlu0 %v3603_v7, %s4108_s16  ;;  %1469 = vrot.lane.b32.xlu1 %v3607_v9, %s4108_s16  ;;  %v4284_v24 = vld [vmem:[%s4216_s15 + $0x58] sm:$0xff]   ;;  %v3627_v26 = vld [vmem:[%s4255_s25] sm:$0xff]   ;;  %p4030_p0 = pneg %p4029_p13 }
  0x25   : > { %3101 = vmatmul.mubr.msk.bf16.vlgmr.msra.gmra.mrb[0].mxu0 %vm468_vm0, %v3601_v5  ;;  %3113 = vmatmul.mubr.msk.bf16.vlgmr.msra.gmra.mrb[0].mxu1 %vm468_vm0, %v3602_v6  ;;  %v3608_v25 = vld [vmem:[%s4216_s15 + $0x78] sm:$0xff]   ;;  %v3624_v27 = vld [vmem:[%s4255_s25 + $0x48] sm:$0xff]   ;;  %v3629_v29 = vld [vmem:[%s4255_s25 + $0x50] sm:$0xff]   ;;  %p4036_p3 = por %p4035_p2, %p4034_p1 }
  0x26   : > { %559 = vmatprep.mubr.bf16.mxu0 %v4107_v0  ;;  %679 = vmatprep.mubr.bf16.mxu1 %v4107_v0  ;;  %v3625_v28 = vld [vmem:[%s4255_s25 + $0x8] sm:$0xff]   ;;  %v3626_v30 = vld [vmem:[%s4255_s25 + $0x10] sm:$0xff]   ;;  %v3631_v31 = vld [vmem:[%s4255_s25 + $0x58] sm:$0xff]  }
  0x27   : > { %1564 = vmatpush1.bf16.msra.mxu0 %v3610_v11  ;;  %3247 = vmatprep.subr.bf16.mxu1 %v3623_v22  ;;  %v3628_v32 = vld [vmem:[%s4255_s25 + $0x18] sm:$0xff]   ;;  %v3633_v33 = vld [vmem:[%s4255_s25 + $0x60] sm:$0xff]   ;;  %v3634_v35 = vld [vmem:[%s4255_s25 + $0x68] sm:$0xff]   ;;  %p4037_p5 = pnand %p4036_p3, %p4030_p0 }
  0x28   : > { %1471 = vrot.lane.b32.xlu0 %v3609_v10, %s4108_s16  ;;  %1473 = vrot.lane.b32.xlu1 %v4241_v14, %s4108_s16  ;;  %v3630_v34 = vld [vmem:[%s4255_s25 + $0x20] sm:$0xff]   ;;  %v3632_v36 = vld [vmem:[%s4255_s25 + $0x28] sm:$0xff]  }
  0x29   : > { %1565 = vmatprep.subr.bf16.mxu0 %v3621_v20  ;;  %3248 = vmatpush3.bf16.msra.mxu1 %v3627_v26  ;;  %v4365_v48 = vld [vmem:[%s4255_s25 + $0x70] sm:$0xff]   ;;  %v4375_v52 = vld [vmem:[%s4255_s25 + $0x78] sm:$0xff]  }
  0x2a   : > { %3249 = vmatprep.subr.bf16.mxu1 %v3624_v27  ;;  %v4368_v49 = vld [vmem:[%s4255_s25 + $0x30] sm:$0xff]   ;;  %v4378_v53 = vld [vmem:[%s4255_s25 + $0x38] sm:$0xff]   ;;  %s3246_s25 = sshll.u32 %s4097_s21, 11  ;;  %s5884_s21 = scalar_lea.sflag [#allocation3], %s270_s14 }
  0x2b   : > { %1566 = vmatpush1.bf16.msra.mxu0 %v3619_v19  ;;  %s5872_s8 = scalar_lea.hbm %s5935_s5, %s3246_s25 }
  0x2c   : > { %1475 = vrot.lane.b32.xlu0 %v4248_v15, %s4108_s16  ;;  %1477 = vrot.lane.b32.xlu1 %v4260_v16, %s4108_s16 }
  0x2d   : > { %3102 = vmatmul.mubr.msk.bf16.gmra.mrb[4].mxu0 %vm468_vm0, %v3603_v7  ;;  %3114 = vmatmul.mubr.msk.bf16.gmra.mrb[4].mxu1 %vm468_vm0, %v3604_v13 }
  0x2e   : > { %569 = vmatprep.mubr.bf16.mxu0 %v4107_v0  ;;  %689 = vmatprep.mubr.bf16.mxu1 %v4107_v0 }
  0x2f   : > { %3250 = vmatpush3.bf16.msra.mxu1 %v3625_v28 }
  0x30   : > { %1479 = vrot.lane.b32.xlu0 %v4266_v18, %s4108_s16  ;;  %1481 = vrot.lane.b32.xlu1 %v4273_v21, %s4108_s16 }
  0x31   : > { %3251 = vmatprep.subr.bf16.mxu1 %v3629_v29 }
  0x33   : > { %3252 = vmatpush3.bf16.msra.mxu1 %v3626_v30 }
  0x34   : > { %1483 = vrot.lane.b32.xlu0 %v4279_v23, %s4108_s16  ;;  %1485 = vrot.lane.b32.xlu1 %v4284_v24, %s4108_s16 }
  0x35   : > { %3103 = vmatmul.mubr.msk.bf16.gmra.mrb[8].mxu0 %vm468_vm0, %v3605_v8  ;;  %3115 = vmatmul.mubr.msk.bf16.gmra.mrb[8].mxu1 %vm468_vm0, %v3606_v17 }
  0x36   : > { %579 = vmatprep.mubr.bf16.mxu0 %v4107_v0  ;;  %699 = vmatprep.mubr.bf16.mxu1 %v4107_v0 }
  0x37   : > { %3253 = vmatprep.subr.bf16.mxu1 %v3631_v31 }
  0x38   : > { %1487 = vrot.lane.b32.xlu0 %v3602_v6, %s4108_s16  ;;  %1489 = vrot.lane.b32.xlu1 %v3604_v13, %s4108_s16 }
  0x39   : > { %3254 = vmatpush3.bf16.msra.mxu1 %v3628_v32 }
  0x3a   : > { %3255 = vmatprep.subr.bf16.mxu1 %v3633_v33 }
  0x3c   : > { %1491 = vrot.lane.b32.xlu0 %v3606_v17, %s4108_s16  ;;  %1493 = vrot.lane.b32.xlu1 %v3608_v25, %s4108_s16 }
  0x3d   : > { %3104 = vmatmul.mubr.msk.bf16.gmra.mrb[12].mxu0 %vm468_vm0, %v3607_v9  ;;  %3116 = vmatmul.mubr.msk.bf16.gmra.mrb[12].mxu1 %vm468_vm0, %v3608_v25 }
  0x3e   : > { %589 = vmatprep.mubr.bf16.mxu0 %v4107_v0  ;;  %3256 = vmatpush3.bf16.msra.mxu1 %v3630_v34 }
  0x3f   : > { %3257 = vmatprep.subr.bf16.mxu1 %v3634_v35 }
  0x40   : > { %2172 = vrot.lane.b32.xlu0 %v3627_v26, %s4108_s16  ;;  %2188 = vrot.lane.b32.xlu1 %v3623_v22, %s4108_s16 }
  0x42   : > { %3258 = vmatpush3.bf16.msra.mxu1 %v3632_v36 }
  0x43   : > { %3259 = vmatprep.subr.bf16.mxu1 %v4365_v48 }
  0x44   : > { %2192 = vrot.lane.b32.xlu0 %v3629_v29, %s4108_s16  ;;  %2190 = vrot.lane.b32.xlu1 %v3624_v27, %s4108_s16 }
  0x45   : > { %3105 = vmatmul.mubr.msk.bf16.gmra.mrb[16].mxu0 %vm468_vm0, %v3609_v10 }
  0x46   : > { %599 = vmatprep.mubr.bf16.mxu0 %v4107_v0  ;;  %3260 = vmatpush3.bf16.msra.mxu1 %v4368_v49 }
  0x47   : > { %3261 = vmatprep.subr.bf16.mxu1 %v4375_v52 }
  0x48   : > { %2194 = vrot.lane.b32.xlu0 %v3631_v31, %s4108_s16  ;;  %2174 = vrot.lane.b32.xlu1 %v3625_v28, %s4108_s16 }
  0x4a   : > { %3262 = vmatpush3.bf16.msra.mxu1 %v4378_v53 }
  0x4c   : > { %2196 = vrot.lane.b32.xlu0 %v3633_v33, %s4108_s16  ;;  %2176 = vrot.lane.b32.xlu1 %v3626_v30, %s4108_s16 }
  0x4d   : > { %3106 = vmatmul.mubr.msk.bf16.gmra.mrb[20].mxu0 %vm468_vm0, %v4241_v14 }
  0x4e   : > { %609 = vmatprep.mubr.bf16.mxu0 %v4107_v0 }
  0x50   : > { %2198 = vrot.lane.b32.xlu0 %v3634_v35, %s4108_s16  ;;  %2178 = vrot.lane.b32.xlu1 %v3628_v32, %s4108_s16 }
  0x54   : > { %2180 = vrot.lane.b32.xlu1 %v3630_v34, %s4108_s16 }
  0x55   : > { %3107 = vmatmul.mubr.msk.bf16.gmra.mrb[24].mxu0 %vm468_vm0, %v4248_v15 }
  0x56   : > { %619 = vmatprep.mubr.bf16.mxu0 %v4107_v0 }
  0x58   : > { %2182 = vrot.lane.b32.xlu1 %v3632_v36, %s4108_s16 }
  0x5d   : > { %3108 = vmatmul.mubr.msk.bf16.gmra.mrb[28].mxu0 %vm468_vm0, %v4260_v16 }
  0x5e   : > { %629 = vmatprep.mubr.bf16.mxu0 %v4107_v0 }
  0x65   : > { %3109 = vmatmul.mubr.msk.bf16.gmra.mrb[32].mxu0 %vm468_vm0, %v4266_v18 }
  0x66   : > { %639 = vmatprep.mubr.bf16.mxu0 %v4107_v0 }
  0x6d   : > { %3110 = vmatmul.mubr.msk.bf16.gmra.mrb[36].mxu0 %vm468_vm0, %v4273_v21 }
  0x6e   : > { %649 = vmatprep.mubr.bf16.mxu0 %v4107_v0 }
  0x75   : > { %3111 = vmatmul.mubr.msk.bf16.gmra.mrb[40].mxu0 %vm468_vm0, %v4279_v23 }
  0x76   : > { %659 = vmatprep.mubr.bf16.mxu0 %v4107_v0 }
  0x7d   : > { %3112 = vmatmul.mubr.msk.bf16.gmra.mrb[44].mxu0 %vm468_vm0, %v4284_v24 }
  0x7e   : > { %1595 = vmatprep.mubr.bf16.mxu0 %v4107_v0 }
  0x92   : > { %v1464_v37 = vpop.permute.xlu0 %1463  ;;  %v1468_v39 = vpop.permute.xlu1 %1467 }
  0x93   : > { %3137 = vmatmul.mubr.msk.bf16.vlgmr.msra.gmra.mrb[48].mxu0 %vm468_vm0, %v1464_v37 }
  0x94   : > { %1605 = vmatprep.mubr.bf16.mxu0 %v4107_v0 }
  0x96   : > { %v1466_v38 = vpop.permute.xlu0 %1465  ;;  %v1470_v40 = vpop.permute.xlu1 %1469 }
  0x9a   : > { %v1472_v41 = vpop.permute.xlu0 %1471  ;;  %v1474_v42 = vpop.permute.xlu1 %1473 }
  0x9b   : > { %3138 = vmatmul.mubr.msk.bf16.gmra.mrb[52].mxu0 %vm468_vm0, %v1466_v38 }
  0x9c   : > { %1615 = vmatprep.mubr.bf16.mxu0 %v4107_v0 }
  0x9e   : > { %v1478_v43 = vpop.permute.xlu1 %1477  ;;  %v1476_v44 = vpop.permute.xlu0 %1475 }
  0xa2   : > { %v1482_v45 = vpop.permute.xlu1 %1481  ;;  %v1480_v51 = vpop.permute.xlu0 %1479 }
  0xa3   : > { %3139 = vmatmul.mubr.msk.bf16.gmra.mrb[56].mxu0 %vm468_vm0, %v1468_v39 }
  0xa4   : > { %1625 = vmatprep.mubr.bf16.mxu0 %v4107_v0 }
  0xa6   : > { %v1486_v46 = vpop.permute.xlu1 %1485  ;;  %v1484_v55 = vpop.permute.xlu0 %1483 }
  0xaa   : > { %v1490_v47 = vpop.permute.xlu1 %1489  ;;  %v1488_v56 = vpop.permute.xlu0 %1487 }
  0xab   : > { %3140 = vmatmul.mubr.msk.bf16.gmra.mrb[60].mxu0 %vm468_vm0, %v1470_v40 }
  0xac   : > { %1635 = vmatprep.mubr.bf16.mxu0 %v4107_v0 }
  0xae   : > { %v4370_v50 = vpop.permute.xlu1 %1493  ;;  %v1492_v6 = vpop.permute.xlu0 %1491 }
  0xb2   : > { %v2189_v54 = vpop.permute.xlu1 %2188 }
  0xb3   : > { %3141 = vmatmul.mubr.msk.bf16.gmra.mrb[64].mxu0 %vm468_vm0, %v1472_v41  ;;  %3359 = vmatprep.subr.bf16.mxu1 %v2189_v54 }
  0xb4   : > { %1645 = vmatprep.mubr.bf16.mxu0 %v4107_v0 }
  0xbb   : > { %3142 = vmatmul.mubr.msk.bf16.gmra.mrb[68].mxu0 %vm468_vm0, %v1474_v42 }
  0xbc   : > { %1655 = vmatprep.mubr.bf16.mxu0 %v4107_v0 }
  0xc3   : > { %3143 = vmatmul.mubr.msk.bf16.gmra.mrb[72].mxu0 %vm468_vm0, %v1476_v44 }
  0xc4   : > { %1665 = vmatprep.mubr.bf16.mxu0 %v4107_v0 }
  0xcb   : > { %3144 = vmatmul.mubr.msk.bf16.gmra.mrb[76].mxu0 %vm468_vm0, %v1478_v43 }
  0xcc   : > { %1675 = vmatprep.mubr.bf16.mxu0 %v4107_v0 }
  0xd3   : > { %3145 = vmatmul.mubr.msk.bf16.gmra.mrb[80].mxu0 %vm468_vm0, %v1480_v51 }
  0xd4   : > { %1685 = vmatprep.mubr.bf16.mxu0 %v4107_v0 }
  0xdb   : > { %3146 = vmatmul.mubr.msk.bf16.gmra.mrb[84].mxu0 %vm468_vm0, %v1482_v45 }
  0xdc   : > { %1695 = vmatprep.mubr.bf16.mxu0 %v4107_v0 }
  0xe3   : > { %3147 = vmatmul.mubr.msk.bf16.gmra.mrb[88].mxu0 %vm468_vm0, %v1484_v55 }
  0xe4   : > { %1705 = vmatprep.mubr.bf16.mxu0 %v4107_v0 }
  0xeb   : > { %3148 = vmatmul.mubr.msk.bf16.gmra.mrb[92].mxu0 %vm468_vm0, %v1486_v46 }
  0xec   : > { %1715 = vmatprep.mubr.bf16.mxu0 %v4107_v0 }
  0xf3   : > { %3149 = vmatmul.mubr.msk.bf16.gmra.mrb[96].mxu0 %vm468_vm0, %v1488_v56 }
  0xf4   : > { %1725 = vmatprep.mubr.bf16.mxu0 %v4107_v0 }
  0xf8   : > { %v4392_v57 = vpop.f32.mrb[0].mxu0  ;;  %v4394_v58 = vpop.f32.mrb[0].mxu1 }
  0xf9   : > { %v4396_v59 = vpop.f32.mrb[1].mxu0  ;;  %v4398_v60 = vpop.f32.mrb[1].mxu1 }
  0xfa   : > { %v4400_v61 = vpop.f32.mrb[2].mxu0  ;;  %v4402_v62 = vpop.f32.mrb[2].mxu1  ;;  %v782_v63 = vmax.f32 %v4394_v58, %v4398_v60  ;;  %v710_v1 = vmax.f32 %v4392_v57, %v4396_v59 }
  0xfb   : > { %v4408_v2 = vpop.f32.mrb[3].mxu0  ;;  %v4410_v3 = vpop.f32.mrb[3].mxu1  ;;  %3150 = vmatmul.mubr.msk.bf16.gmra.mrb[100].mxu0 %vm468_vm0, %v1490_v47 }
  0xfc   : > { %783 = vmax.xlane.f32.xlu1 %v782_v63  ;;  %711 = vmax.xlane.f32.xlu0 %v710_v1  ;;  %v785_v4 = vmax.f32 %v4402_v62, %v4410_v3  ;;  %v713_v5 = vmax.f32 %v4400_v61, %v4408_v2 }
  0xfd   : > { %1735 = vmatprep.mubr.bf16.mxu0 %v4107_v0 }
 0x100   : > { %v4418_v7 = vpop.f32.mrb[4].mxu1  ;;  %786 = vmax.xlane.f32.xlu0 %v785_v4  ;;  %714 = vmax.xlane.f32.xlu1 %v713_v5  ;;  %v4420_v8 = vpop.f32.mrb[4].mxu0 }
 0x101   : > { %v4422_v9 = vpop.f32.mrb[5].mxu0  ;;  %v4424_v10 = vpop.f32.mrb[5].mxu1 }
 0x102   : > { %v4426_v11 = vpop.f32.mrb[6].mxu0  ;;  %v788_v12 = vmax.f32 %v4418_v7, %v4424_v10  ;;  %v716_v13 = vmax.f32 %v4420_v8, %v4422_v9  ;;  %v4432_v14 = vpop.f32.mrb[6].mxu1 }
 0x103   : > { %v4434_v15 = vpop.f32.mrb[7].mxu0  ;;  %v4436_v16 = vpop.f32.mrb[7].mxu1  ;;  %3151 = vmatmul.mubr.msk.bf16.gmra.mrb[104].mxu0 %vm468_vm0, %v1492_v6 }
 0x104   : > { %789 = vmax.xlane.f32.xlu1 %v788_v12  ;;  %717 = vmax.xlane.f32.xlu0 %v716_v13  ;;  %v719_v17 = vmax.f32 %v4426_v11, %v4434_v15  ;;  %v791_v18 = vmax.f32 %v4432_v14, %v4436_v16 }
 0x105   : > { %1745 = vmatprep.mubr.bf16.mxu0 %v4107_v0 }
 0x108   : > { %720 = vmax.xlane.f32.xlu0 %v719_v17  ;;  %v4444_v19 = vpop.f32.mrb[8].mxu0  ;;  %v4446_v20 = vpop.f32.mrb[8].mxu1 }
 0x109   : > { %v4448_v21 = vpop.f32.mrb[9].mxu0  ;;  %v4450_v22 = vpop.f32.mrb[9].mxu1 }
 0x10a   : > { %v4452_v23 = vpop.f32.mrb[10].mxu0  ;;  %v722_v24 = vmax.f32 %v4444_v19, %v4448_v21  ;;  %v4456_v25 = vpop.f32.mrb[10].mxu1  ;;  %v794_v26 = vmax.f32 %v4446_v20, %v4450_v22 }
 0x10b   : > { %v4460_v0 = vpop.f32.mrb[11].mxu0  ;;  %v4462_v27 = vpop.f32.mrb[11].mxu1  ;;  %3152 = vmatmul.mubr.msk.bf16.gmra.mrb[108].mxu0 %vm468_vm0, %v4370_v50 }
 0x10c   : > { %792 = vmax.xlane.f32.xlu0 %v791_v18  ;;  %723 = vmax.xlane.f32.xlu1 %v722_v24  ;;  %v725_v28 = vmax.f32 %v4452_v23, %v4460_v0  ;;  %v797_v29 = vmax.f32 %v4456_v25, %v4462_v27 }
 0x110   : > { %795 = vmax.xlane.f32.xlu1 %v794_v26  ;;  %726 = vmax.xlane.f32.xlu0 %v725_v28  ;;  %v4470_v30 = vpop.f32.mrb[12].mxu0  ;;  %v4472_v31 = vpop.f32.mrb[12].mxu1 }
 0x111   : > { %v4474_v32 = vpop.f32.mrb[13].mxu0  ;;  %v4476_v33 = vpop.f32.mrb[13].mxu1 }
 0x112   : > { %v4478_v34 = vpop.f32.mrb[14].mxu0  ;;  %v728_v35 = vmax.f32 %v4470_v30, %v4474_v32  ;;  %v4482_v36 = vpop.f32.mrb[14].mxu1  ;;  %v800_v37 = vmax.f32 %v4472_v31, %v4476_v33 }
 0x113   : > { %v4486_v38 = vpop.f32.mrb[15].mxu0  ;;  %v4488_v39 = vpop.f32.mrb[15].mxu1 }
 0x114   : > { %798 = vmax.xlane.f32.xlu0 %v797_v29  ;;  %729 = vmax.xlane.f32.xlu1 %v728_v35  ;;  %v731_v40 = vmax.f32 %v4478_v34, %v4486_v38  ;;  %v803_v41 = vmax.f32 %v4482_v36, %v4488_v39 }
 0x118   : > { %801 = vmax.xlane.f32.xlu1 %v800_v37  ;;  %732 = vmax.xlane.f32.xlu0 %v731_v40  ;;  %v4494_v42 = vpop.f32.mrb[16].mxu0 }
 0x119   : > { %v4496_v43 = vpop.f32.mrb[17].mxu0 }
 0x11a   : > { %v4498_v44 = vpop.f32.mrb[18].mxu0  ;;  %v734_v45 = vmax.f32 %v4494_v42, %v4496_v43 }
 0x11b   : > { %6027 = vst [vmem:[#allocation5_spill] sm:$0xff] %v4498_v44  ;;  %v4502_v46 = vpop.f32.mrb[19].mxu0 }
 0x11c   : > { %6028 = vst [vmem:[#allocation6_spill] sm:$0xff] %v4502_v46  ;;  %804 = vmax.xlane.f32.xlu0 %v803_v41  ;;  %735 = vmax.xlane.f32.xlu1 %v734_v45  ;;  %v737_v47 = vmax.f32 %v4498_v44, %v4502_v46 }
 0x120   : > { %738 = vmax.xlane.f32.xlu0 %v737_v47  ;;  %v4506_v50 = vpop.f32.mrb[20].mxu0 }
 0x121   : > { %6029 = vst [vmem:[#allocation7_spill] sm:$0xff] %v4506_v50  ;;  %v4508_v51 = vpop.f32.mrb[21].mxu0 }
 0x122   : > { %6030 = vst [vmem:[#allocation8_spill] sm:$0xff] %v4508_v51  ;;  %v4510_v54 = vpop.f32.mrb[22].mxu0  ;;  %v740_v55 = vmax.f32 %v4506_v50, %v4508_v51 }
 0x123   : > { %6031 = vst [vmem:[#allocation9_spill] sm:$0xff] %v4510_v54  ;;  %v4514_v56 = vpop.f32.mrb[23].mxu0 }
 0x124   : > { %6032 = vst [vmem:[#allocation10_spill] sm:$0xff] %v4514_v56  ;;  %741 = vmax.xlane.f32.xlu1 %v740_v55  ;;  %v743_v63 = vmax.f32 %v4510_v54, %v4514_v56 }
 0x126   : > { %744 = vmax.xlane.f32.xlu0 %v743_v63 }
 0x128   : > { %v4518_v1 = vpop.f32.mrb[24].mxu0 }
 0x129   : > { %6033 = vst [vmem:[#allocation11_spill] sm:$0xff] %v4518_v1  ;;  %v4520_v4 = vpop.f32.mrb[25].mxu0 }
 0x12a   : > { %6034 = vst [vmem:[#allocation12_spill] sm:$0xff] %v4520_v4  ;;  %v4522_v5 = vpop.f32.mrb[26].mxu0  ;;  %v746_v6 = vmax.f32 %v4518_v1, %v4520_v4 }
 0x12b   : > { %6035 = vst [vmem:[#allocation13_spill] sm:$0xff] %v4522_v5  ;;  %v4526_v12 = vpop.f32.mrb[27].mxu0 }
 0x12c   : > { %6036 = vst [vmem:[#allocation14_spill] sm:$0xff] %v4526_v12  ;;  %747 = vmax.xlane.f32.xlu1 %v746_v6  ;;  %v749_v13 = vmax.f32 %v4522_v5, %v4526_v12 }
 0x12e   : > { %750 = vmax.xlane.f32.xlu0 %v749_v13 }
 0x130   : > { %v4530_v17 = vpop.f32.mrb[28].mxu0 }
 0x131   : > { %6037 = vst [vmem:[#allocation15_spill] sm:$0xff] %v4530_v17  ;;  %v4532_v18 = vpop.f32.mrb[29].mxu0 }
 0x132   : > { %6038 = vst [vmem:[#allocation16_spill] sm:$0xff] %v4532_v18  ;;  %v4534_v24 = vpop.f32.mrb[30].mxu0  ;;  %v752_v26 = vmax.f32 %v4530_v17, %v4532_v18 }
 0x133   : > { %6039 = vst [vmem:[#allocation17_spill] sm:$0xff] %v4534_v24  ;;  %v4538_v28 = vpop.f32.mrb[31].mxu0 }
 0x134   : > { %6040 = vst [vmem:[#allocation18_spill] sm:$0xff] %v4538_v28  ;;  %753 = vmax.xlane.f32.xlu1 %v752_v26  ;;  %v755_v29 = vmax.f32 %v4534_v24, %v4538_v28 }
 0x136   : > { %756 = vmax.xlane.f32.xlu0 %v755_v29 }
 0x138   : > { %v4542_v35 = vpop.f32.mrb[32].mxu0 }
 0x139   : > { %6041 = vst [vmem:[#allocation19_spill] sm:$0xff] %v4542_v35  ;;  %v4544_v37 = vpop.f32.mrb[33].mxu0 }
 0x13a   : > { %6042 = vst [vmem:[#allocation20_spill] sm:$0xff] %v4544_v37  ;;  %v4546_v40 = vpop.f32.mrb[34].mxu0  ;;  %v758_v41 = vmax.f32 %v4542_v35, %v4544_v37 }
 0x13b   : > { %6043 = vst [vmem:[#allocation21_spill] sm:$0xff] %v4546_v40  ;;  %v4550_v45 = vpop.f32.mrb[35].mxu0 }
 0x13c   : > { %6044 = vst [vmem:[#allocation22_spill] sm:$0xff] %v4550_v45  ;;  %759 = vmax.xlane.f32.xlu1 %v758_v41  ;;  %v761_v47 = vmax.f32 %v4546_v40, %v4550_v45 }
 0x13e   : > { %762 = vmax.xlane.f32.xlu0 %v761_v47 }
 0x140   : > { %v4554_v55 = vpop.f32.mrb[36].mxu0 }
 0x141   : > { %6045 = vst [vmem:[#allocation23_spill] sm:$0xff] %v4554_v55  ;;  %v4556_v63 = vpop.f32.mrb[37].mxu0 }
 0x142   : > { %6046 = vst [vmem:[#allocation24_spill] sm:$0xff] %v4556_v63  ;;  %v4558_v6 = vpop.f32.mrb[38].mxu0  ;;  %v764_v13 = vmax.f32 %v4554_v55, %v4556_v63 }
 0x143   : > { %6047 = vst [vmem:[#allocation25_spill] sm:$0xff] %v4558_v6  ;;  %v4562_v26 = vpop.f32.mrb[39].mxu0 }
 0x144   : > { %6048 = vst [vmem:[#allocation26_spill] sm:$0xff] %v4562_v26  ;;  %765 = vmax.xlane.f32.xlu1 %v764_v13  ;;  %v767_v29 = vmax.f32 %v4558_v6, %v4562_v26 }
 0x146   : > { %768 = vmax.xlane.f32.xlu0 %v767_v29 }
 0x148   : > { %v4566_v41 = vpop.f32.mrb[40].mxu0 }
 0x149   : > { %6049 = vst [vmem:[#allocation27_spill] sm:$0xff] %v4566_v41  ;;  %v4568_v45 = vpop.f32.mrb[41].mxu0 }
 0x14a   : > { %6050 = vst [vmem:[#allocation28_spill] sm:$0xff] %v4568_v45  ;;  %v4570_v47 = vpop.f32.mrb[42].mxu0  ;;  %v770_v40 = vmax.f32 %v4566_v41, %v4568_v45 }
 0x14b   : > { %6051 = vst [vmem:[#allocation29_spill] sm:$0xff] %v4570_v47  ;;  %v4574_v37 = vpop.f32.mrb[43].mxu0 }
 0x14c   : > { %6052 = vst [vmem:[#allocation30_spill] sm:$0xff] %v4574_v37  ;;  %771 = vmax.xlane.f32.xlu1 %v770_v40  ;;  %v773_v63 = vmax.f32 %v4570_v47, %v4574_v37 }
 0x14e   : > { %774 = vmax.xlane.f32.xlu0 %v773_v63  ;;  %v4594_v63 = vpop.permute.xlu1 %2190 }
 0x150   : > { %v4578_v13 = vpop.f32.mrb[44].mxu0 }
 0x151   : > { %6053 = vst [vmem:[#allocation31_spill] sm:$0xff] %v4578_v13  ;;  %v4580_v26 = vpop.f32.mrb[45].mxu0 }
 0x152   : > { %6054 = vst [vmem:[#allocation32_spill] sm:$0xff] %v4580_v26  ;;  %v4582_v29 = vpop.f32.mrb[46].mxu0  ;;  %v776_v6 = vmax.f32 %v4578_v13, %v4580_v26 }
 0x153   : > { %6055 = vst [vmem:[#allocation33_spill] sm:$0xff] %v4582_v29  ;;  %v4586_v55 = vpop.f32.mrb[47].mxu0 }
 0x154   : > { %6056 = vst [vmem:[#allocation34_spill] sm:$0xff] %v4586_v55  ;;  %777 = vmax.xlane.f32.xlu1 %v776_v6  ;;  %v779_v45 = vmax.f32 %v4582_v29, %v4586_v55 }
 0x156   : > { %780 = vmax.xlane.f32.xlu0 %v779_v45  ;;  %v4606_v45 = vpop.permute.xlu0 %2172 }
 0x15a   : > { %v4622_v35 = vpop.permute.xlu0 %2192 }
 0x15e   : > { %v4632_v24 = vpop.permute.xlu0 %2194 }
 0x15f   : > { %6067 = vst [vmem:[#allocation45_spill] sm:$0xff] %v4632_v24 }
 0x165   : > { %2184 = vrot.lane.b32.xlu1 %v4368_v49, %s4108_s16  ;;  %v4610_v49 = vpop.permute.xlu1 %2174 }
 0x166   : > { %v4592_v40 = vpop.f32.mrb[48].mxu0 }
 0x167   : > { %6057 = vst [vmem:[#allocation35_spill] sm:$0xff] %v4592_v40  ;;  %v4596_v37 = vpop.f32.mrb[49].mxu0 }
 0x168   : > { %6058 = vst [vmem:[#allocation36_spill] sm:$0xff] %v4596_v37  ;;  %v4598_v47 = vpop.f32.mrb[50].mxu0  ;;  %v1756_v26 = vmax.f32 %v4592_v40, %v4596_v37 }
 0x169   : > { %6059 = vst [vmem:[#allocation37_spill] sm:$0xff] %v4598_v47  ;;  %v4602_v13 = vpop.f32.mrb[51].mxu0 }
 0x16a   : > { %6060 = vst [vmem:[#allocation38_spill] sm:$0xff] %v4602_v13  ;;  %v1759_v6 = vmax.f32 %v4598_v47, %v4602_v13  ;;  %v4626_v47 = vpop.permute.xlu1 %2176 }
 0x16c   : > { %2200 = vrot.lane.b32.xlu0 %v4365_v48, %s4108_s16 }
 0x16e   : > { %v4612_v55 = vpop.f32.mrb[52].mxu0 }
 0x16f   : > { %6061 = vst [vmem:[#allocation39_spill] sm:$0xff] %v4612_v55  ;;  %v4614_v29 = vpop.f32.mrb[53].mxu0 }
 0x170   : > { %6062 = vst [vmem:[#allocation40_spill] sm:$0xff] %v4614_v29  ;;  %v4616_v41 = vpop.f32.mrb[54].mxu0  ;;  %v1762_v37 = vmax.f32 %v4612_v55, %v4614_v29  ;;  %v4638_v55 = vpop.permute.xlu1 %2178 }
 0x171   : > { %6063 = vst [vmem:[#allocation41_spill] sm:$0xff] %v4616_v41  ;;  %v4620_v40 = vpop.f32.mrb[55].mxu0  ;;  %6069 = vst [vmem:[#allocation47_spill] sm:$0xff] %v4638_v55 }
 0x172   : > { %6064 = vst [vmem:[#allocation42_spill] sm:$0xff] %v4620_v40  ;;  %v1765_v13 = vmax.f32 %v4616_v41, %v4620_v40  ;;  %v4644_v41 = vpop.permute.xlu0 %2196 }
 0x173   : > { %6071 = vst [vmem:[#allocation49_spill] sm:$0xff] %v4644_v41 }
 0x174   : > { %v4648_v5 = vpop.permute.xlu1 %2180 }
 0x175   : > { %6073 = vst [vmem:[#allocation51_spill] sm:$0xff] %v4648_v5 }
 0x176   : > { %v4628_v48 = vpop.f32.mrb[56].mxu0  ;;  %v4660_v54 = vpop.permute.xlu0 %2198 }
 0x177   : > { %6065 = vst [vmem:[#allocation43_spill] sm:$0xff] %v4628_v48  ;;  %v4630_v28 = vpop.f32.mrb[57].mxu0  ;;  %6077 = vst [vmem:[#allocation55_spill] sm:$0xff] %v4660_v54 }
 0x178   : > { %6066 = vst [vmem:[#allocation44_spill] sm:$0xff] %v4630_v28  ;;  %v4634_v18 = vpop.f32.mrb[58].mxu0  ;;  %v1768_v29 = vmax.f32 %v4628_v48, %v4630_v28 }
 0x179   : > { %6068 = vst [vmem:[#allocation46_spill] sm:$0xff] %v4634_v18  ;;  %v4640_v17 = vpop.f32.mrb[59].mxu0 }
 0x17a   : > { %6070 = vst [vmem:[#allocation48_spill] sm:$0xff] %v4640_v17  ;;  %v1771_v40 = vmax.f32 %v4634_v18, %v4640_v17  ;;  %v4662_v17 = vpop.permute.xlu1 %2182 }
 0x17b   : > { %6078 = vst [vmem:[#allocation56_spill] sm:$0xff] %v4662_v17 }
 0x17e   : > { %v4646_v12 = vpop.f32.mrb[60].mxu0 }
 0x17f   : > { %6072 = vst [vmem:[#allocation50_spill] sm:$0xff] %v4646_v12  ;;  %v4650_v4 = vpop.f32.mrb[61].mxu0 }
 0x180   : > { %6074 = vst [vmem:[#allocation52_spill] sm:$0xff] %v4650_v4  ;;  %v4652_v1 = vpop.f32.mrb[62].mxu0 }
 0x181   : > { %6075 = vst [vmem:[#allocation53_spill] sm:$0xff] %v4652_v1  ;;  %v4656_v48 = vpop.f32.mrb[63].mxu0 }
 0x182   : > { %6076 = vst [vmem:[#allocation54_spill] sm:$0xff] %v4656_v48  ;;  %v1777_v56 = vmax.f32 %v4652_v1, %v4656_v48 }
 0x186   : > { %v4664_v18 = vpop.f32.mrb[64].mxu0 }
 0x187   : > { %6079 = vst [vmem:[#allocation57_spill] sm:$0xff] %v4664_v18  ;;  %v4666_v51 = vpop.f32.mrb[65].mxu0 }
 0x188   : > { %6080 = vst [vmem:[#allocation58_spill] sm:$0xff] %v4666_v51  ;;  %v4668_v5 = vpop.f32.mrb[66].mxu0 }
 0x189   : > { %6081 = vst [vmem:[#allocation59_spill] sm:$0xff] %v4668_v5  ;;  %v784_v41 = vpop.xlane.xlu1 %783  ;;  %v712_v28 = vpop.xlane.xlu0 %711  ;;  %1757 = vmax.xlane.f32.xlu1 %v1756_v26 }
 0x18a   : > { %v854_v55 = vsub.f32 %v4394_v58, %v784_v41  ;;  %v855_v48 = vsub.f32 %v4398_v60, %v784_v41  ;;  %v806_v1 = vsub.f32 %v4392_v57, %v712_v28  ;;  %v807_v17 = vsub.f32 %v4396_v59, %v712_v28  ;;  %v4676_v54 = vpop.f32.mrb[67].mxu0 }
 0x18b   : > { %6082 = vst [vmem:[#allocation60_spill] sm:$0xff] %v4676_v54  ;;  %1760 = vmax.xlane.f32.xlu0 %v1759_v6 }
 0x18c   : > { %v966_v44 = vmul.f32 1.442695, %v854_v55  ;;  %v968_v24 = vmul.f32 1.442695, %v855_v48  ;;  %v870_v50 = vmul.f32 1.442695, %v806_v1 }
 0x18d   : > { %v872_v51 = vmul.f32 1.442695, %v807_v17  ;;  %v787_v18 = vpop.xlane.xlu0 %786  ;;  %v715_v26 = vpop.xlane.xlu1 %714  ;;  %1766 = vmax.xlane.f32.xlu1 %v1765_v13 }
 0x18e   : > { %3643 = vpow2.f32 %v966_v44  ;;  %v856_v58 = vsub.f32 %v4402_v62, %v787_v18  ;;  %v857_v57 = vsub.f32 %v4410_v3, %v787_v18  ;;  %v808_v59 = vsub.f32 %v4400_v61, %v715_v26  ;;  %v4683_v60 = vpop.f32.mrb[68].mxu0 }
 0x18f   : > { %6083 = vst [vmem:[#allocation61_spill] sm:$0xff] %v4683_v60  ;;  %3645 = vpow2.f32 %v968_v24  ;;  %v809_v28 = vsub.f32 %v4408_v2, %v715_v26  ;;  %1763 = vmax.xlane.f32.xlu0 %v1762_v37  ;;  %v4686_v55 = vpop.f32.mrb[69].mxu0 }
 0x190   : > { %6084 = vst [vmem:[#allocation62_spill] sm:$0xff] %v4686_v55  ;;  %3647 = vpow2.f32 %v870_v50  ;;  %v970_v1 = vmul.f32 1.442695, %v856_v58  ;;  %v972_v17 = vmul.f32 1.442695, %v857_v57  ;;  %v4692_v18 = vpop.f32.mrb[70].mxu0 }
 0x191   : > { %v874_v41 = vmul.f32 1.442695, %v808_v59  ;;  %3649 = vpow2.f32 %v872_v51  ;;  %v876_v44 = vmul.f32 1.442695, %v809_v28  ;;  %v790_v13 = vpop.xlane.xlu1 %789  ;;  %v718_v62 = vpop.xlane.xlu0 %717  ;;  %1772 = vmax.xlane.f32.xlu1 %v1771_v40 }
 0x192   : > { %3651 = vpow2.f32 %v970_v1  ;;  %v858_v3 = vsub.f32 %v4418_v7, %v790_v13  ;;  %v810_v2 = vsub.f32 %v4420_v8, %v718_v62  ;;  %v811_v50 = vsub.f32 %v4422_v9, %v718_v62  ;;  %v4695_v24 = vpop.f32.mrb[71].mxu0 }
 0x193   : > { %3653 = vpow2.f32 %v972_v17  ;;  %1769 = vmax.xlane.f32.xlu0 %v1768_v29  ;;  %6085 = vst [vmem:[#allocation63_spill] sm:$0xff] %v4695_v24  ;;  %v859_v40 = vsub.f32 %v4424_v10, %v790_v13  ;;  %v6087_v29 = vmax.f32 %v4646_v12, %v4650_v4  ;;  %v6134_v4 = vld [vmem:[#allocation12_spill] sm:$0xff] }
 0x194   : > { %3655 = vpow2.f32 %v874_v41  ;;  %v974_v51 = vmul.f32 1.442695, %v858_v3  ;;  %v878_v37 = vmul.f32 1.442695, %v810_v2  ;;  %v880_v6 = vmul.f32 1.442695, %v811_v50 }
 0x195   : > { %3657 = vpow2.f32 %v876_v44  ;;  %v721_v48 = vpop.xlane.xlu0 %720  ;;  %1778 = vmax.xlane.f32.xlu1 %v1777_v56  ;;  %v976_v28 = vmul.f32 1.442695, %v859_v40 }
 0x196   : > { %v812_v8 = vsub.f32 %v4426_v11, %v721_v48  ;;  %v813_v26 = vsub.f32 %v4434_v15, %v721_v48  ;;  %v4702_v9 = vpop.f32.mrb[72].mxu0  ;;  %3659 = vpow2.f32 %v974_v51 }
 0x197   : > { %6086 = vst [vmem:[#allocation64_spill] sm:$0xff] %v4702_v9  ;;  %1775 = vmax.xlane.f32.xlu0 %v6087_v29  ;;  %v4707_v58 = vpop.f32.mrb[73].mxu0  ;;  %3661 = vpow2.f32 %v878_v37 }
 0x198   : > { %6088 = vst [vmem:[#allocation65_spill] sm:$0xff] %v4707_v58  ;;  %v4709_v10 = vpop.eup %3643  ;;  %v882_v56 = vmul.f32 1.442695, %v812_v8  ;;  %v884_v57 = vmul.f32 1.442695, %v813_v26  ;;  %v4711_v59 = vpop.f32.mrb[74].mxu0  ;;  %3663 = vpow2.f32 %v880_v6 }
 0x199   : > { %6089 = vst [vmem:[#allocation66_spill] sm:$0xff] %v4711_v59  ;;  %v4715_v15 = vpop.eup %3645  ;;  %v793_v1 = vpop.xlane.xlu0 %792 }
 0x19a   : > { %v724_v17 = vpop.xlane.xlu1 %723  ;;  %v3648_v41 = vpop.eup %3647  ;;  %3665 = vpow2.f32 %v882_v56  ;;  %v860_v44 = vsub.f32 %v4432_v14, %v793_v1  ;;  %v861_v13 = vsub.f32 %v4436_v16, %v793_v1  ;;  %v4727_v37 = vadd.f32 %v4715_v15, %v4709_v10 }
 0x19b   : > { %v814_v62 = vsub.f32 %v4444_v19, %v724_v17  ;;  %v4720_v3 = vpop.f32.mrb[75].mxu0  ;;  %v3650_v2 = vpop.eup %3649  ;;  %3667 = vpow2.f32 %v884_v57  ;;  %v815_v50 = vsub.f32 %v4448_v21, %v724_v17 }
 0x19c   : > { %6090 = vst [vmem:[#allocation67_spill] sm:$0xff] %v4720_v3  ;;  %6091 = vst [vmem:[#allocation68_spill] sm:$0xff] %v4727_v37  ;;  %v4729_v40 = vpop.eup %3651  ;;  %v978_v14 = vmul.f32 1.442695, %v860_v44  ;;  %v980_v6 = vmul.f32 1.442695, %v861_v13  ;;  %v4731_v48 = vadd.f32 %v3650_v2, %v3648_v41  ;;  %3669 = vpow2.f32 %v976_v28 }
 0x19d   : > { %v886_v16 = vmul.f32 1.442695, %v814_v62  ;;  %v4733_v19 = vpop.eup %3653  ;;  %v888_v8 = vmul.f32 1.442695, %v815_v50  ;;  %v727_v21 = vpop.xlane.xlu0 %726 }
 0x19e   : > { %v796_v26 = vpop.xlane.xlu1 %795  ;;  %v3656_v56 = vpop.eup %3655  ;;  %3671 = vpow2.f32 %v978_v14  ;;  %v816_v17 = vsub.f32 %v4452_v23, %v727_v21  ;;  %v817_v28 = vsub.f32 %v4460_v0, %v727_v21  ;;  %v6118_v0 = vld [vmem:[#allocation8_spill] sm:$0xff] }
 0x19f   : > { %v862_v57 = vsub.f32 %v4446_v20, %v796_v26  ;;  %v863_v1 = vsub.f32 %v4450_v22, %v796_v26  ;;  %v4740_v44 = vpop.f32.mrb[76].mxu0  ;;  %v3658_v13 = vpop.eup %3657  ;;  %3673 = vpow2.f32 %v980_v6  ;;  %v1094_v62 = vpack.c.bf16 %v3656_v56, %v3648_v41 }
 0x1a0   : > { %v4743_v50 = vpop.f32.mrb[77].mxu0  ;;  %3675 = vpow2.f32 %v886_v16  ;;  %v890_v20 = vmul.f32 1.442695, %v816_v17  ;;  %v4747_v7 = vpop.eup %3659  ;;  %v892_v22 = vmul.f32 1.442695, %v817_v28  ;;  %v1095_v23 = vpack.c.bf16 %v3658_v13, %v3650_v2 }
 0x1a1   : > { %6092 = vst [vmem:[#allocation69_spill] sm:$0xff] %v4743_v50  ;;  %v982_v14 = vmul.f32 1.442695, %v862_v57  ;;  %v984_v51 = vmul.f32 1.442695, %v863_v1  ;;  %6093 = vst [vmem:[#allocation70_spill] sm:$0xff] %v4747_v7  ;;  %3677 = vpow2.f32 %v888_v8  ;;  %v799_v26 = vpop.xlane.xlu0 %798  ;;  %v4751_v41 = vpop.eup %3661  ;;  %v4761_v17 = vadd.f32 %v3658_v13, %v3656_v56 }
 0x1a2   : > { %v730_v61 = vpop.xlane.xlu1 %729  ;;  %v864_v6 = vsub.f32 %v4456_v25, %v799_v26  ;;  %v865_v16 = vsub.f32 %v4462_v27, %v799_v26  ;;  %v4756_v57 = vpop.f32.mrb[78].mxu0  ;;  %1254 = vmatprep.mubr.bf16.mxu1 %v1095_v23  ;;  %v4765_v28 = vadd.f32 %v4733_v19, %v4729_v40 }
 0x1a3   : > { %3679 = vpow2.f32 %v982_v14  ;;  %v818_v21 = vsub.f32 %v4470_v30, %v730_v61  ;;  %v3664_v1 = vpop.eup %3663  ;;  %v819_v2 = vsub.f32 %v4474_v32, %v730_v61  ;;  %v4759_v8 = vpop.f32.mrb[79].mxu0  ;;  %1255 = vmatmul.mubr.bf16.vlgmr.msra.gmra.mrb[16].mxu1 %v1094_v62 }
 0x1a4   : > { %3681 = vpow2.f32 %v984_v51  ;;  %6094 = vst [vmem:[#allocation71_spill] sm:$0xff] %v4765_v28  ;;  %v3666_v25 = vpop.eup %3665  ;;  %v986_v27 = vmul.f32 1.442695, %v864_v6  ;;  %v988_v30 = vmul.f32 1.442695, %v865_v16  ;;  %3360 = vmatpush3.bf16.msra.mxu1 %v4606_v45 }
 0x1a5   : > { %3683 = vpow2.f32 %v890_v20  ;;  %v894_v14 = vmul.f32 1.442695, %v818_v21  ;;  %v3668_v26 = vpop.eup %3667  ;;  %v896_v51 = vmul.f32 1.442695, %v819_v2  ;;  %v733_v61 = vpop.xlane.xlu0 %732  ;;  %v1096_v56 = vpack.c.bf16 %v3666_v25, %v4751_v41  ;;  %3361 = vmatprep.subr.bf16.mxu1 %v4594_v63 }
 0x1a6   : > { %3685 = vpow2.f32 %v892_v22  ;;  %v802_v32 = vpop.xlane.xlu1 %801  ;;  %v820_v23 = vsub.f32 %v4478_v34, %v733_v61  ;;  %2186 = vrot.lane.b32.xlu1 %v4378_v53, %s4108_s16  ;;  %v4777_v45 = vpop.f32.mrb[80].mxu0  ;;  %v821_v6 = vsub.f32 %v4486_v38, %v733_v61  ;;  %v1097_v16 = vpack.c.bf16 %v3668_v26, %v3664_v1 }
 0x1a7   : > { %3687 = vpow2.f32 %v986_v27  ;;  %v866_v62 = vsub.f32 %v4472_v31, %v802_v32  ;;  %v867_v20 = vsub.f32 %v4476_v33, %v802_v32  ;;  %6095 = vst [vmem:[#allocation72_spill] sm:$0xff] %v4777_v45  ;;  %v4779_v22 = vpop.eup %3669  ;;  %v4782_v21 = vpop.f32.mrb[81].mxu0  ;;  %v4785_v63 = vadd.f32 %v3664_v1, %v4751_v41 }
 0x1a8   : > { %6096 = vst [vmem:[#allocation73_spill] sm:$0xff] %v4779_v22  ;;  %3689 = vpow2.f32 %v988_v30  ;;  %6097 = vst [vmem:[#allocation74_spill] sm:$0xff] %v4782_v21  ;;  %v4787_v31 = vpop.eup %3671  ;;  %v898_v2 = vmul.f32 1.442695, %v820_v23  ;;  %3362 = vmatpush3.bf16.msra.mxu1 %v4610_v49  ;;  %v900_v27 = vmul.f32 1.442695, %v821_v6  ;;  %1262 = vmatprep.mubr.bf16.mxu1 %v1097_v16  ;;  %v4794_v41 = vadd.f32 %v3668_v26, %v3666_v25 }
 0x1a9   : > { %6098 = vst [vmem:[#allocation75_spill] sm:$0xff] %v4787_v31  ;;  %3691 = vpow2.f32 %v894_v14  ;;  %v990_v33 = vmul.f32 1.442695, %v866_v62  ;;  %v992_v34 = vmul.f32 1.442695, %v867_v20  ;;  %v4789_v53 = vpop.eup %3673  ;;  %v805_v38 = vpop.xlane.xlu0 %804  ;;  %3363 = vmatprep.subr.bf16.mxu1 %v4622_v35 }
 0x1aa   : > { %6099 = vst [vmem:[#allocation76_spill] sm:$0xff] %v4789_v53  ;;  %3693 = vpow2.f32 %v896_v51  ;;  %v736_v30 = vpop.xlane.xlu1 %735  ;;  %6100 = vst [vmem:[#allocation77_spill] sm:$0xff] %v4794_v41  ;;  %v4796_v1 = vpop.eup %3675  ;;  %v868_v14 = vsub.f32 %v4482_v36, %v805_v38  ;;  %v869_v51 = vsub.f32 %v4488_v39, %v805_v38  ;;  %v6106_v38 = vld [vmem:[#allocation5_spill] sm:$0xff] }
 0x1ab   : > { %3695 = vpow2.f32 %v990_v33  ;;  %v822_v49 = vsub.f32 %v4494_v42, %v736_v30  ;;  %v4802_v61 = vpop.f32.mrb[82].mxu0  ;;  %v3678_v62 = vpop.eup %3677  ;;  %v823_v20 = vsub.f32 %v4496_v43, %v736_v30  ;;  %1263 = vmatmul.mubr.bf16.gmra.mrb[20].mxu1 %v1096_v56 }
 0x1ac   : > { %6101 = vst [vmem:[#allocation78_spill] sm:$0xff] %v4802_v61  ;;  %3697 = vpow2.f32 %v992_v34  ;;  %v4805_v23 = vpop.f32.mrb[83].mxu0  ;;  %v994_v36 = vmul.f32 1.442695, %v868_v14  ;;  %v996_v39 = vmul.f32 1.442695, %v869_v51  ;;  %3364 = vmatpush3.bf16.msra.mxu1 %v4626_v47  ;;  %v4821_v34 = vadd.f32 %v3678_v62, %v4796_v1 }
 0x1ad   : > { %6102 = vst [vmem:[#allocation79_spill] sm:$0xff] %v4805_v23  ;;  %v4811_v26 = vpop.eup %3679  ;;  %3699 = vpow2.f32 %v898_v2  ;;  %v902_v42 = vmul.f32 1.442695, %v822_v49  ;;  %v904_v43 = vmul.f32 1.442695, %v823_v20  ;;  %v739_v16 = vpop.xlane.xlu0 %738  ;;  %2202 = vrot.lane.b32.xlu0 %v4375_v52, %s4108_s16  ;;  %v6105_v2 = vld [vmem:[#allocation45_spill] sm:$0xff]  ;;  %v4830_v51 = vadd.f32 %v4779_v22, %v4747_v7 }
 0x1ae   : > { %6103 = vst [vmem:[#allocation80_spill] sm:$0xff] %v4811_v26  ;;  %v4813_v6 = vpop.eup %3681  ;;  %3701 = vpow2.f32 %v900_v27  ;;  %3365 = vmatprep.subr.bf16.mxu1 %v6105_v2  ;;  %v824_v30 = vsub.f32 %v6106_v38, %v739_v16  ;;  %v6107_v27 = vmov %v4502_v46  ;;  %v4826_v47 = vpop.f32.mrb[84].mxu0  ;;  %v4837_v2 = vadd.f32 %v4789_v53, %v4787_v31  ;;  %v6144_v7 = vld [vmem:[#allocation18_spill] sm:$0xff] }
 0x1af   : > { %6104 = vst [vmem:[#allocation81_spill] sm:$0xff] %v4813_v6  ;;  %v3684_v56 = vpop.eup %3683  ;;  %3703 = vpow2.f32 %v994_v36  ;;  %v825_v14 = vsub.f32 %v6107_v27, %v739_v16  ;;  %6108 = vst [vmem:[#allocation45_spill] sm:$0xff] %v4830_v51  ;;  %v4833_v20 = vpop.f32.mrb[85].mxu0  ;;  %v4841_v36 = vadd.f32 %v4813_v6, %v4811_v26 }
 0x1b0   : > { %v3686_v52 = vpop.eup %3685  ;;  %3705 = vpow2.f32 %v996_v39  ;;  %v1098_v49 = vpack.c.bf16 %v3684_v56, %v4796_v1  ;;  %6109 = vst [vmem:[#allocation5_spill] sm:$0xff] %v4833_v20  ;;  %6110 = vst [vmem:[#allocation6_spill] sm:$0xff] %v4837_v2  ;;  %v906_v38 = vmul.f32 1.442695, %v824_v30  ;;  %v4845_v25 = vpop.f32.mrb[86].mxu0  ;;  %v6114_v1 = vld [vmem:[#allocation47_spill] sm:$0xff] }
 0x1b1   : > { %6111 = vst [vmem:[#allocation82_spill] sm:$0xff] %v4841_v36  ;;  %v4843_v16 = vpop.eup %3687  ;;  %3707 = vpow2.f32 %v902_v42  ;;  %v908_v27 = vmul.f32 1.442695, %v825_v14  ;;  %v1099_v35 = vpack.c.bf16 %v3686_v52, %v3678_v62  ;;  %3366 = vmatpush3.bf16.msra.mxu1 %v6114_v1  ;;  %v742_v29 = vpop.xlane.xlu1 %741  ;;  %v4854_v32 = vadd.f32 %v3686_v52, %v3684_v56  ;;  %v6116_v62 = vld [vmem:[#allocation49_spill] sm:$0xff]  ;;  %v6117_v14 = vld [vmem:[#allocation7_spill] sm:$0xff] }
 0x1b2   : > { %6112 = vst [vmem:[#allocation83_spill] sm:$0xff] %v4843_v16  ;;  %v4847_v39 = vpop.eup %3689  ;;  %3709 = vpow2.f32 %v904_v43  ;;  %v4850_v33 = vpop.f32.mrb[87].mxu0  ;;  %3367 = vmatprep.subr.bf16.mxu1 %v6116_v62  ;;  %v826_v43 = vsub.f32 %v6117_v14, %v742_v29  ;;  %v827_v1 = vsub.f32 %v6118_v0, %v742_v29  ;;  %v6121_v14 = vld [vmem:[#allocation9_spill] sm:$0xff]  ;;  %v6122_v0 = vld [vmem:[#allocation10_spill] sm:$0xff]  ;;  %v6125_v2 = vld [vmem:[#allocation55_spill] sm:$0xff] }
 0x1b3   : > { %6113 = vst [vmem:[#allocation84_spill] sm:$0xff] %v4847_v39  ;;  %6115 = vst [vmem:[#allocation47_spill] sm:$0xff] %v4854_v32  ;;  %v3692_v30 = vpop.eup %3691  ;;  %3711 = vpow2.f32 %v906_v38  ;;  %1270 = vmatprep.mubr.bf16.mxu1 %v1099_v35  ;;  %v745_v13 = vpop.xlane.xlu0 %744  ;;  %v4867_v52 = vadd.f32 %v4847_v39, %v4843_v16  ;;  %v6137_v16 = vld [vmem:[#allocation14_spill] sm:$0xff] }
 0x1b4   : > { %v3694_v46 = vpop.eup %3693  ;;  %3713 = vpow2.f32 %v908_v27  ;;  %1271 = vmatmul.mubr.bf16.gmra.mrb[24].mxu1 %v1098_v49  ;;  %v910_v35 = vmul.f32 1.442695, %v826_v43  ;;  %v912_v38 = vmul.f32 1.442695, %v827_v1  ;;  %v828_v29 = vsub.f32 %v6121_v14, %v745_v13  ;;  %v6124_v27 = vld [vmem:[#allocation51_spill] sm:$0xff] }
 0x1b5   : > { %6119 = vst [vmem:[#allocation49_spill] sm:$0xff] %v4867_v52  ;;  %v4869_v62 = vpop.eup %3695  ;;  %v829_v42 = vsub.f32 %v6122_v0, %v745_v13  ;;  %3368 = vmatpush3.bf16.msra.mxu1 %v6124_v27  ;;  %v4876_v36 = vadd.f32 %v3694_v46, %v3692_v30 }
 0x1b6   : > { %6120 = vst [vmem:[#allocation7_spill] sm:$0xff] %v4869_v62  ;;  %v4873_v11 = vpop.eup %3697  ;;  %3369 = vmatprep.subr.bf16.mxu1 %v6125_v2  ;;  %3715 = vpow2.f32 %v910_v35  ;;  %v914_v52 = vmul.f32 1.442695, %v828_v29  ;;  %v4879_v28 = vpop.f32.mrb[88].mxu0  ;;  %v6132_v29 = vld [vmem:[#allocation56_spill] sm:$0xff] }
 0x1b7   : > { %6123 = vst [vmem:[#allocation8_spill] sm:$0xff] %v4873_v11  ;;  %v3700_v56 = vpop.eup %3699  ;;  %v916_v51 = vmul.f32 1.442695, %v829_v42  ;;  %6126 = vst [vmem:[#allocation9_spill] sm:$0xff] %v4879_v28  ;;  %v4883_v49 = vadd.f32 %v4873_v11, %v4869_v62  ;;  %3717 = vpow2.f32 %v912_v38  ;;  %v4885_v1 = vpop.f32.mrb[89].mxu0  ;;  %v6136_v62 = vld [vmem:[#allocation13_spill] sm:$0xff] }
 0x1b8   : > { %v3702_v43 = vpop.eup %3701  ;;  %v1100_v13 = vpack.c.bf16 %v3700_v56, %v3692_v30  ;;  %6128 = vst [vmem:[#allocation51_spill] sm:$0xff] %v4885_v1  ;;  %3719 = vpow2.f32 %v914_v52  ;;  %v4889_v27 = vpop.f32.mrb[90].mxu0 }
 0x1b9   : > { %6127 = vst [vmem:[#allocation10_spill] sm:$0xff] %v4883_v49  ;;  %v4887_v14 = vpop.eup %3703  ;;  %v1101_v0 = vpack.c.bf16 %v3702_v43, %v3694_v46  ;;  %v4893_v42 = vadd.f32 %v3702_v43, %v3700_v56  ;;  %3721 = vpow2.f32 %v916_v51  ;;  %3370 = vmatpush3.bf16.msra.mxu1 %v6132_v29  ;;  %v748_v38 = vpop.xlane.xlu1 %747  ;;  %v6133_v46 = vld [vmem:[#allocation11_spill] sm:$0xff] }
 0x1ba   : > { %6129 = vst [vmem:[#allocation55_spill] sm:$0xff] %v4887_v14  ;;  %v4895_v35 = vpop.eup %3705  ;;  %v4898_v30 = vpop.f32.mrb[91].mxu0  ;;  %v830_v37 = vsub.f32 %v6133_v46, %v748_v38  ;;  %v831_v12 = vsub.f32 %v6134_v4, %v748_v38 }
 0x1bb   : > { %6130 = vst [vmem:[#allocation85_spill] sm:$0xff] %v4893_v42  ;;  %6131 = vst [vmem:[#allocation86_spill] sm:$0xff] %v4895_v35  ;;  %v3708_v52 = vpop.eup %3707  ;;  %1278 = vmatprep.mubr.bf16.mxu1 %v1101_v0  ;;  %v751_v29 = vpop.xlane.xlu0 %750  ;;  %v4910_v2 = vadd.f32 %v4895_v35, %v4887_v14 }
 0x1bc   : > { %v3710_v43 = vpop.eup %3709  ;;  %1279 = vmatmul.mubr.bf16.gmra.mrb[28].mxu1 %v1100_v13  ;;  %v918_v49 = vmul.f32 1.442695, %v830_v37  ;;  %v920_v0 = vmul.f32 1.442695, %v831_v12  ;;  %v832_v46 = vsub.f32 %v6136_v62, %v751_v29  ;;  %v833_v4 = vsub.f32 %v6137_v16, %v751_v29  ;;  %v6140_v29 = vld [vmem:[#allocation15_spill] sm:$0xff] }
 0x1bd   : > { %6135 = vst [vmem:[#allocation56_spill] sm:$0xff] %v4910_v2  ;;  %v3712_v26 = vpop.eup %3711  ;;  %v4914_v56 = vadd.f32 %v3710_v43, %v3708_v52 }
 0x1be   : > { %v3714_v38 = vpop.eup %3713  ;;  %v1102_v6 = vpack.c.bf16 %v3712_v26, %v3708_v52  ;;  %3723 = vpow2.f32 %v918_v49  ;;  %v922_v51 = vmul.f32 1.442695, %v832_v46  ;;  %v924_v11 = vmul.f32 1.442695, %v833_v4  ;;  %v4916_v42 = vpop.f32.mrb[92].mxu0  ;;  %v6141_v46 = vld [vmem:[#allocation16_spill] sm:$0xff] }
 0x1bf   : > { %6138 = vst [vmem:[#allocation11_spill] sm:$0xff] %v4914_v56  ;;  %v1103_v39 = vpack.c.bf16 %v3714_v38, %v3710_v43  ;;  %3725 = vpow2.f32 %v920_v0  ;;  %v4918_v2 = vpop.f32.mrb[93].mxu0  ;;  %v4920_v13 = vadd.f32 %v3714_v38, %v3712_v26 }
 0x1c0   : > { %v3716_v12 = vpop.eup %3715  ;;  %3727 = vpow2.f32 %v922_v51  ;;  %v4922_v37 = vpop.f32.mrb[94].mxu0 }
 0x1c1   : > { %6139 = vst [vmem:[#allocation12_spill] sm:$0xff] %v4920_v13  ;;  %1286 = vmatprep.mubr.bf16.mxu1 %v1103_v39  ;;  %v3718_v62 = vpop.eup %3717  ;;  %3729 = vpow2.f32 %v924_v11  ;;  %v754_v49 = vpop.xlane.xlu1 %753  ;;  %v6143_v11 = vld [vmem:[#allocation17_spill] sm:$0xff] }
 0x1c2   : > { %v4926_v52 = vpop.f32.mrb[95].mxu0  ;;  %v3720_v43 = vpop.eup %3719  ;;  %v834_v0 = vsub.f32 %v6140_v29, %v754_v49  ;;  %v835_v4 = vsub.f32 %v6141_v46, %v754_v49  ;;  %v4932_v51 = vadd.f32 %v3718_v62, %v3716_v12 }
 0x1c3   : > { %v3722_v39 = vpop.eup %3721  ;;  %v757_v38 = vpop.xlane.xlu0 %756  ;;  %v1104_v14 = vpack.c.bf16 %v3720_v43, %v3716_v12 }
 0x1c4   : > { %6142 = vst [vmem:[#allocation13_spill] sm:$0xff] %v4932_v51  ;;  %1287 = vmatmul.mubr.bf16.gmra.mrb[32].mxu1 %v1102_v6  ;;  %v926_v16 = vmul.f32 1.442695, %v834_v0  ;;  %v928_v35 = vmul.f32 1.442695, %v835_v4  ;;  %v836_v13 = vsub.f32 %v6143_v11, %v757_v38  ;;  %v837_v31 = vsub.f32 %v6144_v7, %v757_v38  ;;  %v6147_v4 = vld [vmem:[#allocation20_spill] sm:$0xff] }
 0x1c5   : > { %v1105_v32 = vpack.c.bf16 %v3722_v39, %v3718_v62  ;;  %v4936_v56 = vadd.f32 %v3722_v39, %v3720_v43  ;;  %v6149_v51 = vld [vmem:[#allocation21_spill] sm:$0xff] }
 0x1c6   : > { %3731 = vpow2.f32 %v926_v16  ;;  %v930_v49 = vmul.f32 1.442695, %v836_v13  ;;  %v932_v29 = vmul.f32 1.442695, %v837_v31  ;;  %v4938_v46 = vpop.f32.mrb[96].mxu0  ;;  %v6146_v31 = vld [vmem:[#allocation19_spill] sm:$0xff] }
 0x1c7   : > { %6145 = vst [vmem:[#allocation14_spill] sm:$0xff] %v4936_v56  ;;  %3733 = vpow2.f32 %v928_v35  ;;  %1294 = vmatprep.mubr.bf16.mxu1 %v1105_v32  ;;  %v4940_v26 = vpop.f32.mrb[97].mxu0  ;;  %v6148_v32 = vmax.f32 %v4668_v5, %v4676_v54 }
 0x1c8   : > { %v3724_v12 = vpop.eup %3723  ;;  %3735 = vpow2.f32 %v930_v49  ;;  %v4942_v6 = vpop.f32.mrb[98].mxu0 }
 0x1c9   : > { %v3726_v7 = vpop.eup %3725  ;;  %3737 = vpow2.f32 %v932_v29  ;;  %v760_v62 = vpop.xlane.xlu1 %759 }
 0x1ca   : > { %v4946_v43 = vpop.f32.mrb[99].mxu0  ;;  %v3728_v13 = vpop.eup %3727  ;;  %v838_v16 = vsub.f32 %v6146_v31, %v760_v62  ;;  %v839_v35 = vsub.f32 %v6147_v4, %v760_v62  ;;  %1784 = vmax.xlane.f32.xlu1 %v6148_v32  ;;  %v4955_v38 = vadd.f32 %v3726_v7, %v3724_v12  ;;  %v6150_v31 = vld [vmem:[#allocation22_spill] sm:$0xff]  ;;  %v6151_v62 = vld [vmem:[#allocation57_spill] sm:$0xff] }
 0x1cb   : > { %v3730_v11 = vpop.eup %3729  ;;  %v763_v49 = vpop.xlane.xlu0 %762  ;;  %v1106_v29 = vpack.c.bf16 %v3728_v13, %v3724_v12  ;;  %v6152_v4 = vld [vmem:[#allocation58_spill] sm:$0xff]  ;;  %v6154_v12 = vmax.f32 %v4702_v9, %v4707_v58  ;;  %v6159_v58 = vld [vmem:[#allocation25_spill] sm:$0xff] }
 0x1cc   : > { %1295 = vmatmul.mubr.bf16.gmra.mrb[36].mxu1 %v1104_v14  ;;  %v934_v0 = vmul.f32 1.442695, %v838_v16  ;;  %v936_v56 = vmul.f32 1.442695, %v839_v35  ;;  %v840_v22 = vsub.f32 %v6149_v51, %v763_v49  ;;  %v841_v53 = vsub.f32 %v6150_v31, %v763_v49  ;;  %v6156_v35 = vld [vmem:[#allocation23_spill] sm:$0xff]  ;;  %v6157_v49 = vld [vmem:[#allocation24_spill] sm:$0xff] }
 0x1cd   : > { %v6153_v41 = vmax.f32 %v6151_v62, %v6152_v4  ;;  %v1107_v32 = vpack.c.bf16 %v3730_v11, %v3726_v7  ;;  %v4962_v54 = vadd.f32 %v3730_v11, %v3728_v13 }
 0x1ce   : > { %3739 = vpow2.f32 %v934_v0  ;;  %v938_v39 = vmul.f32 1.442695, %v840_v22  ;;  %v940_v5 = vmul.f32 1.442695, %v841_v53  ;;  %1793 = vmax.xlane.f32.xlu1 %v6154_v12  ;;  %v4967_v14 = vpop.f32.mrb[100].mxu0 }
 0x1cf   : > { %1781 = vmax.xlane.f32.xlu0 %v6153_v41  ;;  %3741 = vpow2.f32 %v936_v56  ;;  %1302 = vmatprep.mubr.bf16.mxu1 %v1107_v32  ;;  %v4969_v51 = vpop.f32.mrb[101].mxu0  ;;  %v6155_v41 = vmax.f32 %v4683_v60, %v4686_v55 }
 0x1d0   : > { %v3732_v16 = vpop.eup %3731  ;;  %3743 = vpow2.f32 %v938_v39  ;;  %v4974_v7 = vpop.f32.mrb[102].mxu0  ;;  %v6158_v39 = vmax.f32 %v4740_v44, %v4743_v50 }
 0x1d1   : > { %v3734_v53 = vpop.eup %3733  ;;  %3745 = vpow2.f32 %v940_v5  ;;  %v766_v0 = vpop.xlane.xlu1 %765 }
 0x1d2   : > { %v4978_v13 = vpop.f32.mrb[103].mxu0  ;;  %v3736_v56 = vpop.eup %3735  ;;  %v842_v11 = vsub.f32 %v6156_v35, %v766_v0  ;;  %v843_v31 = vsub.f32 %v6157_v49, %v766_v0  ;;  %1799 = vmax.xlane.f32.xlu1 %v6158_v39  ;;  %v4987_v12 = vadd.f32 %v3734_v53, %v3732_v16  ;;  %v6160_v35 = vld [vmem:[#allocation26_spill] sm:$0xff]  ;;  %v6161_v0 = vmax.f32 %v4692_v18, %v4695_v24 }
 0x1d3   : > { %1787 = vmax.xlane.f32.xlu0 %v6155_v41  ;;  %v3738_v41 = vpop.eup %3737  ;;  %v769_v22 = vpop.xlane.xlu0 %768  ;;  %v1108_v5 = vpack.c.bf16 %v3736_v56, %v3732_v16  ;;  %v6162_v16 = vmax.f32 %v4777_v45, %v4782_v21  ;;  %v6167_v21 = vld [vmem:[#allocation29_spill] sm:$0xff] }
 0x1d4   : > { %1303 = vmatmul.mubr.bf16.gmra.mrb[40].mxu1 %v1106_v29  ;;  %v942_v55 = vmul.f32 1.442695, %v842_v11  ;;  %v944_v60 = vmul.f32 1.442695, %v843_v31  ;;  %v844_v9 = vsub.f32 %v6159_v58, %v769_v22  ;;  %v845_v4 = vsub.f32 %v6160_v35, %v769_v22  ;;  %v6164_v31 = vld [vmem:[#allocation27_spill] sm:$0xff]  ;;  %v6165_v35 = vld [vmem:[#allocation28_spill] sm:$0xff] }
 0x1d5   : > { %v1109_v49 = vpack.c.bf16 %v3738_v41, %v3734_v53  ;;  %v4994_v39 = vadd.f32 %v3738_v41, %v3736_v56  ;;  %v6163_v53 = vmax.f32 %v4711_v59, %v4720_v3 }
 0x1d6   : > { %3747 = vpow2.f32 %v942_v55  ;;  %v946_v32 = vmul.f32 1.442695, %v844_v9  ;;  %v948_v50 = vmul.f32 1.442695, %v845_v4  ;;  %1805 = vmax.xlane.f32.xlu1 %v6162_v16  ;;  %v4999_v29 = vpop.f32.mrb[104].mxu0 }
 0x1d7   : > { %1790 = vmax.xlane.f32.xlu0 %v6161_v0  ;;  %3749 = vpow2.f32 %v944_v60  ;;  %1310 = vmatprep.mubr.bf16.mxu1 %v1109_v49  ;;  %v5001_v58 = vpop.f32.mrb[105].mxu0 }
 0x1d8   : > { %v3740_v22 = vpop.eup %3739  ;;  %3751 = vpow2.f32 %v946_v32  ;;  %v5006_v56 = vpop.f32.mrb[106].mxu0  ;;  %v6166_v32 = vmax.f32 %v4826_v47, %v4833_v20 }
 0x1d9   : > { %v3742_v9 = vpop.eup %3741  ;;  %3753 = vpow2.f32 %v948_v50  ;;  %v772_v4 = vpop.xlane.xlu1 %771 }
 0x1da   : > { %v5010_v11 = vpop.f32.mrb[107].mxu0  ;;  %v3744_v60 = vpop.eup %3743  ;;  %v846_v41 = vsub.f32 %v6164_v31, %v772_v4  ;;  %v847_v0 = vsub.f32 %v6165_v35, %v772_v4  ;;  %1811 = vmax.xlane.f32.xlu1 %v6166_v32  ;;  %v5019_v16 = vadd.f32 %v3742_v9, %v3740_v22  ;;  %v6168_v31 = vld [vmem:[#allocation30_spill] sm:$0xff]  ;;  %v6169_v4 = vmax.f32 %v4756_v57, %v4759_v8 }
 0x1db   : > { %1796 = vmax.xlane.f32.xlu0 %v6163_v53  ;;  %v3746_v53 = vpop.eup %3745  ;;  %v775_v55 = vpop.xlane.xlu0 %774  ;;  %v1110_v50 = vpack.c.bf16 %v3744_v60, %v3740_v22  ;;  %v6170_v22 = vmax.f32 %v4879_v28, %v4885_v1 }
 0x1dc   : > { %1311 = vmatmul.mubr.bf16.gmra.mrb[44].mxu1 %v1108_v5  ;;  %v950_v3 = vmul.f32 1.442695, %v846_v41  ;;  %v952_v59 = vmul.f32 1.442695, %v847_v0  ;;  %v848_v45 = vsub.f32 %v6167_v21, %v775_v55  ;;  %v849_v24 = vsub.f32 %v6168_v31, %v775_v55  ;;  %v6176_v0 = vld [vmem:[#allocation31_spill] sm:$0xff]  ;;  %v6177_v31 = vld [vmem:[#allocation32_spill] sm:$0xff] }
 0x1dd   : > { %v1111_v35 = vpack.c.bf16 %v3746_v53, %v3742_v9  ;;  %v5026_v32 = vadd.f32 %v3746_v53, %v3744_v60  ;;  %v6173_v9 = vmax.f32 %v4802_v61, %v4805_v23  ;;  %v6179_v61 = vld [vmem:[#allocation33_spill] sm:$0xff] }
 0x1de   : > { %3755 = vpow2.f32 %v950_v3  ;;  %v954_v49 = vmul.f32 1.442695, %v848_v45  ;;  %v956_v20 = vmul.f32 1.442695, %v849_v24  ;;  %1817 = vmax.xlane.f32.xlu1 %v6170_v22  ;;  %v5031_v5 = vpop.f32.mrb[108].mxu0 }
 0x1df   : > { %1802 = vmax.xlane.f32.xlu0 %v6169_v4  ;;  %6171 = vst [vmem:[#allocation15_spill] sm:$0xff] %v5031_v5  ;;  %3757 = vpow2.f32 %v952_v59  ;;  %1318 = vmatprep.mubr.bf16.mxu1 %v1111_v35  ;;  %v5033_v21 = vpop.f32.mrb[109].mxu0 }
 0x1e0   : > { %6172 = vst [vmem:[#allocation16_spill] sm:$0xff] %v5033_v21  ;;  %v3748_v55 = vpop.eup %3747  ;;  %3759 = vpow2.f32 %v954_v49  ;;  %v1846_v3 = vmax.f32 %v5031_v5, %v5033_v21  ;;  %v5040_v24 = vpop.f32.mrb[110].mxu0  ;;  %v6178_v49 = vmax.f32 %v4916_v42, %v4918_v2 }
 0x1e1   : > { %6174 = vst [vmem:[#allocation17_spill] sm:$0xff] %v5040_v24  ;;  %v3750_v45 = vpop.eup %3749  ;;  %3761 = vpow2.f32 %v956_v20  ;;  %v778_v60 = vpop.xlane.xlu1 %777 }
 0x1e2   : > { %v5042_v41 = vpop.f32.mrb[111].mxu0  ;;  %v3752_v59 = vpop.eup %3751  ;;  %v850_v53 = vsub.f32 %v6176_v0, %v778_v60  ;;  %v851_v4 = vsub.f32 %v6177_v31, %v778_v60  ;;  %1823 = vmax.xlane.f32.xlu1 %v6178_v49  ;;  %v5051_v22 = vadd.f32 %v3750_v45, %v3748_v55  ;;  %v6180_v0 = vld [vmem:[#allocation34_spill] sm:$0xff]  ;;  %v6181_v60 = vmax.f32 %v4845_v25, %v4850_v33 }
 0x1e3   : > { %1808 = vmax.xlane.f32.xlu0 %v6173_v9  ;;  %6175 = vst [vmem:[#allocation18_spill] sm:$0xff] %v5042_v41  ;;  %v1849_v35 = vmax.f32 %v5040_v24, %v5042_v41  ;;  %v3754_v9 = vpop.eup %3753  ;;  %v781_v21 = vpop.xlane.xlu0 %780  ;;  %v1112_v20 = vpack.c.bf16 %v3752_v59, %v3748_v55  ;;  %v6182_v55 = vmax.f32 %v4938_v46, %v4940_v26 }
 0x1e4   : > { %1319 = vmatmul.mubr.bf16.gmra.mrb[48].mxu1 %v1110_v50  ;;  %v958_v5 = vmul.f32 1.442695, %v850_v53  ;;  %v960_v23 = vmul.f32 1.442695, %v851_v4  ;;  %v852_v1 = vsub.f32 %v6179_v61, %v781_v21  ;;  %v853_v28 = vsub.f32 %v6180_v0, %v781_v21 }
 0x1e5   : > { %v1113_v31 = vpack.c.bf16 %v3754_v9, %v3750_v45  ;;  %v5058_v49 = vadd.f32 %v3754_v9, %v3752_v59  ;;  %v2185_v21 = vpop.permute.xlu1 %2184  ;;  %v6183_v53 = vmax.f32 %v4889_v27, %v4898_v30 }
 0x1e6   : > { %3763 = vpow2.f32 %v958_v5  ;;  %v962_v41 = vmul.f32 1.442695, %v852_v1  ;;  %v964_v24 = vmul.f32 1.442695, %v853_v28  ;;  %1829 = vmax.xlane.f32.xlu1 %v6182_v55  ;;  %v6184_v28 = vmax.f32 %v4967_v14, %v4969_v51 }
 0x1e7   : > { %1814 = vmax.xlane.f32.xlu0 %v6181_v60  ;;  %3765 = vpow2.f32 %v960_v23  ;;  %1326 = vmatprep.mubr.bf16.mxu1 %v1113_v31  ;;  %v2201_v50 = vpop.permute.xlu0 %2200  ;;  %v6187_v60 = vmax.f32 %v4942_v6, %v4946_v43 }
 0x1e8   : > { %v3756_v61 = vpop.eup %3755  ;;  %3767 = vpow2.f32 %v962_v41  ;;  %3371 = vmatprep.subr.bf16.mxu1 %v2201_v50  ;;  %v6185_v41 = vmax.f32 %v4922_v37, %v4926_v52 }
 0x1e9   : > { %v3758_v45 = vpop.eup %3757  ;;  %3769 = vpow2.f32 %v964_v24  ;;  %3372 = vmatpush3.bf16.msra.mxu1 %v2185_v21  ;;  %v6186_v24 = vmax.f32 %v4999_v29, %v5001_v58  ;;  %v6188_v21 = vmax.f32 %v4974_v7, %v4978_v13 }
 0x1ea   : > { %v3760_v1 = vpop.eup %3759  ;;  %1835 = vmax.xlane.f32.xlu1 %v6184_v28  ;;  %v5069_v5 = vadd.f32 %v3758_v45, %v3756_v61  ;;  %v6192_v28 = vld [vmem:[#allocation77_spill] sm:$0xff] }
 0x1eb   : > { %1820 = vmax.xlane.f32.xlu0 %v6183_v53  ;;  %v3762_v23 = vpop.eup %3761  ;;  %v1114_v59 = vpack.c.bf16 %v3760_v1, %v3756_v61 }
 0x1ec   : > { %1327 = vmatmul.mubr.bf16.gmra.mrb[52].mxu1 %v1112_v20  ;;  %v1115_v4 = vpack.c.bf16 %v3762_v23, %v3758_v45  ;;  %v5074_v9 = vadd.f32 %v3762_v23, %v3760_v1  ;;  %v6189_v1 = vmax.f32 %v5006_v56, %v5010_v11  ;;  %v6193_v23 = vld [vmem:[#allocation76_spill] sm:$0xff] }
 0x1ee   : > { %1334 = vmatprep.mubr.bf16.mxu1 %v1115_v4  ;;  %1841 = vmax.xlane.f32.xlu1 %v6186_v24  ;;  %v6206_v24 = vld [vmem:[#allocation12_spill] sm:$0xff] }
 0x1ef   : > { %1826 = vmax.xlane.f32.xlu0 %v6185_v41 }
 0x1f0   : > { %v3764_v0 = vpop.eup %3763 }
 0x1f1   : > { %v3766_v31 = vpop.eup %3765 }
 0x1f2   : > { %v3768_v55 = vpop.eup %3767  ;;  %1847 = vmax.xlane.f32.xlu1 %v1846_v3  ;;  %v5082_v20 = vadd.f32 %v3766_v31, %v3764_v0  ;;  %v6190_v3 = vpack.c.bf16 %v4733_v19, %v4715_v15  ;;  %v6197_v15 = vld [vmem:[#allocation47_spill] sm:$0xff]  ;;  %v6198_v19 = vld [vmem:[#allocation13_spill] sm:$0xff] }
 0x1f3   : > { %1832 = vmax.xlane.f32.xlu0 %v6187_v60  ;;  %v3770_v50 = vpop.eup %3769  ;;  %v1116_v61 = vpack.c.bf16 %v3768_v55, %v3764_v0  ;;  %v6207_v0 = vld [vmem:[#allocation83_spill] sm:$0xff]  ;;  %v6208_v60 = vld [vmem:[#allocation80_spill] sm:$0xff] }
 0x1f4   : > { %1335 = vmatmul.mubr.bf16.gmra.mrb[56].mxu1 %v1114_v59  ;;  %v1117_v53 = vpack.c.bf16 %v3770_v50, %v3766_v31  ;;  %v5087_v45 = vadd.f32 %v3770_v50, %v3768_v55  ;;  %v6209_v31 = vpack.c.bf16 %v6207_v0, %v6208_v60  ;;  %v6210_v55 = vld [vmem:[#allocation14_spill] sm:$0xff]  ;;  %v6223_v60 = vld [vmem:[#allocation39_spill] sm:$0xff] }
 0x1f5   : > { %v6211_v50 = vld [vmem:[#allocation86_spill] sm:$0xff] }
 0x1f6   : > { %1342 = vmatprep.mubr.bf16.mxu1 %v1117_v53  ;;  %999 = vadd.xlane.f32.xlu1 %v4731_v48  ;;  %v6191_v48 = vpack.c.bf16 %v4729_v40, %v4709_v10  ;;  %v6203_v10 = vld [vmem:[#allocation84_spill] sm:$0xff]  ;;  %v6204_v40 = vld [vmem:[#allocation81_spill] sm:$0xff] }
 0x1f7   : > { %1838 = vmax.xlane.f32.xlu0 %v6188_v21  ;;  %v6205_v4 = vpack.c.bf16 %v6203_v10, %v6204_v40  ;;  %v6220_v10 = vld [vmem:[#allocation7_spill] sm:$0xff] }
 0x1fa   : > { %1005 = vadd.xlane.f32.xlu1 %v4785_v63  ;;  %v6194_v63 = vld [vmem:[#allocation73_spill] sm:$0xff] }
 0x1fb   : > { %1844 = vmax.xlane.f32.xlu0 %v6189_v1  ;;  %v6195_v59 = vpack.c.bf16 %v6193_v23, %v6194_v63  ;;  %v6214_v1 = vld [vmem:[#allocation35_spill] sm:$0xff]  ;;  %v6216_v63 = vld [vmem:[#allocation37_spill] sm:$0xff] }
 0x1fc   : > { %1343 = vmatmul.mubr.bf16.gmra.mrb[60].mxu1 %v1116_v61  ;;  %v6212_v61 = vld [vmem:[#allocation8_spill] sm:$0xff] }
 0x1fd   : > { %1350 = vmatprep.mubr.bf16.mxu1 %v6190_v3  ;;  %v6213_v21 = vpack.c.bf16 %v6211_v50, %v6212_v61 }
 0x1fe   : > { %1011 = vadd.xlane.f32.xlu1 %v4821_v34  ;;  %v6199_v34 = vld [vmem:[#allocation75_spill] sm:$0xff] }
 0x1ff   : > { %1850 = vmax.xlane.f32.xlu0 %v1849_v35  ;;  %v6196_v35 = vld [vmem:[#allocation11_spill] sm:$0xff] }
 0x202   : > { %1017 = vadd.xlane.f32.xlu1 %v4876_v36  ;;  %v6202_v36 = vld [vmem:[#allocation85_spill] sm:$0xff] }
 0x203   : > { %1002 = vadd.xlane.f32.xlu0 %v4761_v17  ;;  %v6200_v17 = vld [vmem:[#allocation70_spill] sm:$0xff] }
 0x204   : > { %1351 = vmatmul.mubr.bf16.gmra.mrb[64].mxu1 %v6191_v48  ;;  %v6201_v41 = vpack.c.bf16 %v6199_v34, %v6200_v17 }
 0x205   : > { %1358 = vmatprep.mubr.bf16.mxu1 %v6195_v59 }
 0x206   : > { %1023 = vadd.xlane.f32.xlu1 %v6196_v35  ;;  %v6217_v35 = vld [vmem:[#allocation38_spill] sm:$0xff] }
 0x207   : > { %1008 = vadd.xlane.f32.xlu0 %v6192_v28 }
 0x20a   : > { %1029 = vadd.xlane.f32.xlu1 %v6198_v19 }
 0x20b   : > { %1014 = vadd.xlane.f32.xlu0 %v6197_v15 }
 0x20c   : > { %1359 = vmatmul.mubr.bf16.gmra.mrb[68].mxu1 %v6201_v41 }
 0x20d   : > { %1366 = vmatprep.mubr.bf16.mxu1 %v6205_v4 }
 0x20e   : > { %1035 = vadd.xlane.f32.xlu1 %v4955_v38  ;;  %v6215_v38 = vld [vmem:[#allocation36_spill] sm:$0xff] }
 0x20f   : > { %1020 = vadd.xlane.f32.xlu0 %v6202_v36  ;;  %v6219_v36 = vld [vmem:[#allocation55_spill] sm:$0xff] }
 0x210   : > { %v6221_v40 = vpack.c.bf16 %v6219_v36, %v6220_v10 }
 0x212   : > { %1041 = vadd.xlane.f32.xlu1 %v4987_v12 }
 0x213   : > { %1026 = vadd.xlane.f32.xlu0 %v6206_v24 }
 0x214   : > { %1367 = vmatmul.mubr.bf16.gmra.mrb[72].mxu1 %v6209_v31 }
 0x215   : > { %1374 = vmatprep.mubr.bf16.mxu1 %v6213_v21 }
 0x216   : > { %v1758_v53 = vpop.xlane.xlu1 %1757  ;;  %1047 = vadd.xlane.f32.xlu1 %v5019_v16  ;;  %v6218_v16 = vld [vmem:[#allocation41_spill] sm:$0xff] }
 0x217   : > { %1032 = vadd.xlane.f32.xlu0 %v6210_v55  ;;  %v1852_v3 = vsub.f32 %v6214_v1, %v1758_v53  ;;  %v1853_v48 = vsub.f32 %v6215_v38, %v1758_v53  ;;  %v6225_v1 = vld [vmem:[#allocation46_spill] sm:$0xff]  ;;  %v6226_v38 = vld [vmem:[#allocation48_spill] sm:$0xff] }
 0x218   : > { %v1761_v12 = vpop.xlane.xlu0 %1760 }
 0x219   : > { %v1916_v28 = vmul.f32 1.442695, %v1852_v3  ;;  %v1918_v23 = vmul.f32 1.442695, %v1853_v48  ;;  %v1854_v59 = vsub.f32 %v6216_v63, %v1761_v12  ;;  %v1855_v15 = vsub.f32 %v6217_v35, %v1761_v12  ;;  %v6228_v63 = vld [vmem:[#allocation44_spill] sm:$0xff] }
 0x21a   : > { %v1767_v19 = vpop.xlane.xlu1 %1766  ;;  %1053 = vadd.xlane.f32.xlu1 %v5051_v22  ;;  %v6224_v22 = vld [vmem:[#allocation40_spill] sm:$0xff] }
 0x21b   : > { %1038 = vadd.xlane.f32.xlu0 %v4962_v54  ;;  %3771 = vpow2.f32 %v1916_v28  ;;  %v1920_v34 = vmul.f32 1.442695, %v1854_v59  ;;  %v1922_v17 = vmul.f32 1.442695, %v1855_v15  ;;  %v1858_v41 = vsub.f32 %v6218_v16, %v1767_v19  ;;  %v6222_v54 = vld [vmem:[#allocation42_spill] sm:$0xff]  ;;  %v6227_v28 = vld [vmem:[#allocation43_spill] sm:$0xff] }
 0x21c   : > { %3773 = vpow2.f32 %v1918_v23  ;;  %1375 = vmatmul.mubr.bf16.gmra.mrb[76].mxu1 %v6221_v40  ;;  %v1859_v4 = vsub.f32 %v6222_v54, %v1767_v19  ;;  %v1764_v24 = vpop.xlane.xlu0 %1763  ;;  %v6231_v54 = vld [vmem:[#allocation50_spill] sm:$0xff] }
 0x21d   : > { %3775 = vpow2.f32 %v1920_v34  ;;  %v1928_v0 = vmul.f32 1.442695, %v1858_v41  ;;  %v1856_v31 = vsub.f32 %v6223_v60, %v1764_v24  ;;  %v1857_v55 = vsub.f32 %v6224_v22, %v1764_v24  ;;  %v6230_v41 = vld [vmem:[#allocation54_spill] sm:$0xff]  ;;  %v6232_v24 = vld [vmem:[#allocation52_spill] sm:$0xff] }
 0x21e   : > { %3777 = vpow2.f32 %v1922_v17  ;;  %v1930_v50 = vmul.f32 1.442695, %v1859_v4  ;;  %v1773_v61 = vpop.xlane.xlu1 %1772  ;;  %v6229_v17 = vld [vmem:[#allocation53_spill] sm:$0xff] }
 0x21f   : > { %1044 = vadd.xlane.f32.xlu0 %v4994_v39  ;;  %3779 = vpow2.f32 %v1928_v0  ;;  %v1924_v21 = vmul.f32 1.442695, %v1856_v31  ;;  %v1926_v53 = vmul.f32 1.442695, %v1857_v55  ;;  %v1862_v3 = vsub.f32 %v6225_v1, %v1773_v61 }
 0x220   : > { %3781 = vpow2.f32 %v1930_v50  ;;  %v1863_v48 = vsub.f32 %v6226_v38, %v1773_v61  ;;  %v1770_v39 = vpop.xlane.xlu0 %1769 }
 0x221   : > { %3783 = vpow2.f32 %v1924_v21  ;;  %v1936_v12 = vmul.f32 1.442695, %v1862_v3  ;;  %v1860_v23 = vsub.f32 %v6227_v28, %v1770_v39  ;;  %v1861_v59 = vsub.f32 %v6228_v63, %v1770_v39 }
 0x222   : > { %3785 = vpow2.f32 %v1926_v53  ;;  %v1938_v35 = vmul.f32 1.442695, %v1863_v48  ;;  %v1779_v15 = vpop.xlane.xlu1 %1778 }
 0x223   : > { %1050 = vadd.xlane.f32.xlu0 %v5026_v32  ;;  %3787 = vpow2.f32 %v1936_v12  ;;  %v1932_v19 = vmul.f32 1.442695, %v1860_v23  ;;  %v1934_v34 = vmul.f32 1.442695, %v1861_v59  ;;  %v1866_v16 = vsub.f32 %v6229_v17, %v1779_v15 }
 0x224   : > { %3789 = vpow2.f32 %v1938_v35  ;;  %v1867_v36 = vsub.f32 %v6230_v41, %v1779_v15  ;;  %v1776_v32 = vpop.xlane.xlu0 %1775 }
 0x225   : > { %v3772_v10 = vpop.eup %3771  ;;  %3791 = vpow2.f32 %v1932_v19  ;;  %v1944_v40 = vmul.f32 1.442695, %v1866_v16  ;;  %v1864_v4 = vsub.f32 %v6231_v54, %v1776_v32  ;;  %v1865_v0 = vsub.f32 %v6232_v24, %v1776_v32 }
 0x226   : > { %v3774_v60 = vpop.eup %3773  ;;  %3793 = vpow2.f32 %v1934_v34  ;;  %v1946_v31 = vmul.f32 1.442695, %v1867_v36  ;;  %v2187_v3 = vpop.permute.xlu1 %2186 }
 0x227   : > { %1056 = vadd.xlane.f32.xlu0 %v5058_v49  ;;  %v3776_v22 = vpop.eup %3775  ;;  %3795 = vpow2.f32 %v1944_v40  ;;  %v1940_v55 = vmul.f32 1.442695, %v1864_v4  ;;  %v1942_v50 = vmul.f32 1.442695, %v1865_v0  ;;  %v2044_v61 = vadd.f32 %v3774_v60, %v3772_v10 }
 0x228   : > { %v3778_v21 = vpop.eup %3777  ;;  %3797 = vpow2.f32 %v1946_v31  ;;  %v2203_v53 = vpop.permute.xlu0 %2202  ;;  %v2140_v49 = vpack.c.bf16 %v3776_v22, %v3772_v10 }
 0x229   : > { %v3780_v1 = vpop.eup %3779  ;;  %3799 = vpow2.f32 %v1940_v55  ;;  %2045 = vadd.xlane.f32.xlu1 %v2044_v61  ;;  %3373 = vmatprep.subr.bf16.mxu1 %v2203_v53  ;;  %v2141_v38 = vpack.c.bf16 %v3778_v21, %v3774_v60  ;;  %v2047_v48 = vadd.f32 %v3778_v21, %v3776_v22  ;;  %v6233_v22 = vld [vmem:[#allocation59_spill] sm:$0xff] }
 0x22a   : > { %v3782_v39 = vpop.eup %3781  ;;  %3801 = vpow2.f32 %v1942_v50  ;;  %3374 = vmatpush3.bf16.msra.mxu1 %v2187_v3  ;;  %v6234_v50 = vld [vmem:[#allocation60_spill] sm:$0xff] }
 0x22b   : > { %v3784_v12 = vpop.eup %3783  ;;  %2252 = vmatprep.mubr.bf16.mxu1 %v2141_v38  ;;  %2048 = vadd.xlane.f32.xlu0 %v2047_v48  ;;  %v2053_v28 = vadd.f32 %v3782_v39, %v3780_v1 }
 0x22c   : > { %v3786_v23 = vpop.eup %3785  ;;  %v2142_v63 = vpack.c.bf16 %v3780_v1, %v3784_v12 }
 0x22d   : > { %v3788_v59 = vpop.eup %3787  ;;  %2253 = vmatmul.mubr.bf16.vlgmr.msra.gmra.mrb[80].mxu1 %v2140_v49  ;;  %v2050_v35 = vadd.f32 %v3786_v23, %v3784_v12  ;;  %v2143_v15 = vpack.c.bf16 %v3782_v39, %v3786_v23  ;;  %v6236_v39 = vld [vmem:[#allocation64_spill] sm:$0xff] }
 0x22e   : > { %v3790_v19 = vpop.eup %3789 }
 0x22f   : > { %v3792_v34 = vpop.eup %3791  ;;  %2054 = vadd.xlane.f32.xlu0 %v2053_v28  ;;  %2051 = vadd.xlane.f32.xlu1 %v2050_v35  ;;  %v2059_v17 = vadd.f32 %v3790_v19, %v3788_v59 }
 0x230   : > { %v3794_v16 = vpop.eup %3793  ;;  %2260 = vmatprep.mubr.bf16.mxu1 %v2143_v15  ;;  %v2144_v41 = vpack.c.bf16 %v3788_v59, %v3792_v34  ;;  %v6238_v59 = vld [vmem:[#allocation61_spill] sm:$0xff]  ;;  %v6239_v15 = vld [vmem:[#allocation62_spill] sm:$0xff] }
 0x231   : > { %v3796_v36 = vpop.eup %3795  ;;  %v2056_v32 = vadd.f32 %v3794_v16, %v3792_v34  ;;  %v2145_v10 = vpack.c.bf16 %v3790_v19, %v3794_v16 }
 0x232   : > { %v3798_v40 = vpop.eup %3797 }
 0x233   : > { %v3800_v54 = vpop.eup %3799  ;;  %1062 = vadd.xlane.f32.xlu0 %v5074_v9  ;;  %2057 = vadd.xlane.f32.xlu1 %v2056_v32  ;;  %v2065_v4 = vadd.f32 %v3798_v40, %v3796_v36 }
 0x234   : > { %v3802_v24 = vpop.eup %3801  ;;  %v2146_v0 = vpack.c.bf16 %v3796_v36, %v3800_v54  ;;  %v6240_v36 = vld [vmem:[#allocation69_spill] sm:$0xff] }
 0x235   : > { %2261 = vmatmul.mubr.bf16.gmra.mrb[84].mxu1 %v2142_v63  ;;  %v2062_v60 = vadd.f32 %v3802_v24, %v3800_v54  ;;  %v2147_v31 = vpack.c.bf16 %v3798_v40, %v3802_v24 }
 0x236   : > { %2268 = vmatprep.mubr.bf16.mxu1 %v2145_v10 }
 0x237   : > { %2060 = vadd.xlane.f32.xlu0 %v2059_v17  ;;  %1059 = vadd.xlane.f32.xlu1 %v5069_v5  ;;  %v6235_v5 = vld [vmem:[#allocation58_spill] sm:$0xff] }
 0x23b   : > { %1068 = vadd.xlane.f32.xlu0 %v5087_v45  ;;  %2063 = vadd.xlane.f32.xlu1 %v2062_v60 }
 0x23d   : > { %2269 = vmatmul.mubr.bf16.gmra.mrb[88].mxu1 %v2144_v41 }
 0x23e   : > { %2276 = vmatprep.mubr.bf16.mxu1 %v2147_v31 }
 0x23f   : > { %2066 = vadd.xlane.f32.xlu0 %v2065_v4  ;;  %1065 = vadd.xlane.f32.xlu1 %v5082_v20  ;;  %v6237_v20 = vld [vmem:[#allocation65_spill] sm:$0xff]  ;;  %v6241_v4 = vld [vmem:[#allocation63_spill] sm:$0xff] }
 0x245   : > { %2277 = vmatmul.mubr.bf16.gmra.mrb[92].mxu1 %v2146_v0 }
 0x257   : > { %v1785_v9 = vpop.xlane.xlu1 %1784 }
 0x258   : > { %v1870_v55 = vsub.f32 %v6233_v22, %v1785_v9  ;;  %v1871_v61 = vsub.f32 %v6234_v50, %v1785_v9  ;;  %v6242_v22 = vld [vmem:[#allocation72_spill] sm:$0xff] }
 0x25a   : > { %v1952_v53 = vmul.f32 1.442695, %v1870_v55  ;;  %v1954_v49 = vmul.f32 1.442695, %v1871_v61 }
 0x25b   : > { %v1794_v45 = vpop.xlane.xlu1 %1793 }
 0x25c   : > { %v1782_v21 = vpop.xlane.xlu0 %1781  ;;  %3803 = vpow2.f32 %v1952_v53  ;;  %v1876_v12 = vsub.f32 %v6236_v39, %v1794_v45  ;;  %v1877_v28 = vsub.f32 %v6237_v20, %v1794_v45 }
 0x25d   : > { %v1868_v1 = vsub.f32 %v6151_v62, %v1782_v21  ;;  %v1869_v3 = vsub.f32 %v6235_v5, %v1782_v21  ;;  %3805 = vpow2.f32 %v1954_v49  ;;  %v6244_v49 = vld [vmem:[#allocation66_spill] sm:$0xff] }
 0x25e   : > { %v1964_v63 = vmul.f32 1.442695, %v1876_v12  ;;  %v1966_v62 = vmul.f32 1.442695, %v1877_v28 }
 0x25f   : > { %v1948_v38 = vmul.f32 1.442695, %v1868_v1  ;;  %v1950_v48 = vmul.f32 1.442695, %v1869_v3  ;;  %v1800_v34 = vpop.xlane.xlu1 %1799 }
 0x260   : > { %v1788_v23 = vpop.xlane.xlu0 %1787  ;;  %v1880_v41 = vsub.f32 %v4740_v44, %v1800_v34  ;;  %v1881_v32 = vsub.f32 %v6240_v36, %v1800_v34  ;;  %v6243_v44 = vld [vmem:[#allocation74_spill] sm:$0xff] }
 0x261   : > { %3807 = vpow2.f32 %v1948_v38  ;;  %v1872_v35 = vsub.f32 %v6238_v59, %v1788_v23  ;;  %v1873_v19 = vsub.f32 %v6239_v15, %v1788_v23  ;;  %v6246_v23 = vld [vmem:[#allocation5_spill] sm:$0xff] }
 0x262   : > { %3809 = vpow2.f32 %v1950_v48  ;;  %v1972_v40 = vmul.f32 1.442695, %v1880_v41  ;;  %v1974_v0 = vmul.f32 1.442695, %v1881_v32 }
 0x263   : > { %3811 = vpow2.f32 %v1964_v63  ;;  %v1956_v17 = vmul.f32 1.442695, %v1872_v35  ;;  %v1958_v16 = vmul.f32 1.442695, %v1873_v19  ;;  %v1806_v60 = vpop.xlane.xlu1 %1805 }
 0x264   : > { %3813 = vpow2.f32 %v1966_v62  ;;  %v1791_v10 = vpop.xlane.xlu0 %1790  ;;  %v1884_v55 = vsub.f32 %v6242_v22, %v1806_v60  ;;  %v1885_v50 = vsub.f32 %v6243_v44, %v1806_v60 }
 0x265   : > { %3815 = vpow2.f32 %v1956_v17  ;;  %v1874_v54 = vsub.f32 %v4692_v18, %v1791_v10  ;;  %v1875_v24 = vsub.f32 %v6241_v4, %v1791_v10  ;;  %v6245_v18 = vld [vmem:[#allocation67_spill] sm:$0xff]  ;;  %v6247_v4 = vld [vmem:[#allocation9_spill] sm:$0xff] }
 0x266   : > { %3817 = vpow2.f32 %v1958_v16  ;;  %v3804_v21 = vpop.eup %3803  ;;  %v1980_v53 = vmul.f32 1.442695, %v1884_v55  ;;  %v1982_v45 = vmul.f32 1.442695, %v1885_v50  ;;  %v6249_v55 = vld [vmem:[#allocation78_spill] sm:$0xff]  ;;  %v6250_v50 = vld [vmem:[#allocation79_spill] sm:$0xff] }
 0x267   : > { %3819 = vpow2.f32 %v1972_v40  ;;  %v1960_v31 = vmul.f32 1.442695, %v1874_v54  ;;  %v1962_v9 = vmul.f32 1.442695, %v1875_v24  ;;  %v3806_v3 = vpop.eup %3805  ;;  %v1812_v38 = vpop.xlane.xlu1 %1811 }
 0x268   : > { %3821 = vpow2.f32 %v1974_v0  ;;  %v1797_v61 = vpop.xlane.xlu0 %1796  ;;  %v1888_v20 = vsub.f32 %v4826_v47, %v1812_v38  ;;  %v1889_v63 = vsub.f32 %v6246_v23, %v1812_v38  ;;  %v2071_v59 = vadd.f32 %v3806_v3, %v3804_v21 }
 0x269   : > { %3823 = vpow2.f32 %v1960_v31  ;;  %v1878_v1 = vsub.f32 %v6244_v49, %v1797_v61  ;;  %v1879_v5 = vsub.f32 %v6245_v18, %v1797_v61 }
 0x26a   : > { %3825 = vpow2.f32 %v1962_v9  ;;  %v1988_v62 = vmul.f32 1.442695, %v1888_v20  ;;  %v1990_v41 = vmul.f32 1.442695, %v1889_v63  ;;  %2072 = vadd.xlane.f32.xlu0 %v2071_v59 }
 0x26b   : > { %v3808_v48 = vpop.eup %3807  ;;  %3827 = vpow2.f32 %v1980_v53  ;;  %v1968_v39 = vmul.f32 1.442695, %v1878_v1  ;;  %v1970_v12 = vmul.f32 1.442695, %v1879_v5  ;;  %v1818_v47 = vpop.xlane.xlu1 %1817 }
 0x26c   : > { %v3810_v28 = vpop.eup %3809  ;;  %3829 = vpow2.f32 %v1982_v45  ;;  %v1803_v35 = vpop.xlane.xlu0 %1802  ;;  %v2148_v15 = vpack.c.bf16 %v3804_v21, %v3808_v48  ;;  %v1892_v24 = vsub.f32 %v6247_v4, %v1818_v47 }
 0x26d   : > { %v5174_v19 = vpop.eup %3811  ;;  %3831 = vpow2.f32 %v1968_v39  ;;  %v1882_v34 = vsub.f32 %v4756_v57, %v1803_v35  ;;  %v1883_v17 = vsub.f32 %v4759_v8, %v1803_v35  ;;  %v2149_v36 = vpack.c.bf16 %v3806_v3, %v3810_v28  ;;  %v6248_v57 = vld [vmem:[#allocation51_spill] sm:$0xff] }
 0x26e   : > { %v5178_v16 = vpop.eup %3813  ;;  %3833 = vpow2.f32 %v1970_v12  ;;  %v2068_v32 = vadd.f32 %v3810_v28, %v3808_v48  ;;  %v1893_v60 = vsub.f32 %v6248_v57, %v1818_v47  ;;  %v1996_v22 = vmul.f32 1.442695, %v1892_v24 }
 0x26f   : > { %v5180_v10 = vpop.eup %3815  ;;  %3835 = vpow2.f32 %v1988_v62  ;;  %v1976_v40 = vmul.f32 1.442695, %v1882_v34  ;;  %v1978_v54 = vmul.f32 1.442695, %v1883_v17  ;;  %2284 = vmatprep.mubr.bf16.mxu1 %v2149_v36  ;;  %v2080_v31 = vadd.f32 %v5178_v16, %v5174_v19  ;;  %v1824_v49 = vpop.xlane.xlu1 %1823 }
 0x270   : > { %v3818_v0 = vpop.eup %3817  ;;  %3837 = vpow2.f32 %v1990_v41  ;;  %2069 = vadd.xlane.f32.xlu1 %v2068_v32  ;;  %v1809_v8 = vpop.xlane.xlu0 %1808  ;;  %2285 = vmatmul.mubr.bf16.gmra.mrb[96].mxu1 %v2148_v15  ;;  %v1998_v53 = vmul.f32 1.442695, %v1893_v60  ;;  %v1896_v45 = vsub.f32 %v4916_v42, %v1824_v49  ;;  %v1897_v48 = vsub.f32 %v4918_v2, %v1824_v49 }
 0x271   : > { %v5186_v9 = vpop.eup %3819  ;;  %3839 = vpow2.f32 %v1976_v40  ;;  %v1886_v44 = vsub.f32 %v6249_v55, %v1809_v8  ;;  %v1887_v61 = vsub.f32 %v6250_v50, %v1809_v8  ;;  %v2074_v1 = vadd.f32 %v3818_v0, %v5180_v10 }
 0x272   : > { %v5190_v21 = vpop.eup %3821  ;;  %3841 = vpow2.f32 %v1978_v54  ;;  %v2004_v23 = vmul.f32 1.442695, %v1896_v45  ;;  %v2006_v35 = vmul.f32 1.442695, %v1897_v48 }
 0x273   : > { %v3824_v18 = vpop.eup %3823  ;;  %3843 = vpow2.f32 %v1996_v22  ;;  %v1984_v5 = vmul.f32 1.442695, %v1886_v44  ;;  %v1986_v3 = vmul.f32 1.442695, %v1887_v61  ;;  %v2086_v20 = vadd.f32 %v5190_v21, %v5186_v9  ;;  %v1830_v2 = vpop.xlane.xlu1 %1829 }
 0x274   : > { %v3826_v38 = vpop.eup %3825  ;;  %3845 = vpow2.f32 %v1998_v53  ;;  %2075 = vadd.xlane.f32.xlu1 %v2074_v1  ;;  %v1815_v39 = vpop.xlane.xlu0 %1814  ;;  %v2150_v12 = vpack.c.bf16 %v3824_v18, %v5180_v10  ;;  %v1900_v47 = vsub.f32 %v4938_v46, %v1830_v2 }
 0x275   : > { %v5198_v28 = vpop.eup %3827  ;;  %3847 = vpow2.f32 %v1984_v5  ;;  %v1890_v63 = vsub.f32 %v4845_v25, %v1815_v39  ;;  %v1891_v59 = vsub.f32 %v4850_v33, %v1815_v39  ;;  %v2151_v15 = vpack.c.bf16 %v3826_v38, %v3818_v0 }
 0x276   : > { %v5202_v42 = vpop.eup %3829  ;;  %3849 = vpow2.f32 %v1986_v3  ;;  %v2077_v62 = vadd.f32 %v3826_v38, %v3824_v18  ;;  %v1901_v25 = vsub.f32 %v4940_v26, %v1830_v2  ;;  %v2012_v54 = vmul.f32 1.442695, %v1900_v47  ;;  %v3263_v24 = vpop.f32.mrb[16].mxu1 }
 0x277   : > { %v5204_v34 = vpop.eup %3831  ;;  %3851 = vpow2.f32 %v2004_v23  ;;  %v1992_v17 = vmul.f32 1.442695, %v1890_v63  ;;  %v1994_v41 = vmul.f32 1.442695, %v1891_v59  ;;  %2292 = vmatprep.mubr.bf16.mxu1 %v2151_v15  ;;  %v2092_v32 = vadd.f32 %v5202_v42, %v5198_v28  ;;  %v1836_v57 = vpop.xlane.xlu1 %1835 }
 0x278   : > { %v3834_v36 = vpop.eup %3833  ;;  %3853 = vpow2.f32 %v2006_v35  ;;  %2081 = vadd.xlane.f32.xlu1 %v2080_v31  ;;  %v1821_v33 = vpop.xlane.xlu0 %1820  ;;  %v2152_v10 = vpack.c.bf16 %v5204_v34, %v5174_v19  ;;  %2078 = vadd.xlane.f32.xlu0 %v2077_v62  ;;  %v2014_v0 = vmul.f32 1.442695, %v1901_v25  ;;  %v1905_v61 = vsub.f32 %v4969_v51, %v1836_v57 }
 0x279   : > { %v5212_v40 = vpop.eup %3835  ;;  %3855 = vpow2.f32 %v1992_v17  ;;  %2293 = vmatmul.mubr.bf16.gmra.mrb[100].mxu1 %v2150_v12  ;;  %v1894_v46 = vsub.f32 %v4889_v27, %v1821_v33  ;;  %v1895_v4 = vsub.f32 %v4898_v30, %v1821_v33  ;;  %v2153_v60 = vpack.c.bf16 %v3834_v36, %v5178_v16  ;;  %v3264_v31 = vpop.f32.mrb[17].mxu1 }
 0x27a   : > { %v5216_v26 = vpop.eup %3837  ;;  %3857 = vpow2.f32 %v1994_v41  ;;  %v2083_v19 = vadd.f32 %v3834_v36, %v5204_v34  ;;  %v1904_v27 = vsub.f32 %v4967_v14, %v1836_v57  ;;  %v5223_v30 = vadd.f32 %v3264_v31, %v3263_v24  ;;  %v3266_v50 = vpop.f32.mrb[18].mxu1 }
 0x27b   : > { %v5220_v8 = vpop.eup %3839  ;;  %3859 = vpow2.f32 %v2012_v54  ;;  %v2000_v22 = vmul.f32 1.442695, %v1894_v46  ;;  %v2002_v55 = vmul.f32 1.442695, %v1895_v4  ;;  %2300 = vmatprep.mubr.bf16.mxu1 %v2153_v60  ;;  %v2098_v53 = vadd.f32 %v5216_v26, %v5212_v40  ;;  %v3267_v1 = vpop.f32.mrb[19].mxu1  ;;  %v6252_v4 = vld [vmem:[#allocation16_spill] sm:$0xff] }
 0x27c   : > { %v3842_v44 = vpop.eup %3841  ;;  %3861 = vpow2.f32 %v2014_v0  ;;  %2087 = vadd.xlane.f32.xlu1 %v2086_v20  ;;  %v1827_v16 = vpop.xlane.xlu0 %1826  ;;  %v2020_v18 = vmul.f32 1.442695, %v1904_v27  ;;  %2084 = vadd.xlane.f32.xlu0 %v2083_v19  ;;  %v5234_v51 = vadd.f32 %v3267_v1, %v3266_v50  ;;  %v2022_v45 = vmul.f32 1.442695, %v1905_v61 }
 0x27d   : > { %v5228_v49 = vpop.eup %3843  ;;  %3863 = vpow2.f32 %v2000_v22  ;;  %v1898_v14 = vsub.f32 %v4922_v37, %v1827_v16  ;;  %v1899_v5 = vsub.f32 %v4926_v52, %v1827_v16  ;;  %v1842_v38 = vpop.xlane.xlu1 %1841  ;;  %v2089_v48 = vadd.f32 %v3842_v44, %v5220_v8 }
 0x27e   : > { %v5232_v3 = vpop.eup %3845  ;;  %3865 = vpow2.f32 %v2002_v55  ;;  %v1908_v23 = vsub.f32 %v4999_v29, %v1842_v38  ;;  %v1909_v37 = vsub.f32 %v5001_v58, %v1842_v38  ;;  %v2155_v52 = vpack.c.bf16 %v3842_v44, %v5190_v21  ;;  %v3269_v58 = vpop.f32.mrb[20].mxu1 }
 0x27f   : > { %v5237_v39 = vpop.eup %3847  ;;  %3867 = vpow2.f32 %v2020_v18  ;;  %v2008_v12 = vmul.f32 1.442695, %v1898_v14  ;;  %v2010_v20 = vmul.f32 1.442695, %v1899_v5  ;;  %v2104_v35 = vadd.f32 %v5232_v3, %v5228_v49  ;;  %v3270_v25 = vpop.f32.mrb[21].mxu1 }
 0x280   : > { %v5240_v63 = vpop.eup %3849  ;;  %3869 = vpow2.f32 %v2022_v45  ;;  %2093 = vadd.xlane.f32.xlu1 %v2092_v32  ;;  %v1833_v59 = vpop.xlane.xlu0 %1832  ;;  %v2028_v15 = vmul.f32 1.442695, %v1908_v23  ;;  %2090 = vadd.xlane.f32.xlu0 %v2089_v48  ;;  %v2030_v17 = vmul.f32 1.442695, %v1909_v37  ;;  %v2154_v47 = vpack.c.bf16 %v5220_v8, %v5186_v9 }
 0x281   : > { %v5246_v2 = vpop.eup %3851  ;;  %3871 = vpow2.f32 %v2008_v12  ;;  %2301 = vmatmul.mubr.bf16.gmra.mrb[104].mxu1 %v2152_v10  ;;  %v1902_v29 = vsub.f32 %v4942_v6, %v1833_v59  ;;  %v1903_v62 = vsub.f32 %v4946_v43, %v1833_v59  ;;  %v1848_v21 = vpop.xlane.xlu1 %1847  ;;  %v2095_v41 = vadd.f32 %v5240_v63, %v5237_v39  ;;  %v6251_v43 = vld [vmem:[#allocation15_spill] sm:$0xff] }
 0x282   : > { %v5250_v34 = vpop.eup %3853  ;;  %3873 = vpow2.f32 %v2010_v20  ;;  %2308 = vmatprep.mubr.bf16.mxu1 %v2155_v52  ;;  %v1912_v32 = vsub.f32 %v6251_v43, %v1848_v21  ;;  %v5261_v54 = vadd.f32 %v3270_v25, %v3269_v58  ;;  %v3272_v46 = vpop.f32.mrb[22].mxu1  ;;  %v1913_v24 = vsub.f32 %v6252_v4, %v1848_v21  ;;  %v6253_v21 = vld [vmem:[#allocation17_spill] sm:$0xff] }
 0x283   : > { %v5256_v36 = vpop.eup %3855  ;;  %3875 = vpow2.f32 %v2028_v15  ;;  %v2016_v6 = vmul.f32 1.442695, %v1902_v29  ;;  %v2018_v33 = vmul.f32 1.442695, %v1903_v62  ;;  %v2157_v9 = vpack.c.bf16 %v5240_v63, %v5202_v42  ;;  %v3273_v60 = vpop.f32.mrb[23].mxu1 }
 0x284   : > { %v5259_v10 = vpop.eup %3857  ;;  %3877 = vpow2.f32 %v2030_v17  ;;  %2099 = vadd.xlane.f32.xlu1 %v2098_v53  ;;  %v1839_v0 = vpop.xlane.xlu0 %1838  ;;  %v2036_v19 = vmul.f32 1.442695, %v1912_v32  ;;  %2096 = vadd.xlane.f32.xlu0 %v2095_v41  ;;  %v5272_v55 = vadd.f32 %v3273_v60, %v3272_v46  ;;  %v2038_v27 = vmul.f32 1.442695, %v1913_v24 }
 0x285   : > { %v5266_v57 = vpop.eup %3859  ;;  %3879 = vpow2.f32 %v2016_v6  ;;  %v1906_v8 = vsub.f32 %v4974_v7, %v1839_v0  ;;  %v1907_v31 = vsub.f32 %v4978_v13, %v1839_v0  ;;  %v1000_v44 = vpop.xlane.xlu1 %999  ;;  %v2101_v42 = vadd.f32 %v5259_v10, %v5256_v36 }
 0x286   : > { %v5270_v22 = vpop.eup %3861  ;;  %3881 = vpow2.f32 %v2018_v33  ;;  %v2110_v7 = vadd.f32 %v5250_v34, %v5246_v2  ;;  %v2156_v18 = vpack.c.bf16 %v5237_v39, %v5198_v28  ;;  %v2159_v14 = vpack.c.bf16 %v5259_v10, %v5216_v26 }
 0x287   : > { %v5276_v50 = vpop.eup %3863  ;;  %3883 = vpow2.f32 %v2036_v19  ;;  %v2024_v61 = vmul.f32 1.442695, %v1906_v8  ;;  %v2026_v16 = vmul.f32 1.442695, %v1907_v31  ;;  %v2116_v1 = vadd.f32 %v5270_v22, %v5266_v57  ;;  %v3275_v20 = vpop.f32.mrb[24].mxu1 }
 0x288   : > { %v5280_v53 = vpop.eup %3865  ;;  %3885 = vpow2.f32 %v2038_v27  ;;  %2105 = vadd.xlane.f32.xlu1 %v2104_v35  ;;  %v1845_v13 = vpop.xlane.xlu0 %1844  ;;  %2102 = vadd.xlane.f32.xlu0 %v2101_v42  ;;  %v2158_v26 = vpack.c.bf16 %v5256_v36, %v5212_v40 }
 0x289   : > { %v5288_v5 = vpop.eup %3867  ;;  %3887 = vpow2.f32 %v2024_v61  ;;  %2309 = vmatmul.mubr.bf16.gmra.mrb[108].mxu1 %v2154_v47  ;;  %v1910_v45 = vsub.f32 %v5006_v56, %v1845_v13  ;;  %v1911_v38 = vsub.f32 %v5010_v11, %v1845_v13  ;;  %v2107_v48 = vadd.f32 %v5280_v53, %v5276_v50  ;;  %v1006_v28 = vpop.xlane.xlu1 %1005  ;;  %v6254_v47 = vld [vmem:[#allocation18_spill] sm:$0xff] }
 0x28a   : > { %v5294_v12 = vpop.eup %3869  ;;  %3889 = vpow2.f32 %v2026_v16  ;;  %2316 = vmatprep.mubr.bf16.mxu1 %v2157_v9  ;;  %v2161_v39 = vpack.c.bf16 %v5280_v53, %v5232_v3  ;;  %v2160_v56 = vpack.c.bf16 %v5276_v50, %v5228_v49  ;;  %v3276_v11 = vpop.f32.mrb[25].mxu1 }
 0x28b   : > { %v5302_v23 = vpop.eup %3871  ;;  %3891 = vrcp.f32 %v1000_v44  ;;  %v2032_v63 = vmul.f32 1.442695, %v1910_v45  ;;  %v2034_v37 = vmul.f32 1.442695, %v1911_v38  ;;  %v5306_v52 = vadd.f32 %v5294_v12, %v5288_v5  ;;  %v3278_v15 = vpop.f32.mrb[26].mxu1  ;;  %v6255_v38 = vld [vmem:[#allocation68_spill] sm:$0xff] }
 0x28c   : > { %v5308_v59 = vpop.eup %3873  ;;  %v5310_v35 = vadd.f32 %v3276_v11, %v3275_v20  ;;  %3893 = vrcp.f32 %v1006_v28  ;;  %2111 = vadd.xlane.f32.xlu1 %v2110_v7  ;;  %v1851_v29 = vpop.xlane.xlu0 %1850  ;;  %v2162_v62 = vpack.c.bf16 %v5302_v23, %v5246_v2  ;;  %2108 = vadd.xlane.f32.xlu0 %v2107_v48  ;;  %v6256_v11 = vld [vmem:[#allocation71_spill] sm:$0xff] }
 0x28d   : > { %v5314_v58 = vpop.eup %3875  ;;  %3895 = vpow2.f32 %v2032_v63  ;;  %v3279_v17 = vpop.f32.mrb[27].mxu1  ;;  %v1914_v41 = vsub.f32 %v6253_v21, %v1851_v29  ;;  %v1915_v25 = vsub.f32 %v6254_v47, %v1851_v29  ;;  %v2113_v6 = vadd.f32 %v5308_v59, %v5302_v23  ;;  %v6260_v23 = vld [vmem:[#allocation49_spill] sm:$0xff] }
 0x28e   : > { %v5320_v33 = vpop.eup %3877  ;;  %3897 = vpow2.f32 %v2034_v37  ;;  %v5322_v43 = vadd.f32 %v3279_v17, %v3278_v15  ;;  %v1012_v32 = vpop.xlane.xlu1 %1011  ;;  %v2163_v10 = vpack.c.bf16 %v5308_v59, %v5250_v34 }
 0x28f   : > { %v5326_v46 = vpop.eup %3879  ;;  %v2040_v4 = vmul.f32 1.442695, %v1914_v41  ;;  %v2042_v24 = vmul.f32 1.442695, %v1915_v25  ;;  %3899 = vrcp.f32 %v1012_v32  ;;  %v5330_v0 = vadd.f32 %v5320_v33, %v5314_v58  ;;  %v3281_v42 = vpop.f32.mrb[28].mxu1 }
 0x290   : > { %v5332_v9 = vpop.eup %3881  ;;  %2117 = vadd.xlane.f32.xlu1 %v2116_v1  ;;  %v1003_v60 = vpop.xlane.xlu0 %1002  ;;  %v2164_v19 = vpack.c.bf16 %v5326_v46, %v5266_v57  ;;  %2114 = vadd.xlane.f32.xlu0 %v2113_v6 }
 0x291   : > { %v5336_v8 = vpop.eup %3883  ;;  %3901 = vpow2.f32 %v2040_v4  ;;  %2317 = vmatmul.mubr.bf16.gmra.mrb[112].mxu1 %v2156_v18  ;;  %v2119_v31 = vadd.f32 %v5332_v9, %v5326_v46  ;;  %v2165_v27 = vpack.c.bf16 %v5332_v9, %v5270_v22  ;;  %v3282_v7 = vpop.f32.mrb[29].mxu1 }
 0x292   : > { %v5342_v44 = vpop.eup %3885  ;;  %3903 = vpow2.f32 %v2042_v24  ;;  %2324 = vmatprep.mubr.bf16.mxu1 %v2159_v14  ;;  %v1018_v61 = vpop.xlane.xlu1 %1017  ;;  %v3283_v18 = vadd.f32 %v3282_v7, %v3281_v42 }
 0x293   : > { %v5344_v16 = vpop.eup %3887  ;;  %3905 = vrcp.f32 %v1003_v60  ;;  %v5348_v13 = vadd.f32 %v5342_v44, %v5336_v8  ;;  %v3284_v45 = vpop.f32.mrb[30].mxu1 }
 0x294   : > { %v5350_v1 = vpop.eup %3889  ;;  %3907 = vrcp.f32 %v1018_v61  ;;  %1071 = vadd.xlane.f32.xlu1 %v6255_v38  ;;  %v1009_v48 = vpop.xlane.xlu0 %1008  ;;  %v2166_v14 = vpack.c.bf16 %v5344_v16, %v5288_v5  ;;  %1074 = vadd.xlane.f32.xlu0 %v6256_v11  ;;  %v6257_v61 = vld [vmem:[#allocation45_spill] sm:$0xff] }
 0x295   : > { %v3892_v20 = vpop.eup %3891  ;;  %v3285_v28 = vpop.f32.mrb[31].mxu1  ;;  %3909 = vrcp.f32 %v1009_v48  ;;  %v2125_v63 = vadd.f32 %v5350_v1, %v5344_v16  ;;  %v2167_v37 = vpack.c.bf16 %v5350_v1, %v5294_v12 }
 0x296   : > { %v3894_v15 = vpop.eup %3893  ;;  %v5360_v29 = vadd.f32 %v3285_v28, %v3284_v45  ;;  %v1024_v17 = vpop.xlane.xlu1 %1023  ;;  %v5363_v21 = vmul.f32 %v3892_v20, %v5223_v30 }
 0x297   : > { %v5365_v41 = vpop.eup %3895  ;;  %3911 = vrcp.f32 %v1024_v17  ;;  %v5368_v47 = vmul.f32 %v3894_v15, %v5261_v54  ;;  %v3287_v24 = vpop.f32.mrb[32].mxu1 }
 0x298   : > { %v5370_v25 = vpop.eup %3897  ;;  %2123 = vadd.xlane.f32.xlu1 %v5306_v52  ;;  %v1015_v6 = vpop.xlane.xlu0 %1014  ;;  %v2168_v32 = vpack.c.bf16 %v5365_v41, %v5314_v58  ;;  %2120 = vadd.xlane.f32.xlu0 %v2119_v31 }
 0x299   : > { %v3900_v4 = vpop.eup %3899  ;;  %2325 = vmatmul.mubr.bf16.gmra.mrb[116].mxu1 %v2158_v26  ;;  %3913 = vrcp.f32 %v1015_v6  ;;  %v2131_v30 = vadd.f32 %v5370_v25, %v5365_v41  ;;  %v2169_v54 = vpack.c.bf16 %v5370_v25, %v5320_v33  ;;  %v3288_v40 = vpop.f32.mrb[33].mxu1 }
 0x29a   : > { %2332 = vmatprep.mubr.bf16.mxu1 %v2161_v39  ;;  %v1030_v52 = vpop.xlane.xlu1 %1029  ;;  %v5386_v60 = vmul.f32 %v3900_v4, %v5310_v35  ;;  %v3289_v26 = vadd.f32 %v3288_v40, %v3287_v24  ;;  %v3290_v42 = vpop.f32.mrb[34].mxu1  ;;  %v6258_v39 = vld [vmem:[#allocation6_spill] sm:$0xff] }
 0x29b   : > { %v5388_v31 = vpop.eup %3901  ;;  %3915 = vrcp.f32 %v1030_v52  ;;  %v3291_v53 = vpop.f32.mrb[35].mxu1 }
 0x29c   : > { %v5390_v36 = vpop.eup %3903  ;;  %1077 = vadd.xlane.f32.xlu1 %v6257_v61  ;;  %v1021_v7 = vpop.xlane.xlu0 %1020  ;;  %v2170_v45 = vpack.c.bf16 %v5388_v31, %v5336_v8  ;;  %1080 = vadd.xlane.f32.xlu0 %v6258_v39  ;;  %v3292_v20 = vadd.f32 %v3291_v53, %v3290_v42 }
 0x29d   : > { %v3906_v3 = vpop.eup %3905  ;;  %3917 = vrcp.f32 %v1021_v7  ;;  %v2137_v35 = vadd.f32 %v5390_v36, %v5388_v31  ;;  %v2171_v38 = vpack.c.bf16 %v5390_v36, %v5342_v44 }
 0x29e   : > { %v3908_v48 = vpop.eup %3907  ;;  %v1036_v28 = vpop.xlane.xlu1 %1035  ;;  %v5401_v11 = vmul.f32 %v3906_v3, %v5234_v51  ;;  %v6259_v3 = vld [vmem:[#allocation82_spill] sm:$0xff] }
 0x29f   : > { %v3910_v15 = vpop.eup %3909  ;;  %v5403_v17 = vmul.f32 %v3908_v48, %v3283_v18  ;;  %3919 = vrcp.f32 %v1036_v28  ;;  %v3293_v18 = vpop.f32.mrb[36].mxu1 }
 0x2a0   : > { %2129 = vadd.xlane.f32.xlu1 %v5330_v0  ;;  %v1027_v6 = vpop.xlane.xlu0 %1026  ;;  %v5409_v24 = vmul.f32 %v3910_v15, %v5272_v55  ;;  %2126 = vadd.xlane.f32.xlu0 %v2125_v63  ;;  %v3294_v55 = vpop.f32.mrb[37].mxu1 }
 0x2a1   : > { %v3912_v52 = vpop.eup %3911  ;;  %2333 = vmatmul.mubr.bf16.gmra.mrb[120].mxu1 %v2160_v56  ;;  %3921 = vrcp.f32 %v1027_v6  ;;  %v3295_v42 = vadd.f32 %v3294_v55, %v3293_v18  ;;  %v3296_v61 = vpop.f32.mrb[38].mxu1 }
 0x2a2   : > { %v5414_v51 = vmul.f32 %v3912_v52, %v3289_v26  ;;  %2340 = vmatprep.mubr.bf16.mxu1 %v2163_v10  ;;  %v3297_v56 = vpop.f32.mrb[39].mxu1  ;;  %v1042_v7 = vpop.xlane.xlu1 %1041 }
 0x2a3   : > { %v3914_v40 = vpop.eup %3913  ;;  %v3298_v34 = vadd.f32 %v3297_v56, %v3296_v61 }
 0x2a4   : > { %2135 = vadd.xlane.f32.xlu1 %v5348_v13  ;;  %v1033_v63 = vpop.xlane.xlu0 %1032  ;;  %v5423_v49 = vmul.f32 %v3914_v40, %v5322_v43  ;;  %2132 = vadd.xlane.f32.xlu0 %v2131_v30 }
 0x2a5   : > { %v3916_v50 = vpop.eup %3915  ;;  %3923 = vrcp.f32 %v1033_v63 }
 0x2a6   : > { %v5425_v26 = vmul.f32 %v3916_v50, %v3295_v42 }
 0x2a7   : > { %v3918_v10 = vpop.eup %3917  ;;  %v3299_v30 = vpop.f32.mrb[40].mxu1 }
 0x2a8   : > { %1083 = vadd.xlane.f32.xlu1 %v6259_v3  ;;  %v1039_v53 = vpop.xlane.xlu0 %1038  ;;  %v5431_v13 = vmul.f32 %v3918_v10, %v5360_v29  ;;  %2138 = vadd.xlane.f32.xlu0 %v2137_v35  ;;  %v3300_v28 = vpop.f32.mrb[41].mxu1 }
 0x2a9   : > { %2341 = vmatmul.mubr.bf16.gmra.mrb[124].mxu1 %v2162_v62  ;;  %3925 = vrcp.f32 %v1039_v53  ;;  %v3920_v43 = vpop.eup %3919  ;;  %v3301_v29 = vadd.f32 %v3300_v28, %v3299_v30  ;;  %v3302_v15 = vpop.f32.mrb[42].mxu1 }
 0x2aa   : > { %2348 = vmatprep.mubr.bf16.mxu1 %v2165_v27  ;;  %3927 = vrcp.f32 %v1042_v7  ;;  %v3303_v2 = vpop.f32.mrb[43].mxu1  ;;  %v1048_v27 = vpop.xlane.xlu1 %1047 }
 0x2ab   : > { %v3922_v48 = vpop.eup %3921  ;;  %v5444_v62 = vmul.f32 %v3920_v43, %v3301_v29  ;;  %v3304_v52 = vadd.f32 %v3303_v2, %v3302_v15 }
 0x2ac   : > { %v1045_v35 = vpop.xlane.xlu0 %1044  ;;  %v5441_v6 = vmul.f32 %v3922_v48, %v3292_v20  ;;  %1086 = vadd.xlane.f32.xlu0 %v6260_v23 }
 0x2ad   : > { %3929 = vrcp.f32 %v1045_v35 }
 0x2ae   : > { %3931 = vrcp.f32 %v1048_v27  ;;  %v1054_v46 = vpop.xlane.xlu1 %1053 }
 0x2af   : > { %v3924_v9 = vpop.eup %3923  ;;  %v3305_v20 = vpop.f32.mrb[44].mxu1 }
 0x2b0   : > { %v1051_v18 = vpop.xlane.xlu0 %1050  ;;  %v5448_v40 = vmul.f32 %v3924_v9, %v3298_v34  ;;  %v3306_v61 = vpop.f32.mrb[45].mxu1 }
 0x2b1   : > { %2349 = vmatmul.mubr.bf16.gmra.mrb[128].mxu1 %v2164_v19  ;;  %3933 = vrcp.f32 %v1051_v18  ;;  %v3307_v50 = vadd.f32 %v3306_v61, %v3305_v20  ;;  %v3308_v56 = vpop.f32.mrb[46].mxu1 }
 0x2b2   : > { %2356 = vmatprep.mubr.bf16.mxu1 %v2167_v37  ;;  %v3309_v10 = vpop.f32.mrb[47].mxu1  ;;  %3935 = vrcp.f32 %v1054_v46 }
 0x2b3   : > { %v3926_v42 = vpop.eup %3925  ;;  %v3310_v12 = vadd.f32 %v3309_v10, %v3308_v56 }
 0x2b4   : > { %v5458_v63 = vmul.f32 %v3926_v42, %v3304_v52  ;;  %v3928_v34 = vpop.eup %3927  ;;  %v1057_v37 = vpop.xlane.xlu0 %1056 }
 0x2b5   : > { %v5462_v19 = vmul.f32 %v3928_v34, %v3307_v50  ;;  %3937 = vrcp.f32 %v1057_v37 }
 0x2b6   : > { %v5471_v43 = vpop.xlane.xlu1 %2045 }
 0x2b7   : > { %v3930_v1 = vpop.eup %3929  ;;  %v3311_v53 = vpop.f32.mrb[48].mxu1 }
 0x2b8   : > { %v5464_v7 = vmul.f32 %v3930_v1, %v3310_v12  ;;  %v3312_v30 = vpop.f32.mrb[49].mxu1  ;;  %v5476_v48 = vpop.xlane.xlu0 %2048 }
 0x2b9   : > { %2357 = vmatmul.mubr.bf16.gmra.mrb[132].mxu1 %v2166_v14  ;;  %v3932_v28 = vpop.eup %3931  ;;  %v3313_v29 = vadd.f32 %v3312_v30, %v3311_v53  ;;  %v3314_v15 = vpop.f32.mrb[50].mxu1 }
 0x2ba   : > { %2364 = vmatprep.mubr.bf16.mxu1 %v2169_v54  ;;  %v3315_v5 = vpop.f32.mrb[51].mxu1 }
 0x2bb   : > { %v3934_v35 = vpop.eup %3933  ;;  %v5478_v16 = vmul.f32 %v3932_v28, %v3313_v29  ;;  %v3316_v14 = vadd.f32 %v3315_v5, %v3314_v15 }
 0x2bc   : > { %v5480_v2 = vpop.xlane.xlu1 %2051  ;;  %v5482_v23 = vpop.xlane.xlu0 %2054 }
 0x2bd   : > { %v5484_v52 = vmul.f32 %v3934_v35, %v3316_v14  ;;  %v3936_v42 = vpop.eup %3935 }
 0x2bf   : > { %v3317_v25 = vpop.f32.mrb[52].mxu1  ;;  %v3938_v41 = vpop.eup %3937 }
 0x2c0   : > { %v3318_v54 = vpop.f32.mrb[53].mxu1  ;;  %v5494_v9 = vpop.xlane.xlu1 %2057 }
 0x2c1   : > { %2365 = vmatmul.mubr.bf16.gmra.mrb[136].mxu1 %v2168_v32  ;;  %v3319_v27 = vadd.f32 %v3318_v54, %v3317_v25  ;;  %v3320_v18 = vpop.f32.mrb[54].mxu1  ;;  %v1063_v20 = vpop.xlane.xlu0 %1062 }
 0x2c2   : > { %2372 = vmatprep.mubr.bf16.mxu1 %v2171_v38  ;;  %v3321_v61 = vpop.f32.mrb[55].mxu1  ;;  %3939 = vrcp.f32 %v1063_v20 }
 0x2c3   : > { %v5496_v50 = vmul.f32 %v3936_v42, %v3319_v27  ;;  %v3322_v58 = vadd.f32 %v3321_v61, %v3320_v18 }
 0x2c4   : > { %v1060_v32 = vpop.xlane.xlu1 %1059 }
 0x2c5   : > { %v5498_v56 = vmul.f32 %v3938_v41, %v3322_v58  ;;  %3941 = vrcp.f32 %v1060_v32  ;;  %v5500_v34 = vpop.xlane.xlu0 %2060 }
 0x2c7   : > { %v3323_v36 = vpop.f32.mrb[56].mxu1 }
 0x2c8   : > { %v3324_v38 = vpop.f32.mrb[57].mxu1  ;;  %v5507_v10 = vpop.xlane.xlu1 %2063 }
 0x2c9   : > { %2373 = vmatmul.mubr.bf16.gmra.mrb[140].mxu1 %v2170_v45  ;;  %v3325_v46 = vadd.f32 %v3324_v38, %v3323_v36  ;;  %v3326_v12 = vpop.f32.mrb[58].mxu1  ;;  %v1069_v1 = vpop.xlane.xlu0 %1068 }
 0x2ca   : > { %v3327_v37 = vpop.f32.mrb[59].mxu1  ;;  %3943 = vrcp.f32 %v1069_v1 }
 0x2cb   : > { %v3328_v53 = vadd.f32 %v3327_v37, %v3326_v12 }
 0x2cc   : > { %v3940_v30 = vpop.eup %3939  ;;  %v1066_v28 = vpop.xlane.xlu1 %1065 }
 0x2cd   : > { %v5509_v29 = vmul.f32 %v3940_v30, %v3328_v53  ;;  %3945 = vrcp.f32 %v1066_v28 }
 0x2ce   : > { %3947 = vrcp.f32 %v5471_v43  ;;  %v3641_v43 = vld [vmem:[%s5933_s3 + $0x10] sm:$0xff]  }
 0x2cf   : > { %v3942_v8 = vpop.eup %3941  ;;  %v3329_v31 = vpop.f32.mrb[60].mxu1  ;;  %3949 = vrcp.f32 %v5476_v48 }
 0x2d0   : > { %v5511_v45 = vmul.f32 %v3942_v8, %v3325_v46  ;;  %v3330_v15 = vpop.f32.mrb[61].mxu1  ;;  %3951 = vrcp.f32 %v5480_v2 }
 0x2d1   : > { %v3331_v35 = vadd.f32 %v3330_v15, %v3329_v31  ;;  %v3332_v5 = vpop.f32.mrb[62].mxu1  ;;  %3953 = vrcp.f32 %v5482_v23  ;;  %v3642_v23 = vld [vmem:[%s5933_s3 + $0x18] sm:$0xff]  }
 0x2d2   : > { %v3333_v25 = vpop.f32.mrb[63].mxu1  ;;  %3955 = vrcp.f32 %v5494_v9 }
 0x2d3   : > { %v3334_v54 = vadd.f32 %v3333_v25, %v3332_v5  ;;  %3957 = vrcp.f32 %v5500_v34 }
 0x2d4   : > { %v3944_v27 = vpop.eup %3943  ;;  %3959 = vrcp.f32 %v5507_v10 }
 0x2d5   : > { %v5515_v18 = vmul.f32 %v3944_v27, %v3334_v54 }
 0x2d7   : > { %v3946_v20 = vpop.eup %3945  ;;  %v3335_v42 = vpop.f32.mrb[64].mxu1 }
 0x2d8   : > { %v5517_v61 = vmul.f32 %v3946_v20, %v3331_v35  ;;  %v3336_v58 = vpop.f32.mrb[65].mxu1 }
 0x2d9   : > { %v5519_v41 = vadd.f32 %v3336_v58, %v3335_v42  ;;  %v3338_v32 = vpop.f32.mrb[66].mxu1 }
 0x2da   : > { %6261 = vst [vmem:[#allocation19_spill] sm:$0xff] %v5517_v61  ;;  %v3339_v38 = vpop.f32.mrb[67].mxu1 }
 0x2db   : > { %v5523_v46 = vadd.f32 %v3339_v38, %v3338_v32  ;;  %v3639_v38 = vld [vmem:[%s5933_s3] sm:$0xff]  }
 0x2dc   : > { %3491 = vmatprep.subr.bf16.mxu0 %v3639_v38 }
 0x2dd   : > { %3492 = vmatpush3.bf16.msra.mxu0 %v3639_v38 }
 0x2df   : > { %v3341_v12 = vpop.f32.mrb[68].mxu1 }
 0x2e0   : > { %v3342_v1 = vpop.f32.mrb[69].mxu1 }
 0x2e1   : > { %v5525_v37 = vadd.f32 %v3342_v1, %v3341_v12  ;;  %v3344_v53 = vpop.f32.mrb[70].mxu1  ;;  %v2067_v1 = vpop.xlane.xlu0 %2066 }
 0x2e2   : > { %v3345_v30 = vpop.f32.mrb[71].mxu1  ;;  %3961 = vrcp.f32 %v2067_v1 }
 0x2e3   : > { %v5527_v28 = vadd.f32 %v3345_v30, %v3344_v53 }
 0x2e7   : > { %v3347_v8 = vpop.f32.mrb[72].mxu1 }
 0x2e8   : > { %v3348_v31 = vpop.f32.mrb[73].mxu1 }
 0x2e9   : > { %v5529_v15 = vadd.f32 %v3348_v31, %v3347_v8  ;;  %v3350_v35 = vpop.f32.mrb[74].mxu1 }
 0x2ea   : > { %v3351_v5 = vpop.f32.mrb[75].mxu1 }
 0x2eb   : > { %v5531_v25 = vadd.f32 %v3351_v5, %v3350_v35  ;;  %v3640_v35 = vld [vmem:[%s5933_s3 + $0x8] sm:$0xff]  }
 0x2ec   : > { %3493 = vmatprep.subr.bf16.mxu0 %v3640_v35 }
 0x2ed   : > { %3494 = vmatpush3.bf16.msra.mxu0 %v3640_v35 }
 0x2ee   : > { %3495 = vmatprep.subr.bf16.mxu0 %v3641_v43 }
 0x2ef   : > { %v3353_v54 = vpop.f32.mrb[76].mxu1 }
 0x2f0   : > { %v3354_v27 = vpop.f32.mrb[77].mxu1 }
 0x2f1   : > { %v5533_v20 = vadd.f32 %v3354_v27, %v3353_v54  ;;  %v3356_v42 = vpop.f32.mrb[78].mxu1  ;;  %3496 = vmatpush3.bf16.msra.mxu0 %v3641_v43 }
 0x2f2   : > { %v3357_v58 = vpop.f32.mrb[79].mxu1  ;;  %3497 = vmatprep.subr.bf16.mxu0 %v3642_v23 }
 0x2f3   : > { %v5535_v32 = vadd.f32 %v3357_v58, %v3356_v42  ;;  %v3948_v58 = vpop.eup %3947 }
 0x2f4   : > { %v3950_v36 = vpop.eup %3949 }
 0x2f5   : > { %3498 = vmatpush3.bf16.msra.mxu0 %v3642_v23 }
 0x2f7   : > { %v5546_v30 = vpop.xlane.xlu0 %2072 }
 0x2fd   : > { %v5541_v12 = vpop.xlane.xlu1 %2069 }
 0x300   : > { %v3375_v8 = vpop.f32.mrb[80].mxu1 }
 0x301   : > { %v5544_v53 = vpop.xlane.xlu1 %2075  ;;  %v3376_v31 = vpop.f32.mrb[81].mxu1 }
 0x302   : > { %v3377_v5 = vadd.f32 %v3376_v31, %v3375_v8  ;;  %v3378_v54 = vpop.f32.mrb[82].mxu1 }
 0x303   : > { %v3379_v42 = vpop.f32.mrb[83].mxu1 }
 0x304   : > { %v3380_v38 = vadd.f32 %v3379_v42, %v3378_v54  ;;  %v2413_v14 = vmul.f32 %v3948_v58, %v3377_v5 }
 0x305   : > { %v5555_v48 = vpop.xlane.xlu1 %2081  ;;  %v5558_v27 = vpop.xlane.xlu0 %2078 }
 0x306   : > { %v2414_v44 = vmul.f32 %v3950_v36, %v3380_v38 }
 0x308   : > { %v2445_v3 = vpack.c.bf16 %v2414_v44, %v2413_v14  ;;  %v3381_v8 = vpop.f32.mrb[84].mxu1  ;;  %v3952_v14 = vpop.eup %3951 }
 0x309   : > { %v5560_v33 = vpop.xlane.xlu1 %2087  ;;  %v5562_v2 = vpop.xlane.xlu0 %2084 }
 0x30a   : > { %v3382_v31 = vpop.f32.mrb[85].mxu1  ;;  %2477 = vrot.lane.b32.xlu1 %v2445_v3, %s4109_s13  ;;  %v3954_v5 = vpop.eup %3953 }
 0x30b   : > { %v3383_v35 = vadd.f32 %v3382_v31, %v3381_v8  ;;  %v3384_v42 = vpop.f32.mrb[86].mxu1 }
 0x30c   : > { %v3385_v44 = vpop.f32.mrb[87].mxu1 }
 0x30d   : > { %v5568_v54 = vpop.xlane.xlu1 %2093  ;;  %v5572_v36 = vpop.xlane.xlu0 %2090  ;;  %v3386_v43 = vadd.f32 %v3385_v44, %v3384_v42  ;;  %v2415_v58 = vmul.f32 %v3952_v14, %v3383_v35 }
 0x30e   : > { %v3956_v42 = vpop.eup %3955 }
 0x30f   : > { %v2416_v38 = vmul.f32 %v3954_v5, %v3386_v43  ;;  %v3958_v14 = vpop.eup %3957 }
 0x310   : > { %v3387_v31 = vpop.f32.mrb[88].mxu1 }
 0x311   : > { %v5574_v9 = vpop.xlane.xlu1 %2099  ;;  %v5576_v57 = vpop.xlane.xlu0 %2096  ;;  %v2446_v8 = vpack.c.bf16 %v2416_v38, %v2415_v58 }
 0x312   : > { %v3388_v55 = vpop.f32.mrb[89].mxu1 }
 0x313   : > { %v3389_v34 = vadd.f32 %v3388_v55, %v3387_v31  ;;  %v3390_v22 = vpop.f32.mrb[90].mxu1  ;;  %2479 = vrot.lane.b32.xlu0 %v2446_v8, %s4109_s13 }
 0x314   : > { %v3391_v35 = vpop.f32.mrb[91].mxu1 }
 0x315   : > { %v5579_v3 = vpop.xlane.xlu1 %2105  ;;  %v5582_v23 = vpop.xlane.xlu0 %2102  ;;  %v3392_v44 = vadd.f32 %v3391_v35, %v3390_v22  ;;  %v2417_v43 = vmul.f32 %v3956_v42, %v3389_v34 }
 0x316   : > { %v3960_v22 = vpop.eup %3959 }
 0x317   : > { %v2418_v5 = vmul.f32 %v3958_v14, %v3392_v44  ;;  %v3962_v34 = vpop.eup %3961 }
 0x318   : > { %v3393_v39 = vpop.f32.mrb[92].mxu1 }
 0x319   : > { %v5584_v58 = vpop.xlane.xlu1 %2111  ;;  %v5586_v38 = vpop.xlane.xlu0 %2108  ;;  %v2447_v10 = vpack.c.bf16 %v2418_v5, %v2417_v43 }
 0x31a   : > { %v3394_v59 = vpop.f32.mrb[93].mxu1 }
 0x31b   : > { %v3395_v31 = vadd.f32 %v3394_v59, %v3393_v39  ;;  %v3396_v8 = vpop.f32.mrb[94].mxu1  ;;  %2481 = vrot.lane.b32.xlu1 %v2447_v10, %s4109_s13 }
 0x31c   : > { %v3397_v0 = vpop.f32.mrb[95].mxu1 }
 0x31d   : > { %v5588_v55 = vpop.xlane.xlu1 %2117  ;;  %v5591_v1 = vpop.xlane.xlu0 %2114  ;;  %v3398_v35 = vadd.f32 %v3397_v0, %v3396_v8  ;;  %v2419_v42 = vmul.f32 %v3960_v22, %v3395_v31 }
 0x31f   : > { %v2420_v44 = vmul.f32 %v3962_v34, %v3398_v35 }
 0x321   : > { %v1072_v14 = vpop.xlane.xlu1 %1071  ;;  %v1075_v4 = vpop.xlane.xlu0 %1074  ;;  %v2448_v43 = vpack.c.bf16 %v2420_v44, %v2419_v42 }
 0x322   : > { %3963 = vrcp.f32 %v1072_v14 }
 0x323   : > { %3965 = vrcp.f32 %v1075_v4  ;;  %2483 = vrot.lane.b32.xlu0 %v2448_v43, %s4109_s13 }
 0x325   : > { %v5593_v5 = vpop.xlane.xlu1 %2123  ;;  %v5596_v59 = vpop.xlane.xlu0 %2120 }
 0x329   : > { %v1078_v39 = vpop.xlane.xlu1 %1077  ;;  %v1081_v10 = vpop.xlane.xlu0 %1080 }
 0x32a   : > { %3967 = vrcp.f32 %v1078_v39 }
 0x32b   : > { %3969 = vrcp.f32 %v1081_v10 }
 0x32c   : > { %v3964_v61 = vpop.eup %3963 }
 0x32d   : > { %v3966_v0 = vpop.eup %3965  ;;  %v5598_v8 = vpop.xlane.xlu1 %2129  ;;  %v5601_v31 = vmul.f32 %v3964_v61, %v5519_v41 }
 0x32e   : > { %v5603_v22 = vpop.xlane.xlu0 %2126  ;;  %v5606_v4 = vmul.f32 %v3966_v0, %v5523_v46 }
 0x32f   : > { %6262 = vst [vmem:[#allocation20_spill] sm:$0xff] %v5601_v31 }
 0x330   : > { %6263 = vst [vmem:[#allocation21_spill] sm:$0xff] %v5606_v4 }
 0x331   : > { %v5610_v34 = vpop.xlane.xlu1 %2135 }
 0x332   : > { %v5612_v42 = vpop.xlane.xlu0 %2132 }
 0x334   : > { %v3968_v44 = vpop.eup %3967 }
 0x335   : > { %v3970_v14 = vpop.eup %3969  ;;  %v5615_v43 = vmul.f32 %v3968_v44, %v5525_v37  ;;  %v1084_v39 = vpop.xlane.xlu1 %1083 }
 0x336   : > { %v5617_v61 = vpop.xlane.xlu0 %2138  ;;  %v5620_v41 = vmul.f32 %v3970_v14, %v5527_v28  ;;  %3971 = vrcp.f32 %v1084_v39 }
 0x337   : > { %6264 = vst [vmem:[#allocation22_spill] sm:$0xff] %v5615_v43 }
 0x338   : > { %6265 = vst [vmem:[#allocation57_spill] sm:$0xff] %v5620_v41 }
 0x33a   : > { %v1087_v10 = vpop.xlane.xlu0 %1086 }
 0x33b   : > { %3973 = vrcp.f32 %v1087_v10 }
 0x33c   : > { %3975 = vrcp.f32 %v5546_v30 }
 0x33d   : > { %3977 = vrcp.f32 %v5541_v12 }
 0x33e   : > { %3979 = vrcp.f32 %v5544_v53 }
 0x33f   : > { %3981 = vrcp.f32 %v5558_v27 }
 0x340   : > { %v3972_v0 = vpop.eup %3971  ;;  %3983 = vrcp.f32 %v5555_v48 }
 0x341   : > { %v5628_v28 = vmul.f32 %v3972_v0, %v5529_v15  ;;  %3985 = vrcp.f32 %v5562_v2 }
 0x342   : > { %3987 = vrcp.f32 %v5560_v33 }
 0x343   : > { %v3399_v35 = vpop.f32.mrb[96].mxu1  ;;  %6266 = vst [vmem:[#allocation23_spill] sm:$0xff] %v5628_v28  ;;  %3989 = vrcp.f32 %v5572_v36 }
 0x344   : > { %v3400_v44 = vpop.f32.mrb[97].mxu1  ;;  %3991 = vrcp.f32 %v5568_v54 }
 0x345   : > { %v3974_v37 = vpop.eup %3973  ;;  %v3401_v31 = vadd.f32 %v3400_v44, %v3399_v35  ;;  %v3402_v4 = vpop.f32.mrb[98].mxu1  ;;  %3993 = vrcp.f32 %v5576_v57 }
 0x346   : > { %v5631_v14 = vmul.f32 %v3974_v37, %v5531_v25  ;;  %v3403_v39 = vpop.f32.mrb[99].mxu1  ;;  %v3976_v30 = vpop.eup %3975  ;;  %3995 = vrcp.f32 %v5574_v9 }
 0x347   : > { %v3404_v10 = vadd.f32 %v3403_v39, %v3402_v4  ;;  %v3978_v46 = vpop.eup %3977  ;;  %3997 = vrcp.f32 %v5582_v23 }
 0x348   : > { %v2421_v43 = vmul.f32 %v3978_v46, %v3401_v31  ;;  %v3980_v27 = vpop.eup %3979  ;;  %3999 = vrcp.f32 %v5579_v3 }
 0x349   : > { %v2422_v41 = vmul.f32 %v3976_v30, %v3404_v10  ;;  %v3982_v37 = vpop.eup %3981  ;;  %4001 = vrcp.f32 %v5586_v38 }
 0x34a   : > { %v3984_v30 = vpop.eup %3983  ;;  %4003 = vrcp.f32 %v5584_v58 }
 0x34b   : > { %v2449_v53 = vpack.c.bf16 %v2422_v41, %v2421_v43  ;;  %v3986_v10 = vpop.eup %3985  ;;  %4005 = vrcp.f32 %v5591_v1 }
 0x34c   : > { %v3405_v35 = vpop.f32.mrb[100].mxu1  ;;  %4007 = vrcp.f32 %v5588_v55  ;;  %v6268_v55 = vld [vmem:[#allocation10_spill] sm:$0xff] }
 0x34d   : > { %v3406_v44 = vpop.f32.mrb[101].mxu1  ;;  %2485 = vrot.lane.b32.xlu1 %v2449_v53, %s4109_s13  ;;  %4009 = vrcp.f32 %v5596_v59  ;;  %v6269_v59 = vld [vmem:[#allocation56_spill] sm:$0xff] }
 0x34e   : > { %v3407_v15 = vadd.f32 %v3406_v44, %v3405_v35  ;;  %v3408_v0 = vpop.f32.mrb[102].mxu1  ;;  %4011 = vrcp.f32 %v5593_v5 }
 0x34f   : > { %v3409_v25 = vpop.f32.mrb[103].mxu1  ;;  %4013 = vrcp.f32 %v5603_v22 }
 0x350   : > { %v3410_v4 = vadd.f32 %v3409_v25, %v3408_v0  ;;  %v2423_v39 = vmul.f32 %v3980_v27, %v3407_v15  ;;  %4015 = vrcp.f32 %v5598_v8 }
 0x351   : > { %4017 = vrcp.f32 %v5612_v42 }
 0x352   : > { %v2424_v12 = vmul.f32 %v3982_v37, %v3410_v4 }
 0x354   : > { %v2450_v28 = vpack.c.bf16 %v2424_v12, %v2423_v39  ;;  %v3411_v31 = vpop.f32.mrb[104].mxu1 }
 0x355   : > { %v3412_v46 = vpop.f32.mrb[105].mxu1 }
 0x356   : > { %v3413_v43 = vadd.f32 %v3412_v46, %v3411_v31  ;;  %v3414_v41 = vpop.f32.mrb[106].mxu1  ;;  %2487 = vrot.lane.b32.xlu0 %v2450_v28, %s4109_s13  ;;  %v3988_v28 = vpop.eup %3987  ;;  %4019 = vrcp.f32 %v5610_v34 }
 0x357   : > { %v3415_v48 = vpop.f32.mrb[107].mxu1  ;;  %v3990_v27 = vpop.eup %3989  ;;  %4021 = vrcp.f32 %v5617_v61 }
 0x358   : > { %v3416_v2 = vadd.f32 %v3415_v48, %v3414_v41  ;;  %v2425_v53 = vmul.f32 %v3984_v30, %v3413_v43  ;;  %v3992_v48 = vpop.eup %3991 }
 0x359   : > { %v3994_v30 = vpop.eup %3993 }
 0x35a   : > { %v2426_v35 = vmul.f32 %v3986_v10, %v3416_v2 }
 0x35c   : > { %v2451_v44 = vpack.c.bf16 %v2426_v35, %v2425_v53  ;;  %v3417_v15 = vpop.f32.mrb[108].mxu1 }
 0x35d   : > { %v3418_v0 = vpop.f32.mrb[109].mxu1 }
 0x35e   : > { %v3419_v12 = vadd.f32 %v3418_v0, %v3417_v15  ;;  %v3420_v25 = vpop.f32.mrb[110].mxu1  ;;  %2489 = vrot.lane.b32.xlu1 %v2451_v44, %s4109_s13  ;;  %v3996_v0 = vpop.eup %3995 }
 0x35f   : > { %v3421_v33 = vpop.f32.mrb[111].mxu1 }
 0x360   : > { %v3422_v36 = vadd.f32 %v3421_v33, %v3420_v25  ;;  %v2427_v4 = vmul.f32 %v3988_v28, %v3419_v12  ;;  %v3998_v25 = vpop.eup %3997 }
 0x362   : > { %v2428_v37 = vmul.f32 %v3990_v27, %v3422_v36 }
 0x364   : > { %v2452_v39 = vpack.c.bf16 %v2428_v37, %v2427_v4  ;;  %v3423_v31 = vpop.f32.mrb[112].mxu1 }
 0x365   : > { %v3424_v46 = vpop.f32.mrb[113].mxu1 }
 0x366   : > { %v3425_v43 = vadd.f32 %v3424_v46, %v3423_v31  ;;  %v3426_v41 = vpop.f32.mrb[114].mxu1  ;;  %2491 = vrot.lane.b32.xlu0 %v2452_v39, %s4109_s13  ;;  %v4000_v39 = vpop.eup %3999 }
 0x367   : > { %v3427_v54 = vpop.f32.mrb[115].mxu1  ;;  %v4002_v46 = vpop.eup %4001 }
 0x368   : > { %v3428_v57 = vadd.f32 %v3427_v54, %v3426_v41  ;;  %v5648_v2 = vmul.f32 %v3992_v48, %v3425_v43 }
 0x36a   : > { %v5650_v10 = vmul.f32 %v3994_v30, %v3428_v57 }
 0x36c   : > { %v2453_v53 = vpack.c.bf16 %v5650_v10, %v5648_v2  ;;  %v3429_v35 = vpop.f32.mrb[116].mxu1 }
 0x36d   : > { %v3430_v44 = vpop.f32.mrb[117].mxu1 }
 0x36e   : > { %v3431_v9 = vadd.f32 %v3430_v44, %v3429_v35  ;;  %v3432_v15 = vpop.f32.mrb[118].mxu1 }
 0x36f   : > { %v3433_v23 = vpop.f32.mrb[119].mxu1 }
 0x370   : > { %v3434_v12 = vadd.f32 %v3433_v23, %v3432_v15  ;;  %v5656_v33 = vmul.f32 %v3996_v0, %v3431_v9  ;;  %v4004_v9 = vpop.eup %4003  ;;  %v6267_v15 = vpack.c.bf16 %v5401_v11, %v5363_v21 }
 0x371   : > { %v4006_v0 = vpop.eup %4005 }
 0x372   : > { %v5658_v28 = vmul.f32 %v3998_v25, %v3434_v12 }
 0x374   : > { %v2454_v36 = vpack.c.bf16 %v5658_v28, %v5656_v33  ;;  %v3435_v27 = vpop.f32.mrb[120].mxu1 }
 0x375   : > { %v3436_v4 = vpop.f32.mrb[121].mxu1 }
 0x376   : > { %v3437_v3 = vadd.f32 %v3436_v4, %v3435_v27  ;;  %v3438_v37 = vpop.f32.mrb[122].mxu1 }
 0x377   : > { %v3439_v38 = vpop.f32.mrb[123].mxu1 }
 0x378   : > { %v3440_v31 = vadd.f32 %v3439_v38, %v3438_v37  ;;  %v2433_v43 = vmul.f32 %v4000_v39, %v3437_v3  ;;  %v4008_v39 = vpop.eup %4007 }
 0x37a   : > { %v2434_v41 = vmul.f32 %v4002_v46, %v3440_v31  ;;  %v6270_v46 = vpack.c.bf16 %v5409_v24, %v5368_v47  ;;  %v6271_v24 = vpack.c.bf16 %v5423_v49, %v5386_v60 }
 0x37c   : > { %v2455_v54 = vpack.c.bf16 %v2434_v41, %v2433_v43  ;;  %v3441_v48 = vpop.f32.mrb[124].mxu1  ;;  %v2478_v44 = vpop.permute.xlu1 %2477 }
 0x37d   : > { %v3442_v57 = vpop.f32.mrb[125].mxu1  ;;  %v2511_v23 = vsel %vm468_vm0, %v6267_v15, %v2478_v44  ;;  %v4010_v41 = vpop.eup %4009 }
 0x37e   : > { %v3443_v30 = vadd.f32 %v3442_v57, %v3441_v48  ;;  %v3444_v35 = vpop.f32.mrb[126].mxu1  ;;  %3499 = vmatprep.mubr.msk.bf16.mxu0 %vm2595_vm1, %v2511_v23 }
 0x37f   : > { %v3445_v58 = vpop.f32.mrb[127].mxu1 }
 0x380   : > { %v3446_v1 = vadd.f32 %v3445_v58, %v3444_v35  ;;  %v2435_v12 = vmul.f32 %v4004_v9, %v3443_v30 }
 0x382   : > { %v2436_v25 = vmul.f32 %v4006_v0, %v3446_v1  ;;  %1089 = vadd.xlane.f32.xlu1 %v6268_v55  ;;  %v4012_v1 = vpop.eup %4011 }
 0x383   : > { %v4014_v23 = vpop.eup %4013 }
 0x384   : > { %v2456_v27 = vpack.c.bf16 %v2436_v25, %v2435_v12  ;;  %v3447_v4 = vpop.f32.mrb[128].mxu1 }
 0x385   : > { %v3448_v3 = vpop.f32.mrb[129].mxu1  ;;  %1092 = vadd.xlane.f32.xlu0 %v6269_v59  ;;  %v2480_v11 = vpop.permute.xlu0 %2479 }
 0x386   : > { %v3449_v37 = vadd.f32 %v3448_v3, %v3447_v4  ;;  %v3450_v38 = vpop.f32.mrb[130].mxu1  ;;  %v2514_v43 = vsel %vm468_vm0, %v6270_v46, %v2480_v11  ;;  %v4016_v3 = vpop.eup %4015 }
 0x387   : > { %v3451_v21 = vpop.f32.mrb[131].mxu1  ;;  %3500 = vmatmul.mubr.msk.bf16.vlgmr.msra.gmra.mrb[112].mxu0 %vm2595_vm1, %v2514_v43  ;;  %v4018_v10 = vpop.eup %4017 }
 0x388   : > { %v3452_v31 = vadd.f32 %v3451_v21, %v3450_v38  ;;  %v2437_v48 = vmul.f32 %v4008_v39, %v3449_v37  ;;  %v6272_v37 = vpack.c.bf16 %v5431_v13, %v5403_v17  ;;  %v4020_v13 = vpop.eup %4019 }
 0x38a   : > { %v2438_v57 = vmul.f32 %v4010_v41, %v3452_v31  ;;  %v4022_v31 = vpop.eup %4021 }
 0x38c   : > { %v2457_v30 = vpack.c.bf16 %v2438_v57, %v2437_v48  ;;  %v3453_v5 = vpop.f32.mrb[132].mxu1  ;;  %v6274_v48 = vpack.c.bf16 %v5448_v40, %v5425_v26 }
 0x38d   : > { %v3454_v35 = vpop.f32.mrb[133].mxu1  ;;  %v2482_v9 = vpop.permute.xlu1 %2481 }
 0x38e   : > { %v3455_v22 = vadd.f32 %v3454_v35, %v3453_v5  ;;  %v3456_v58 = vpop.f32.mrb[134].mxu1  ;;  %v2517_v15 = vsel %vm468_vm0, %v6271_v24, %v2482_v9  ;;  %v6275_v5 = vpack.c.bf16 %v5458_v63, %v5444_v62  ;;  %v6277_v62 = vpack.c.bf16 %v5484_v52, %v5478_v16 }
 0x38f   : > { %v3457_v44 = vpop.f32.mrb[135].mxu1  ;;  %3503 = vmatprep.mubr.msk.bf16.mxu0 %vm2595_vm1, %v2517_v15 }
 0x390   : > { %v3458_v47 = vadd.f32 %v3457_v44, %v3456_v58  ;;  %v2439_v0 = vmul.f32 %v4012_v1, %v3455_v22  ;;  %v6279_v1 = vpack.c.bf16 %v5509_v29, %v5511_v45  ;;  %v6282_v45 = vld [vmem:[#allocation21_spill] sm:$0xff] }
 0x392   : > { %v2440_v12 = vmul.f32 %v4014_v23, %v3458_v47 }
 0x393   : > { %2493 = vrot.lane.b32.xlu1 %v2453_v53, %s4109_s13 }
 0x394   : > { %v2458_v8 = vpack.c.bf16 %v2440_v12, %v2439_v0  ;;  %v3459_v42 = vpop.f32.mrb[136].mxu1  ;;  %v6283_v12 = vld [vmem:[#allocation20_spill] sm:$0xff] }
 0x395   : > { %v3460_v25 = vpop.f32.mrb[137].mxu1  ;;  %v2484_v49 = vpop.permute.xlu0 %2483 }
 0x396   : > { %v3461_v55 = vadd.f32 %v3460_v25, %v3459_v42  ;;  %v3462_v4 = vpop.f32.mrb[138].mxu1  ;;  %v2520_v2 = vsel %vm468_vm0, %v6272_v37, %v2484_v49  ;;  %v6288_v49 = vld [vmem:[#allocation23_spill] sm:$0xff] }
 0x397   : > { %v3463_v60 = vpop.f32.mrb[139].mxu1  ;;  %2497 = vrot.lane.b32.xlu1 %v2455_v54, %s4109_s13  ;;  %3504 = vmatmul.mubr.msk.bf16.gmra.mrb[116].mxu0 %vm2595_vm1, %v2520_v2 }
 0x398   : > { %v3464_v59 = vadd.f32 %v3463_v60, %v3462_v4  ;;  %v2441_v53 = vmul.f32 %v4016_v3, %v3461_v55  ;;  %v6285_v4 = vld [vmem:[#allocation57_spill] sm:$0xff]  ;;  %v6289_v3 = vpack.c.bf16 %v5631_v14, %v6288_v49 }
 0x39a   : > { %v2442_v34 = vmul.f32 %v4018_v10, %v3464_v59  ;;  %v5771_v10 = vld [vmem:[%s5934_s4] ss:$0 sm:$0xff] }
 0x39b   : > { %2495 = vrot.lane.b32.xlu0 %v2454_v36, %s4109_s13  ;;  %2499 = vrot.lane.b32.xlu1 %v2456_v27, %s4109_s13  ;;  %v6273_v36 = vpack.c.bf16 %v5441_v6, %v5414_v51  ;;  %v6276_v6 = vpack.c.bf16 %v5464_v7, %v5462_v19  ;;  %v6278_v19 = vpack.c.bf16 %v5498_v56, %v5496_v50  ;;  %v6280_v56 = vld [vmem:[#allocation19_spill] sm:$0xff] }
 0x39c   : > { %v2459_v61 = vpack.c.bf16 %v2442_v34, %v2441_v53  ;;  %v3465_v54 = vpop.f32.mrb[140].mxu1  ;;  %v6281_v0 = vpack.c.bf16 %v5515_v18, %v6280_v56 }
 0x39d   : > { %v3466_v38 = vpop.f32.mrb[141].mxu1 }
 0x39e   : > { %v3467_v21 = vadd.f32 %v3466_v38, %v3465_v54  ;;  %v3468_v11 = vpop.f32.mrb[142].mxu1 }
 0x39f   : > { %v3469_v17 = vpop.f32.mrb[143].mxu1  ;;  %2501 = vrot.lane.b32.xlu0 %v2457_v30, %s4109_s13  ;;  %2503 = vrot.lane.b32.xlu1 %v2458_v8, %s4109_s13  ;;  %v6284_v8 = vpack.c.bf16 %v6282_v45, %v6283_v12 }
 0x3a0   : > { %v3470_v39 = vadd.f32 %v3469_v17, %v3468_v11  ;;  %v2443_v46 = vmul.f32 %v4020_v13, %v3467_v21 }
 0x3a2   : > { %v2444_v43 = vmul.f32 %v4022_v31, %v3470_v39 }
 0x3a3   : > { %2505 = vrot.lane.b32.xlu0 %v2459_v61, %s4109_s13 }
 0x3a4   : > { %v2460_v33 = vpack.c.bf16 %v2444_v43, %v2443_v46 }
 0x3a6   : > { %2507 = vrot.lane.b32.xlu1 %v2460_v33, %s4109_s13 }
 0x3bf   : > { %v2486_v28 = vpop.permute.xlu1 %2485 }
 0x3c0   : > { %v2523_v27 = vsel %vm468_vm0, %v6273_v36, %v2486_v28 }
 0x3c1   : > { %3507 = vmatprep.mubr.msk.bf16.mxu0 %vm2595_vm1, %v2523_v27 }
 0x3c8   : > { %v2488_v41 = vpop.permute.xlu0 %2487 }
 0x3c9   : > { %v2526_v57 = vsel %vm468_vm0, %v6274_v48, %v2488_v41 }
 0x3ca   : > { %3508 = vmatmul.mubr.msk.bf16.gmra.mrb[120].mxu0 %vm2595_vm1, %v2526_v57 }
 0x3d0   : > { %v2490_v30 = vpop.permute.xlu1 %2489 }
 0x3d1   : > { %v2529_v35 = vsel %vm468_vm0, %v6275_v5, %v2490_v30 }
 0x3d2   : > { %3511 = vmatprep.mubr.msk.bf16.mxu0 %vm2595_vm1, %v2529_v35 }
 0x3d8   : > { %v2492_v51 = vpop.permute.xlu0 %2491 }
 0x3d9   : > { %v2532_v22 = vsel %vm468_vm0, %v6276_v6, %v2492_v51 }
 0x3da   : > { %3512 = vmatmul.mubr.msk.bf16.gmra.mrb[124].mxu0 %vm2595_vm1, %v2532_v22 }
 0x40f   : > { %v1090_v26 = vpop.xlane.xlu1 %1089 }
 0x410   : > { %4023 = vrcp.f32 %v1090_v26 }
 0x412   : > { %v1093_v40 = vpop.xlane.xlu0 %1092 }
 0x413   : > { %4025 = vrcp.f32 %v1093_v40  ;;  %v2494_v58 = vpop.permute.xlu1 %2493 }
 0x414   : > { %v2535_v63 = vsel %vm468_vm0, %v6277_v62, %v2494_v58 }
 0x415   : > { %3515 = vmatprep.mubr.msk.bf16.mxu0 %vm2595_vm1, %v2535_v63 }
 0x416   : > { %v2496_v44 = vpop.permute.xlu0 %2495 }
 0x417   : > { %v2538_v7 = vsel %vm468_vm0, %v6278_v19, %v2496_v44  ;;  %v2498_v9 = vpop.permute.xlu1 %2497 }
 0x418   : > { %v2541_v47 = vsel %vm468_vm0, %v6279_v1, %v2498_v9  ;;  %3516 = vmatmul.mubr.msk.bf16.gmra.mrb[128].mxu0 %vm2595_vm1, %v2538_v7 }
 0x419   : > { %3519 = vmatprep.mubr.msk.bf16.mxu0 %vm2595_vm1, %v2541_v47 }
 0x41a   : > { %v4024_v16 = vpop.eup %4023  ;;  %v2502_v15 = vpop.permute.xlu0 %2501 }
 0x41b   : > { %v2500_v52 = vpop.permute.xlu1 %2499  ;;  %v1445_v23 = vmul.f32 %v4024_v16, %v5533_v20  ;;  %v2547_v42 = vsel %vm468_vm0, %v6284_v8, %v2502_v15 }
 0x41c   : > { %v2544_v29 = vsel %vm468_vm0, %v6281_v0, %v2500_v52 }
 0x41d   : > { %v4026_v24 = vpop.eup %4025 }
 0x41e   : > { %v1446_v50 = vmul.f32 %v4026_v24, %v5535_v32  ;;  %v2506_v55 = vpop.permute.xlu0 %2505  ;;  %v6286_v32 = vld [vmem:[#allocation22_spill] sm:$0xff] }
 0x41f   : > { %v2504_v20 = vpop.permute.xlu1 %2503  ;;  %v6287_v60 = vpack.c.bf16 %v6285_v4, %v6286_v32  ;;  %v2553_v59 = vsel %vm468_vm0, %v6289_v3, %v2506_v55 }
 0x420   : > { %3520 = vmatmul.mubr.msk.bf16.gmra.mrb[132].mxu0 %vm2595_vm1, %v2544_v29  ;;  %v1462_v25 = vpack.c.bf16 %v1446_v50, %v1445_v23 }
 0x421   : > { %3523 = vmatprep.mubr.msk.bf16.mxu0 %vm2595_vm1, %v2547_v42  ;;  %v2550_v18 = vsel %vm468_vm0, %v6287_v60, %v2504_v20 }
 0x423   : > { %v2508_v37 = vpop.permute.xlu1 %2507 }
 0x424   : > { %v2556_v2 = vsel %vm468_vm0, %v1462_v25, %v2508_v37 }
 0x428   : > { %3524 = vmatmul.mubr.msk.bf16.gmra.mrb[136].mxu0 %vm2595_vm1, %v2550_v18 }
 0x429   : > { %3527 = vmatprep.mubr.msk.bf16.mxu0 %vm2595_vm1, %v2553_v59 }
 0x430   : > { %3528 = vmatmul.mubr.msk.bf16.gmra.mrb[140].mxu0 %vm2595_vm1, %v2556_v2 }
 0x45a   : > { %v3501_v14 = vpop.f32.mrb[112].mxu0 }
 0x45b   : > { %v2671_v53 = vadd.f32 %v3501_v14, %v5771_v10  ;;  %v2662_v34 = vpop.f32.mrb[113].mxu0 }
 0x45c   : > { %v2663_v61 = vadd.f32 %v5771_v10, %v2662_v34  ;;  %v3502_v54 = vpop.f32.mrb[114].mxu0 }
 0x45d   : > { %v3216_v38 = vpack.c.bf16 %v2671_v53, %v2671_v53  ;;  %v2674_v21 = vadd.f32 %v3502_v54, %v5771_v10  ;;  %v2665_v11 = vpop.f32.mrb[115].mxu0 }
 0x45e   : > { %v3214_v17 = vpack.c.bf16 %v2663_v61, %v2663_v61  ;;  %v2666_v13 = vadd.f32 %v5771_v10, %v2665_v11 }
 0x45f   : > { %2920 = vst.msk [vmem:[%s5779_s24 + $0x8] sm:$0xf] %vm2917_vm2, %v3216_v38  ;;  %v3217_v39 = vpack.c.bf16 %v2674_v21, %v2674_v21 }
 0x460   : > { %2918 = vst.msk [vmem:[%s5779_s24] sm:$0xf] %vm2917_vm2, %v3214_v17  ;;  %v3215_v31 = vpack.c.bf16 %v2666_v13, %v2666_v13 }
 0x461   : > { %2921 = vst.msk [vmem:[%s5779_s24 + $0xc] sm:$0xf] %vm2917_vm2, %v3217_v39 }
 0x462   : > { %2919 = vst.msk [vmem:[%s5779_s24 + $0x4] sm:$0xf] %vm2917_vm2, %v3215_v31 }
 0x46a   : > { %v3505_v46 = vpop.f32.mrb[116].mxu0 }
 0x46b   : > { %v2687_v43 = vadd.f32 %v3505_v46, %v5771_v10  ;;  %v2678_v33 = vpop.f32.mrb[117].mxu0 }
 0x46c   : > { %v2679_v28 = vadd.f32 %v5771_v10, %v2678_v33  ;;  %v3506_v36 = vpop.f32.mrb[118].mxu0 }
 0x46d   : > { %v3220_v27 = vpack.c.bf16 %v2687_v43, %v2687_v43  ;;  %v2690_v41 = vadd.f32 %v3506_v36, %v5771_v10  ;;  %v2681_v48 = vpop.f32.mrb[119].mxu0 }
 0x46e   : > { %v3218_v57 = vpack.c.bf16 %v2679_v28, %v2679_v28  ;;  %v2682_v30 = vadd.f32 %v5771_v10, %v2681_v48 }
 0x46f   : > { %2924 = vst.msk [vmem:[%s5779_s24 + $0x18] sm:$0xf] %vm2917_vm2, %v3220_v27  ;;  %v3221_v5 = vpack.c.bf16 %v2690_v41, %v2690_v41 }
 0x470   : > { %2922 = vst.msk [vmem:[%s5779_s24 + $0x10] sm:$0xf] %vm2917_vm2, %v3218_v57  ;;  %v3219_v35 = vpack.c.bf16 %v2682_v30, %v2682_v30 }
 0x471   : > { %2925 = vst.msk [vmem:[%s5779_s24 + $0x1c] sm:$0xf] %vm2917_vm2, %v3221_v5 }
 0x472   : > { %2923 = vst.msk [vmem:[%s5779_s24 + $0x14] sm:$0xf] %vm2917_vm2, %v3219_v35 }
 0x49d   : > { %v3509_v51 = vpop.f32.mrb[120].mxu0 }
 0x49e   : > { %v2703_v6 = vadd.f32 %v3509_v51, %v5771_v10  ;;  %v2694_v22 = vpop.f32.mrb[121].mxu0 }
 0x49f   : > { %v2695_v26 = vadd.f32 %v5771_v10, %v2694_v22  ;;  %v3510_v40 = vpop.f32.mrb[122].mxu0 }
 0x4a0   : > { %v3224_v58 = vpack.c.bf16 %v2703_v6, %v2703_v6  ;;  %v2706_v62 = vadd.f32 %v3510_v40, %v5771_v10  ;;  %v2697_v63 = vpop.f32.mrb[123].mxu0 }
 0x4a1   : > { %v3222_v44 = vpack.c.bf16 %v2695_v26, %v2695_v26  ;;  %v2698_v19 = vadd.f32 %v5771_v10, %v2697_v63 }
 0x4a2   : > { %2928 = vst.msk [vmem:[%s5779_s24 + $0x28] sm:$0xf] %vm2917_vm2, %v3224_v58  ;;  %v3225_v7 = vpack.c.bf16 %v2706_v62, %v2706_v62 }
 0x4a3   : > { %2926 = vst.msk [vmem:[%s5779_s24 + $0x20] sm:$0xf] %vm2917_vm2, %v3222_v44  ;;  %v3223_v9 = vpack.c.bf16 %v2698_v19, %v2698_v19 }
 0x4a4   : > { %2929 = vst.msk [vmem:[%s5779_s24 + $0x2c] sm:$0xf] %vm2917_vm2, %v3225_v7 }
 0x4a5   : > { %2927 = vst.msk [vmem:[%s5779_s24 + $0x24] sm:$0xf] %vm2917_vm2, %v3223_v9 }
 0x4ad   : > { %v3513_v1 = vpop.f32.mrb[124].mxu0 }
 0x4ae   : > { %v2719_v47 = vadd.f32 %v3513_v1, %v5771_v10  ;;  %v2710_v16 = vpop.f32.mrb[125].mxu0 }
 0x4af   : > { %v2711_v52 = vadd.f32 %v5771_v10, %v2710_v16  ;;  %v3514_v24 = vpop.f32.mrb[126].mxu0 }
 0x4b0   : > { %v3228_v15 = vpack.c.bf16 %v2719_v47, %v2719_v47  ;;  %v2722_v23 = vadd.f32 %v3514_v24, %v5771_v10  ;;  %v2713_v50 = vpop.f32.mrb[127].mxu0 }
 0x4b1   : > { %v3226_v56 = vpack.c.bf16 %v2711_v52, %v2711_v52  ;;  %v2714_v0 = vadd.f32 %v5771_v10, %v2713_v50 }
 0x4b2   : > { %2932 = vst.msk [vmem:[%s5779_s24 + $0x38] sm:$0xf] %vm2917_vm2, %v3228_v15  ;;  %v3229_v29 = vpack.c.bf16 %v2722_v23, %v2722_v23 }
 0x4b3   : > { %2930 = vst.msk [vmem:[%s5779_s24 + $0x30] sm:$0xf] %vm2917_vm2, %v3226_v56  ;;  %v3227_v45 = vpack.c.bf16 %v2714_v0, %v2714_v0 }
 0x4b4   : > { %2933 = vst.msk [vmem:[%s5779_s24 + $0x3c] sm:$0xf] %vm2917_vm2, %v3229_v29 }
 0x4b5   : > { %2931 = vst.msk [vmem:[%s5779_s24 + $0x34] sm:$0xf] %vm2917_vm2, %v3227_v45 }
 0x4eb   : > { %v3517_v12 = vpop.f32.mrb[128].mxu0 }
 0x4ec   : > { %v2735_v8 = vadd.f32 %v3517_v12, %v5771_v10  ;;  %v2726_v42 = vpop.f32.mrb[129].mxu0 }
 0x4ed   : > { %v2727_v25 = vadd.f32 %v5771_v10, %v2726_v42  ;;  %v3518_v20 = vpop.f32.mrb[130].mxu0 }
 0x4ee   : > { %v3232_v55 = vpack.c.bf16 %v2735_v8, %v2735_v8  ;;  %v2738_v4 = vadd.f32 %v3518_v20, %v5771_v10  ;;  %v2729_v32 = vpop.f32.mrb[131].mxu0 }
 0x4ef   : > { %v3230_v60 = vpack.c.bf16 %v2727_v25, %v2727_v25  ;;  %v2730_v18 = vadd.f32 %v5771_v10, %v2729_v32 }
 0x4f0   : > { %2936 = vst.msk [vmem:[%s5779_s24 + $0x48] sm:$0xf] %vm2917_vm2, %v3232_v55  ;;  %v3233_v49 = vpack.c.bf16 %v2738_v4, %v2738_v4 }
 0x4f1   : > { %2934 = vst.msk [vmem:[%s5779_s24 + $0x40] sm:$0xf] %vm2917_vm2, %v3230_v60  ;;  %v3231_v3 = vpack.c.bf16 %v2730_v18, %v2730_v18 }
 0x4f2   : > { %2937 = vst.msk [vmem:[%s5779_s24 + $0x4c] sm:$0xf] %vm2917_vm2, %v3233_v49 }
 0x4f3   : > { %2935 = vst.msk [vmem:[%s5779_s24 + $0x44] sm:$0xf] %vm2917_vm2, %v3231_v3  ;;  %v3521_v59 = vpop.f32.mrb[132].mxu0 }
 0x4f4   : > { %v2751_v37 = vadd.f32 %v3521_v59, %v5771_v10  ;;  %v2742_v2 = vpop.f32.mrb[133].mxu0 }
 0x4f5   : > { %v2743_v14 = vadd.f32 %v5771_v10, %v2742_v2  ;;  %v3522_v53 = vpop.f32.mrb[134].mxu0 }
 0x4f6   : > { %v3236_v34 = vpack.c.bf16 %v2751_v37, %v2751_v37  ;;  %v2754_v61 = vadd.f32 %v3522_v53, %v5771_v10  ;;  %v2745_v54 = vpop.f32.mrb[135].mxu0 }
 0x4f7   : > { %v3234_v38 = vpack.c.bf16 %v2743_v14, %v2743_v14  ;;  %v2746_v21 = vadd.f32 %v5771_v10, %v2745_v54 }
 0x4f8   : > { %2940 = vst.msk [vmem:[%s5779_s24 + $0x58] sm:$0xf] %vm2917_vm2, %v3236_v34  ;;  %v3237_v11 = vpack.c.bf16 %v2754_v61, %v2754_v61 }
 0x4f9   : > { %2938 = vst.msk [vmem:[%s5779_s24 + $0x50] sm:$0xf] %vm2917_vm2, %v3234_v38  ;;  %v3235_v17 = vpack.c.bf16 %v2746_v21, %v2746_v21 }
 0x4fa   : > { %2941 = vst.msk [vmem:[%s5779_s24 + $0x5c] sm:$0xf] %vm2917_vm2, %v3237_v11 }
 0x4fb   : > { %2939 = vst.msk [vmem:[%s5779_s24 + $0x54] sm:$0xf] %vm2917_vm2, %v3235_v17  ;;  %v3525_v13 = vpop.f32.mrb[136].mxu0 }
 0x4fc   : > { %v2767_v39 = vadd.f32 %v3525_v13, %v5771_v10  ;;  %v2758_v31 = vpop.f32.mrb[137].mxu0 }
 0x4fd   : > { %v2759_v46 = vadd.f32 %v5771_v10, %v2758_v31  ;;  %v3526_v43 = vpop.f32.mrb[138].mxu0 }
 0x4fe   : > { %v3240_v33 = vpack.c.bf16 %v2767_v39, %v2767_v39  ;;  %v2770_v28 = vadd.f32 %v3526_v43, %v5771_v10  ;;  %v2761_v36 = vpop.f32.mrb[139].mxu0 }
 0x4ff   : > { %v3238_v27 = vpack.c.bf16 %v2759_v46, %v2759_v46  ;;  %v2762_v41 = vadd.f32 %v5771_v10, %v2761_v36 }
 0x500   : > { %2944 = vst.msk [vmem:[%s5779_s24 + $0x68] sm:$0xf] %vm2917_vm2, %v3240_v33  ;;  %v3241_v48 = vpack.c.bf16 %v2770_v28, %v2770_v28 }
 0x501   : > { %2942 = vst.msk [vmem:[%s5779_s24 + $0x60] sm:$0xf] %vm2917_vm2, %v3238_v27  ;;  %v3239_v57 = vpack.c.bf16 %v2762_v41, %v2762_v41 }
 0x502   : > { %2945 = vst.msk [vmem:[%s5779_s24 + $0x6c] sm:$0xf] %vm2917_vm2, %v3241_v48 }
 0x503   : > { %2943 = vst.msk [vmem:[%s5779_s24 + $0x64] sm:$0xf] %vm2917_vm2, %v3239_v57  ;;  %v3529_v30 = vpop.f32.mrb[140].mxu0 }
 0x504   : > { %v2783_v5 = vadd.f32 %v3529_v30, %v5771_v10  ;;  %v2774_v35 = vpop.f32.mrb[141].mxu0 }
 0x505   : > { %v2775_v51 = vadd.f32 %v5771_v10, %v2774_v35  ;;  %v3530_v6 = vpop.f32.mrb[142].mxu0 }
 0x506   : > { %v3244_v22 = vpack.c.bf16 %v2783_v5, %v2783_v5  ;;  %v2786_v26 = vadd.f32 %v3530_v6, %v5771_v10  ;;  %v2777_v40 = vpop.f32.mrb[143].mxu0 }
 0x507   : > { %v3242_v58 = vpack.c.bf16 %v2775_v51, %v2775_v51  ;;  %v2778_v62 = vadd.f32 %v5771_v10, %v2777_v40 }
 0x508   : > { %2948 = vst.msk [vmem:[%s5779_s24 + $0x78] sm:$0xf] %vm2917_vm2, %v3244_v22  ;;  %v3245_v63 = vpack.c.bf16 %v2786_v26, %v2786_v26 }
 0x509   : > { %2946 = vst.msk [vmem:[%s5779_s24 + $0x70] sm:$0xf] %vm2917_vm2, %v3242_v58  ;;  %v3243_v44 = vpack.c.bf16 %v2778_v62, %v2778_v62 }
 0x50a   : > { %2949 = vst.msk [vmem:[%s5779_s24 + $0x7c] sm:$0xf] %vm2917_vm2, %v3245_v63 }
 0x50b   : > { %2947 = vst.msk [vmem:[%s5779_s24 + $0x74] sm:$0xf] %vm2917_vm2, %v3243_v44 }
 0x50c   : > { %4040 = shalt.err (!%p4037_p5)
}
 0x50d   : > { %s4041_s13 = scalar_lea.hbm %s5872_s8, 2048  ;;  %s4045_s16 = scalar_lea.hbm %s5935_s5, 4096 }
 0x50e   : > { %p4042_p6 = scmp.ne.s32.totalorder %s5872_s8, %s4041_s13  ;;  %p4046_p10 = scmp.lt.u32.totalorder %s5872_s8, %s5935_s5 }
 0x50f   : > { %p4047_p11 = scmp.lt.u32.totalorder %s4045_s16, %s4041_s13  ;;  %p4049_p13 = scmp.lt.u32.totalorder %s4041_s13, %s5872_s8 }
 0x510   : > { %p4043_p7 = pnand %p4042_p6, %p4183_p4 }
 0x511   : > { %p4048_p12 = por %p4047_p11, %p4046_p10 }
 0x512   : > { %p4044_p9 = pneg %p4043_p7 }
 0x513   : > { %p4050_p0 = por %p4049_p13, %p4048_p12 }
 0x515   : > { %p4051_p1 = pnand %p4050_p0, %p4044_p9 }
 0x517   : > { %4054 = shalt.err (!%p4051_p1)
}
 0x518   : > { %s4111_s25 = smov 64   ;;  %s4112_s29 = smov 4  }
 0x519   : > { %3535 = dma.vmem_to_hbm [thread:$0]  (%p4183_p4), %s5874_s27, 2048, %s5872_s8, %s5884_s21, %s4111_s25, %s4111_s25, %s4112_s29  }
 0x51a PF: > { %p3541_p2 = scmp.ge.s32.totalorder %s4105_s23, 2  ;;  %s2981_s7 = sand.u32 1, %s4085_s18  }
 0x51b   : > { %s2982_s9 = scalar_lea.sflag [#allocation3], %s2981_s7 }
 0x51c   : > { %p3538_p3 = pnand %p3541_p2, %p4190_p8 }
 0x51e   : > { %4080 = dma.done.wait (!%p3538_p3), %s2982_s9, 2048  }
 0x51f   : > { %4082 = vsyncadd (!%p3538_p3), %s2982_s9, 4294965248  ;;  %s18_s23 = sadd.s32 1, %s4105_s23   ;;  %s6290_s18 = smov %s4089_s19 }
 0x520   : > { %p15_p5 = scmp.ge.s32.totalorder %s18_s23, 4   ;;  %s6291_s19 = smov %s4093_s20 }
 0x521   : > { %s6292_s20 = smov %s4196_s6  ;;  %s6293_s21 = smov %s4101_s22 }
 0x522   : > { %s6294_s22 = smov %s6296_s26  ;;  %17 = sbr.rel (!%p15_p5) target bundleno = 4 (0x4), region = 81 }
 0x529   :  { %2987 = vsyncpa [#allocation3], 1 }
 0x52a   :  { %2989 = vsyncpa [#allocation3 + $0x1], 1 }

</bundles_post_ra>
